<compile_context>
chip_gen: v5e
topology: v5e:2x2
jax: 0.10.0
libtpu: 0.0.40
codegen_flags: <defaults>
</compile_context>

<pallas_src>
from functools import lru_cache

import jax
import jax.numpy as jnp
from jax.experimental import pallas as pl
from jax.experimental.pallas import tpu as pltpu

INPUT_DIM = 300
H1 = 256
H2 = 128
OUT = 64


def query_tower_kernel(x_ref, w1_ref, b1_ref, w2_ref, b2_ref, w3_ref, b3_ref,
                       o_ref):
    # Layer 1: Linear(300 -> 256) + ReLU.  bf16 operands, f32 MXU accumulation.
    # (Dropout(0.2) is identity at inference and is not materialized.)
    h = jnp.dot(x_ref[...], w1_ref[...], preferred_element_type=jnp.float32)
    h = jnp.maximum(h + b1_ref[...], 0.0)

    # Layer 2: Linear(256 -> 128) + ReLU
    h = jnp.dot(h.astype(jnp.bfloat16), w2_ref[...],
                preferred_element_type=jnp.float32)
    h = jnp.maximum(h + b2_ref[...], 0.0)

    # Layer 3: Linear(128 -> 64)
    h = jnp.dot(h.astype(jnp.bfloat16), w3_ref[...],
                preferred_element_type=jnp.float32)
    h = h + b3_ref[...]

    # F.normalize(p=2, dim=1): h / max(||h||, 1e-12)
    #                        == h * rsqrt(max(||h||^2, 1e-24))
    sumsq = jnp.sum(h * h, axis=1, keepdims=True)
    o_ref[...] = h * jax.lax.rsqrt(jnp.maximum(sumsq, 1e-24))


def _default_batch_tile(B: int) -> int:
    """Largest multiple-of-8 divisor of B that is <= min(1024, B // 2).

    Keeps the grid at >= 2 steps (pipelining + both v7x TensorCores busy)
    whenever the batch allows it; otherwise falls back to the full batch
    (a full-extent block is always layout-legal)."""
    cap = min(1024, B // 2)
    cap -= cap % 8
    for t in range(cap, 7, -8):
        if B % t == 0:
            return t
    return B


@lru_cache(maxsize=None)
def _make_call(B: int, tb: int, single_buffer_weights: bool):
    def const_spec(shape):
        idx = lambda *_: (0,) * len(shape)
        if single_buffer_weights:
            # Constant across the grid -> no double buffering needed.
            return pl.BlockSpec(shape, idx, pipeline_mode=pl.Buffered(1))
        return pl.BlockSpec(shape, idx)

    matmul_flops = 2 * B * (INPUT_DIM * H1 + H1 * H2 + H2 * OUT)
    cost = pl.CostEstimate(
        flops=matmul_flops,
        transcendentals=B,  # one rsqrt per row
        bytes_accessed=(B * INPUT_DIM * 2            # bf16 x
                        + B * OUT * 4                # f32 out
                        + (INPUT_DIM * H1 + H1 * H2 + H2 * OUT) * 2  # bf16 W
                        + (H1 + H2 + OUT) * 4),      # f32 biases
    )

    return pl.pallas_call(
        query_tower_kernel,
        out_shape=jax.ShapeDtypeStruct((B, OUT), jnp.float32),
        grid_spec=pltpu.PrefetchScalarGridSpec(
            num_scalar_prefetch=0,
            grid=(B // tb,),
            in_specs=[
                pl.BlockSpec((tb, INPUT_DIM), lambda i: (i, 0)),  # x tile
                const_spec((INPUT_DIM, H1)), const_spec((1, H1)),
                const_spec((H1, H2)), const_spec((1, H2)),
                const_spec((H2, OUT)), const_spec((1, OUT)),
            ],
            out_specs=pl.BlockSpec((tb, OUT), lambda i: (i, 0)),
        ),
        compiler_params=pltpu.CompilerParams(
            dimension_semantics=("parallel",),
            # Above v5e's 16 MiB default scoped window; well under v7x's
            # 64 MiB physical VMEM.  Leaves room to sweep tb upward.
            vmem_limit_bytes=32 * 1024 * 1024,
        ),
        cost_estimate=cost,
    )


def query_tower(x, params, *, batch_tile=None):
    """x: (B, INPUT_DIM) float32. Returns (B, OUT) float32, L2-normalized rows."""
    w1, b1, w2, b2, w3, b3 = params
    B = x.shape[0]
    tb = batch_tile if batch_tile is not None else _default_batch_tile(B)
    assert B % tb == 0, f"batch {B} must be divisible by batch_tile {tb}"
    assert tb == B or tb % 8 == 0, "batch_tile must be a multiple of 8"

    # bf16 operands for the MXU (f32 accumulation inside the kernel);
    # halves the x DMA bytes.  Biases stay f32.
    x_bf = x.astype(jnp.bfloat16)
    w1_bf, w2_bf, w3_bf = (w.astype(jnp.bfloat16) for w in (w1, w2, w3))
    args = (x_bf, w1_bf, b1, w2_bf, b2, w3_bf, b3)

    try:
        return _make_call(B, tb, True)(*args)
    except Exception:
        # Some jax versions reject pipeline_mode=pl.Buffered(1) on a top-level
        # pallas_call BlockSpec; fall back to default (double) buffering.
        return _make_call(B, tb, False)(*args)


def init_params(key):
    """Deterministic synthetic parameters (shapes match the nn.Linear layers)."""
    ks = jax.random.split(key, 6)

    def lin(kw, kb, fan_in, fan_out):
        bound = 1.0 / jnp.sqrt(fan_in)
        w = jax.random.uniform(kw, (fan_in, fan_out), jnp.float32, -bound, bound)
        b = jax.random.uniform(kb, (1, fan_out), jnp.float32, -bound, bound)
        return w, b

    w1, b1 = lin(ks[0], ks[1], INPUT_DIM, H1)
    w2, b2 = lin(ks[2], ks[3], H1, H2)
    w3, b3 = lin(ks[4], ks[5], H2, OUT)
    return (w1, b1, w2, b2, w3, b3)


def reference(x, params):
    """Pure-JAX f32 reference (PyTorch eval-mode semantics)."""
    w1, b1, w2, b2, w3, b3 = params
    h = jnp.maximum(x @ w1 + b1, 0.0)
    h = jnp.maximum(h @ w2 + b2, 0.0)
    h = h @ w3 + b3
    n = jnp.sqrt(jnp.sum(h * h, axis=1, keepdims=True))
    return h / jnp.maximum(n, 1e-12)


if __name__ == "__main__":
    key = jax.random.PRNGKey(0)
    k_x, k_p = jax.random.split(key)
    B = 256  # default tiling -> tb=128, grid=(2,)
    x = jax.random.normal(k_x, (B, INPUT_DIM), dtype=jnp.float32)
    params = init_params(k_p)

    out = jax.block_until_ready(query_tower(x, params))
    ref = reference(x, params)

    assert out.shape == (B, OUT)
    assert bool(jnp.all(jnp.isfinite(out)))
    # bf16 matmul operands (f32 accumulation) vs. the pure-f32 reference.
    assert float(jnp.max(jnp.abs(out - ref))) < 2e-2, "mismatch vs reference"
    # Rows must be unit-norm after F.normalize.
    assert float(jnp.max(jnp.abs(jnp.linalg.norm(out, axis=1) - 1.0))) < 1e-3
    print("KERNEL_OK")
</pallas_src>

<mosaic_0001>
module attributes {stable_mosaic.version = 11 : i64} {
  func.func @query_tower_kernel(%arg0: i32, %arg1: memref<128x300xbf16, #tpu.memory_space<vmem>>, %arg2: memref<300x256xbf16, #tpu.memory_space<vmem>>, %arg3: memref<1x256xf32, #tpu.memory_space<vmem>>, %arg4: memref<256x128xbf16, #tpu.memory_space<vmem>>, %arg5: memref<1x128xf32, #tpu.memory_space<vmem>>, %arg6: memref<128x64xbf16, #tpu.memory_space<vmem>>, %arg7: memref<1x64xf32, #tpu.memory_space<vmem>>, %arg8: memref<128x64xf32, #tpu.memory_space<vmem>>) attributes {dimension_semantics = [#tpu.dimension_semantics<parallel>], iteration_bounds = array<i64: 2>, scalar_prefetch = 0 : i64, scratch_operands = 0 : i64, tpu.core_type = #tpu.core_type<tc>, window_params = [{transform_indices = @transform_0, window_bounds = array<i64: 128, 300>}, {pipeline_mode = #tpu.pipeline_mode<synchronous>, transform_indices = @transform_1, window_bounds = array<i64: 300, 256>}, {pipeline_mode = #tpu.pipeline_mode<synchronous>, transform_indices = @transform_2, window_bounds = array<i64: 1, 256>}, {pipeline_mode = #tpu.pipeline_mode<synchronous>, transform_indices = @transform_3, window_bounds = array<i64: 256, 128>}, {pipeline_mode = #tpu.pipeline_mode<synchronous>, transform_indices = @transform_4, window_bounds = array<i64: 1, 128>}, {pipeline_mode = #tpu.pipeline_mode<synchronous>, transform_indices = @transform_5, window_bounds = array<i64: 128, 64>}, {pipeline_mode = #tpu.pipeline_mode<synchronous>, transform_indices = @transform_6, window_bounds = array<i64: 1, 64>}, {transform_indices = @transform_7, window_bounds = array<i64: 128, 64>}]} {
    %c0 = arith.constant 0 : index
    %c0_0 = arith.constant 0 : index
    %0 = vector.load %arg1[%c0, %c0_0] : memref<128x300xbf16, #tpu.memory_space<vmem>>, vector<128x300xbf16>
    %c0_1 = arith.constant 0 : index
    %c0_2 = arith.constant 0 : index
    %1 = vector.load %arg2[%c0_1, %c0_2] : memref<300x256xbf16, #tpu.memory_space<vmem>>, vector<300x256xbf16>
    %cst = arith.constant dense<0.000000e+00> : vector<128x256xf32>
    %2 = tpu.matmul %0, %1, %cst {dimension_numbers = #tpu.dot_dimension_numbers<[1], [0], [0], [1], [0, 0, 1, 1], [], []>} : vector<128x300xbf16>, vector<300x256xbf16>, vector<128x256xf32> -> vector<128x256xf32>
    %c0_3 = arith.constant 0 : index
    %c0_4 = arith.constant 0 : index
    %3 = vector.load %arg3[%c0_3, %c0_4] : memref<1x256xf32, #tpu.memory_space<vmem>>, vector<1x256xf32>
    %4 = vector.broadcast %3 : vector<1x256xf32> to vector<128x256xf32>
    %5 = arith.addf %2, %4 : vector<128x256xf32>
    %cst_5 = arith.constant 0.000000e+00 : f32
    %6 = vector.broadcast %cst_5 : f32 to vector<128x256xf32>
    %7 = arith.maximumf %5, %6 : vector<128x256xf32>
    %8 = arith.truncf %7 : vector<128x256xf32> to vector<128x256xbf16>
    %c0_6 = arith.constant 0 : index
    %c0_7 = arith.constant 0 : index
    %9 = vector.load %arg4[%c0_6, %c0_7] : memref<256x128xbf16, #tpu.memory_space<vmem>>, vector<256x128xbf16>
    %cst_8 = arith.constant dense<0.000000e+00> : vector<128x128xf32>
    %10 = tpu.matmul %8, %9, %cst_8 {dimension_numbers = #tpu.dot_dimension_numbers<[1], [0], [0], [1], [0, 0, 1, 1], [], []>} : vector<128x256xbf16>, vector<256x128xbf16>, vector<128x128xf32> -> vector<128x128xf32>
    %c0_9 = arith.constant 0 : index
    %c0_10 = arith.constant 0 : index
    %11 = vector.load %arg5[%c0_9, %c0_10] : memref<1x128xf32, #tpu.memory_space<vmem>>, vector<1x128xf32>
    %12 = vector.broadcast %11 : vector<1x128xf32> to vector<128x128xf32>
    %13 = arith.addf %10, %12 : vector<128x128xf32>
    %cst_11 = arith.constant 0.000000e+00 : f32
    %14 = vector.broadcast %cst_11 : f32 to vector<128x128xf32>
    %15 = arith.maximumf %13, %14 : vector<128x128xf32>
    %16 = arith.truncf %15 : vector<128x128xf32> to vector<128x128xbf16>
    %c0_12 = arith.constant 0 : index
    %c0_13 = arith.constant 0 : index
    %17 = vector.load %arg6[%c0_12, %c0_13] : memref<128x64xbf16, #tpu.memory_space<vmem>>, vector<128x64xbf16>
    %cst_14 = arith.constant dense<0.000000e+00> : vector<128x64xf32>
    %18 = tpu.matmul %16, %17, %cst_14 {dimension_numbers = #tpu.dot_dimension_numbers<[1], [0], [0], [1], [0, 0, 1, 1], [], []>} : vector<128x128xbf16>, vector<128x64xbf16>, vector<128x64xf32> -> vector<128x64xf32>
    %c0_15 = arith.constant 0 : index
    %c0_16 = arith.constant 0 : index
    %19 = vector.load %arg7[%c0_15, %c0_16] : memref<1x64xf32, #tpu.memory_space<vmem>>, vector<1x64xf32>
    %20 = vector.broadcast %19 : vector<1x64xf32> to vector<128x64xf32>
    %21 = arith.addf %18, %20 : vector<128x64xf32>
    %22 = arith.mulf %21, %21 : vector<128x64xf32>
    %cst_17 = arith.constant dense<0.000000e+00> : vector<128xf32>
    %23 = vector.multi_reduction <add>, %22, %cst_17 [1] : vector<128x64xf32> to vector<128xf32>
    %24 = vector.shape_cast %23 : vector<128xf32> to vector<128x1xf32>
    %cst_18 = arith.constant 1.000000e-24 : f32
    %25 = vector.broadcast %cst_18 : f32 to vector<128x1xf32>
    %26 = arith.maximumf %24, %25 : vector<128x1xf32>
    %27 = math.rsqrt %26 : vector<128x1xf32>
    %28 = vector.broadcast %27 : vector<128x1xf32> to vector<128x64xf32>
    %29 = arith.mulf %21, %28 : vector<128x64xf32>
    %c0_19 = arith.constant 0 : index
    %c0_20 = arith.constant 0 : index
    %30 = vector.load %arg8[%c0_19, %c0_20] : memref<128x64xf32, #tpu.memory_space<vmem>>, vector<128x64xf32>
    tpu.vector_store %arg8[%c0_19, %c0_20], %29 {strides = array<i32>} : memref<128x64xf32, #tpu.memory_space<vmem>>, vector<128x64xf32>,
    return
  }
  func.func @transform_0(%arg0: i32) -> (i32, i32) {
    %c0_i32 = arith.constant 0 : i32
    %c0_i32_0 = arith.constant 0 : i32
    return %arg0, %c0_i32 : i32, i32
  }
  func.func @transform_1(%arg0: i32) -> (i32, i32) {
    %c0_i32 = arith.constant 0 : i32
    %c0_i32_0 = arith.constant 0 : i32
    %c0_i32_1 = arith.constant 0 : i32
    return %c0_i32, %c0_i32_0 : i32, i32
  }
  func.func @transform_2(%arg0: i32) -> (i32, i32) {
    %c0_i32 = arith.constant 0 : i32
    %c0_i32_0 = arith.constant 0 : i32
    %c0_i32_1 = arith.constant 0 : i32
    return %c0_i32, %c0_i32_0 : i32, i32
  }
  func.func @transform_3(%arg0: i32) -> (i32, i32) {
    %c0_i32 = arith.constant 0 : i32
    %c0_i32_0 = arith.constant 0 : i32
    %c0_i32_1 = arith.constant 0 : i32
    return %c0_i32, %c0_i32_0 : i32, i32
  }
  func.func @transform_4(%arg0: i32) -> (i32, i32) {
    %c0_i32 = arith.constant 0 : i32
    %c0_i32_0 = arith.constant 0 : i32
    %c0_i32_1 = arith.constant 0 : i32
    return %c0_i32, %c0_i32_0 : i32, i32
  }
  func.func @transform_5(%arg0: i32) -> (i32, i32) {
    %c0_i32 = arith.constant 0 : i32
    %c0_i32_0 = arith.constant 0 : i32
    %c0_i32_1 = arith.constant 0 : i32
    return %c0_i32, %c0_i32_0 : i32, i32
  }
  func.func @transform_6(%arg0: i32) -> (i32, i32) {
    %c0_i32 = arith.constant 0 : i32
    %c0_i32_0 = arith.constant 0 : i32
    %c0_i32_1 = arith.constant 0 : i32
    return %c0_i32, %c0_i32_0 : i32, i32
  }
  func.func @transform_7(%arg0: i32) -> (i32, i32) {
    %c0_i32 = arith.constant 0 : i32
    %c0_i32_0 = arith.constant 0 : i32
    return %arg0, %c0_i32 : i32, i32
  }
}

module attributes {stable_mosaic.version = 11 : i64} {
  func.func @query_tower_kernel(%arg0: i32, %arg1: memref<128x300xbf16, #tpu.memory_space<vmem>>, %arg2: memref<300x256xbf16, #tpu.memory_space<vmem>>, %arg3: memref<1x256xf32, #tpu.memory_space<vmem>>, %arg4: memref<256x128xbf16, #tpu.memory_space<vmem>>, %arg5: memref<1x128xf32, #tpu.memory_space<vmem>>, %arg6: memref<128x64xbf16, #tpu.memory_space<vmem>>, %arg7: memref<1x64xf32, #tpu.memory_space<vmem>>, %arg8: memref<128x64xf32, #tpu.memory_space<vmem>>) attributes {dimension_semantics = [#tpu.dimension_semantics<parallel>], iteration_bounds = array<i64: 2>, scalar_prefetch = 0 : i64, scratch_operands = 0 : i64, tpu.core_type = #tpu.core_type<tc>, window_params = [{transform_indices = @transform_0, window_bounds = array<i64: 128, 300>}, {pipeline_mode = #tpu.pipeline_mode<synchronous>, transform_indices = @transform_1, window_bounds = array<i64: 300, 256>}, {pipeline_mode = #tpu.pipeline_mode<synchronous>, transform_indices = @transform_2, window_bounds = array<i64: 1, 256>}, {pipeline_mode = #tpu.pipeline_mode<synchronous>, transform_indices = @transform_3, window_bounds = array<i64: 256, 128>}, {pipeline_mode = #tpu.pipeline_mode<synchronous>, transform_indices = @transform_4, window_bounds = array<i64: 1, 128>}, {pipeline_mode = #tpu.pipeline_mode<synchronous>, transform_indices = @transform_5, window_bounds = array<i64: 128, 64>}, {pipeline_mode = #tpu.pipeline_mode<synchronous>, transform_indices = @transform_6, window_bounds = array<i64: 1, 64>}, {transform_indices = @transform_7, window_bounds = array<i64: 128, 64>}]} {
    %c0 = arith.constant 0 : index
    %c0_0 = arith.constant 0 : index
    %0 = vector.load %arg1[%c0, %c0_0] : memref<128x300xbf16, #tpu.memory_space<vmem>>, vector<128x300xbf16>
    %c0_1 = arith.constant 0 : index
    %c0_2 = arith.constant 0 : index
    %1 = vector.load %arg2[%c0_1, %c0_2] : memref<300x256xbf16, #tpu.memory_space<vmem>>, vector<300x256xbf16>
    %cst = arith.constant dense<0.000000e+00> : vector<128x256xf32>
    %2 = tpu.matmul %0, %1, %cst {dimension_numbers = #tpu.dot_dimension_numbers<[1], [0], [0], [1], [0, 0, 1, 1], [], []>} : vector<128x300xbf16>, vector<300x256xbf16>, vector<128x256xf32> -> vector<128x256xf32>
    %c0_3 = arith.constant 0 : index
    %c0_4 = arith.constant 0 : index
    %3 = vector.load %arg3[%c0_3, %c0_4] : memref<1x256xf32, #tpu.memory_space<vmem>>, vector<1x256xf32>
    %4 = vector.broadcast %3 : vector<1x256xf32> to vector<128x256xf32>
    %5 = arith.addf %2, %4 : vector<128x256xf32>
    %cst_5 = arith.constant 0.000000e+00 : f32
    %6 = vector.broadcast %cst_5 : f32 to vector<128x256xf32>
    %7 = arith.maximumf %5, %6 : vector<128x256xf32>
    %8 = arith.truncf %7 : vector<128x256xf32> to vector<128x256xbf16>
    %c0_6 = arith.constant 0 : index
    %c0_7 = arith.constant 0 : index
    %9 = vector.load %arg4[%c0_6, %c0_7] : memref<256x128xbf16, #tpu.memory_space<vmem>>, vector<256x128xbf16>
    %cst_8 = arith.constant dense<0.000000e+00> : vector<128x128xf32>
    %10 = tpu.matmul %8, %9, %cst_8 {dimension_numbers = #tpu.dot_dimension_numbers<[1], [0], [0], [1], [0, 0, 1, 1], [], []>} : vector<128x256xbf16>, vector<256x128xbf16>, vector<128x128xf32> -> vector<128x128xf32>
    %c0_9 = arith.constant 0 : index
    %c0_10 = arith.constant 0 : index
    %11 = vector.load %arg5[%c0_9, %c0_10] : memref<1x128xf32, #tpu.memory_space<vmem>>, vector<1x128xf32>
    %12 = vector.broadcast %11 : vector<1x128xf32> to vector<128x128xf32>
    %13 = arith.addf %10, %12 : vector<128x128xf32>
    %cst_11 = arith.constant 0.000000e+00 : f32
    %14 = vector.broadcast %cst_11 : f32 to vector<128x128xf32>
    %15 = arith.maximumf %13, %14 : vector<128x128xf32>
    %16 = arith.truncf %15 : vector<128x128xf32> to vector<128x128xbf16>
    %c0_12 = arith.constant 0 : index
    %c0_13 = arith.constant 0 : index
    %17 = vector.load %arg6[%c0_12, %c0_13] : memref<128x64xbf16, #tpu.memory_space<vmem>>, vector<128x64xbf16>
    %cst_14 = arith.constant dense<0.000000e+00> : vector<128x64xf32>
    %18 = tpu.matmul %16, %17, %cst_14 {dimension_numbers = #tpu.dot_dimension_numbers<[1], [0], [0], [1], [0, 0, 1, 1], [], []>} : vector<128x128xbf16>, vector<128x64xbf16>, vector<128x64xf32> -> vector<128x64xf32>
    %c0_15 = arith.constant 0 : index
    %c0_16 = arith.constant 0 : index
    %19 = vector.load %arg7[%c0_15, %c0_16] : memref<1x64xf32, #tpu.memory_space<vmem>>, vector<1x64xf32>
    %20 = vector.broadcast %19 : vector<1x64xf32> to vector<128x64xf32>
    %21 = arith.addf %18, %20 : vector<128x64xf32>
    %22 = arith.mulf %21, %21 : vector<128x64xf32>
    %cst_17 = arith.constant dense<0.000000e+00> : vector<128xf32>
    %23 = vector.multi_reduction <add>, %22, %cst_17 [1] : vector<128x64xf32> to vector<128xf32>
    %24 = vector.shape_cast %23 : vector<128xf32> to vector<128x1xf32>
    %cst_18 = arith.constant 1.000000e-24 : f32
    %25 = vector.broadcast %cst_18 : f32 to vector<128x1xf32>
    %26 = arith.maximumf %24, %25 : vector<128x1xf32>
    %27 = math.rsqrt %26 : vector<128x1xf32>
    %28 = vector.broadcast %27 : vector<128x1xf32> to vector<128x64xf32>
    %29 = arith.mulf %21, %28 : vector<128x64xf32>
    %c0_19 = arith.constant 0 : index
    %c0_20 = arith.constant 0 : index
    %30 = vector.load %arg8[%c0_19, %c0_20] : memref<128x64xf32, #tpu.memory_space<vmem>>, vector<128x64xf32>
    tpu.vector_store %arg8[%c0_19, %c0_20], %29 {strides = array<i32>} : memref<128x64xf32, #tpu.memory_space<vmem>>, vector<128x64xf32>,
    return
  }
  func.func @transform_0(%arg0: i32) -> (i32, i32) {
    %c0_i32 = arith.constant 0 : i32
    %c0_i32_0 = arith.constant 0 : i32
    return %arg0, %c0_i32 : i32, i32
  }
  func.func @transform_1(%arg0: i32) -> (i32, i32) {
    %c0_i32 = arith.constant 0 : i32
    %c0_i32_0 = arith.constant 0 : i32
    %c0_i32_1 = arith.constant 0 : i32
    return %c0_i32, %c0_i32_0 : i32, i32
  }
  func.func @transform_2(%arg0: i32) -> (i32, i32) {
    %c0_i32 = arith.constant 0 : i32
    %c0_i32_0 = arith.constant 0 : i32
    %c0_i32_1 = arith.constant 0 : i32
    return %c0_i32, %c0_i32_0 : i32, i32
  }
  func.func @transform_3(%arg0: i32) -> (i32, i32) {
    %c0_i32 = arith.constant 0 : i32
    %c0_i32_0 = arith.constant 0 : i32
    %c0_i32_1 = arith.constant 0 : i32
    return %c0_i32, %c0_i32_0 : i32, i32
  }
  func.func @transform_4(%arg0: i32) -> (i32, i32) {
    %c0_i32 = arith.constant 0 : i32
    %c0_i32_0 = arith.constant 0 : i32
    %c0_i32_1 = arith.constant 0 : i32
    return %c0_i32, %c0_i32_0 : i32, i32
  }
  func.func @transform_5(%arg0: i32) -> (i32, i32) {
    %c0_i32 = arith.constant 0 : i32
    %c0_i32_0 = arith.constant 0 : i32
    %c0_i32_1 = arith.constant 0 : i32
    return %c0_i32, %c0_i32_0 : i32, i32
  }
  func.func @transform_6(%arg0: i32) -> (i32, i32) {
    %c0_i32 = arith.constant 0 : i32
    %c0_i32_0 = arith.constant 0 : i32
    %c0_i32_1 = arith.constant 0 : i32
    return %c0_i32, %c0_i32_0 : i32, i32
  }
  func.func @transform_7(%arg0: i32) -> (i32, i32) {
    %c0_i32 = arith.constant 0 : i32
    %c0_i32_0 = arith.constant 0 : i32
    return %arg0, %c0_i32 : i32, i32
  }
}

</mosaic_0001>

<bundles_post_ra>
// kernel: tpu_custom_call.1
= control target key start
LH: loop header
LB: loop body
LE: loop exit
PB: predicated region body
PF: predicated region fallthrough
CT: control target
= control target key end

     0   :  { %s2311_s24 = smov 0   ;;  %s3077_s0 = inlined_call_operand.vmem [shape: bf16[256,300], index: 0, kind: input, shape index: {}]   ;;  %s3078_s1 = inlined_call_operand.vmem [shape: bf16[300,256], index: 1, kind: input, shape index: {}]   ;;  %s3079_s2 = inlined_call_operand.vmem [shape: f32[1,256], index: 2, kind: input, shape index: {}]   ;;  %s3080_s3 = inlined_call_operand.vmem [shape: bf16[256,128], index: 3, kind: input, shape index: {}]   ;;  %s3081_s4 = inlined_call_operand.vmem [shape: f32[1,128], index: 4, kind: input, shape index: {}]   ;;  %s3082_s5 = inlined_call_operand.vmem [shape: bf16[128,64], index: 5, kind: input, shape index: {}]   ;;  %s3083_s6 = inlined_call_operand.vmem [shape: f32[1,64], index: 6, kind: input, shape index: {}]   ;;  %s3084_s7 = inlined_call_operand.vmem [shape: f32[256,64], index: 7, kind: output, shape index: {}]  }
   0x1 LB: > { %s1744_s25 = sadd.s32 4294967295, %s2269_s24   ;;  %p1748_p0 = scmp.ge.s32.totalorder %s2269_s24, 1  ;;  %s2269_s24 = sphi %s2311_s24, %s17_s24  }
   0x2   : > { %p239_p1 = scmp.lt.s32.totalorder %s2269_s24, 3 }
   0x4   : > { %p240_p2 = pnand %p1748_p0, %p239_p1 }
   0x5   : > { %s1749_s23 = sshll.u32 (!%p240_p2), %s1744_s25, 4 }
   0x6   : > { %243 = sbr.rel (%p240_p2) target bundleno = 887 (0x377), region = 48  ;;  %p273_p3 = scmp.lt.s32.totalorder (!%p240_p2), %s1749_s23, 31 }
   0xb   : > { %v1907_v0 = vld [vmem:[%s3078_s1 + $0x70] sm:$0xf]  ;;  %v2154_v1 = vld [vmem:[%s3078_s1 + $0x74] sm:$0xf0]  ;;  %v1899_v2 = vld [vmem:[%s3078_s1 + $0x60] sm:$0xf] }
   0xc   : > { %v1908_v3 = vor.u32 %v2154_v1, %v1907_v0  ;;  %v2152_v4 = vld [vmem:[%s3078_s1 + $0x64] sm:$0xf0]  ;;  %v1891_v6 = vld [vmem:[%s3078_s1 + $0x50] sm:$0xf]  ;;  %v2150_v7 = vld [vmem:[%s3078_s1 + $0x54] sm:$0xf0] }
   0xd   : > { %v1900_v5 = vor.u32 %v2152_v4, %v1899_v2  ;;  %v1995_v8 = vld [vmem:[%s3078_s1 + $0x120] sm:$0xf]  ;;  %v1892_v9 = vor.u32 %v2150_v7, %v1891_v6  ;;  %v2176_v10 = vld [vmem:[%s3078_s1 + $0x124] sm:$0x30]  ;;  %vm695_vm0 = vcmask 1045504   ;;  %s3086_s23 = smov (!%p273_p3, %s1749_s23), 31 }
   0xe   : > { %702 = vmatpush.bf16.msra.mxu0 %v1908_v3  ;;  %2201 = vmatpush.bf16.msra.mxu1 %v1908_v3  ;;  %v1883_v11 = vld [vmem:[%s3078_s1 + $0x40] sm:$0xf]  ;;  %v2148_v12 = vld [vmem:[%s3078_s1 + $0x44] sm:$0xf0]  ;;  %v1996_v13 = vor.u32 %v2176_v10, %v1995_v8  ;;  %v1875_v16 = vld [vmem:[%s3078_s1 + $0x30] sm:$0xf] }
   0xf   : > { %2202 = vmatpush.bf16.msra.mxu3 %v1908_v3  ;;  %v1884_v14 = vor.u32 %v2148_v12, %v1883_v11  ;;  %v2146_v17 = vld [vmem:[%s3078_s1 + $0x34] sm:$0xf0]  ;;  %v1867_v19 = vld [vmem:[%s3078_s1 + $0x20] sm:$0xf]  ;;  %v2144_v20 = vld [vmem:[%s3078_s1 + $0x24] sm:$0xf0] }
  0x10   : > { %v697_v15 = vsel %vm695_vm0, %v1996_v13, 0  ;;  %v1876_v18 = vor.u32 %v2146_v17, %v1875_v16  ;;  %v1868_v21 = vor.u32 %v2144_v20, %v1867_v19  ;;  %s2220_s10 = smul.u32 12, %s3086_s23  ;;  %v1859_v22 = vld [vmem:[%s3078_s1 + $0x10] sm:$0xf]  ;;  %v2142_v23 = vld [vmem:[%s3078_s1 + $0x14] sm:$0xf0] }
  0x11   : > { %2217 = vmatpush.bf16.msra.mxu2 %v697_v15  ;;  %v1860_v24 = vor.u32 %v2142_v23, %v1859_v22  ;;  %v1851_v25 = vld [vmem:[%s3078_s1] sm:$0xf]  ;;  %v2140_v26 = vld [vmem:[%s3078_s1 + $0x4] sm:$0xf0]  ;;  %v1987_v27 = vld [vmem:[%s3078_s1 + $0x110] sm:$0xf] }
  0x12   : > { %703 = vmatpush.bf16.msra.mxu0 %v1900_v5  ;;  %2203 = vmatpush.bf16.msra.mxu1 %v1900_v5  ;;  %s2377_s19 = scalar_lea.vmem %s3077_s0, %s2220_s10  ;;  %v2174_v28 = vld [vmem:[%s3078_s1 + $0x114] sm:$0xf0]  ;;  %v1971_v29 = vld [vmem:[%s3078_s1 + $0xf0] sm:$0xf]  ;;  %v1852_v33 = vor.u32 %v2140_v26, %v1851_v25  ;;  %v1963_v38 = vld [vmem:[%s3078_s1 + $0xe0] sm:$0xf] }
  0x13   : > { %2204 = vmatpush.bf16.msra.mxu3 %v1900_v5  ;;  %v2170_v30 = vld [vmem:[%s3078_s1 + $0xf4] sm:$0xf0]  ;;  %v1755_v31 = vld [vmem:[%s2377_s19] sm:$0xf]  ;;  %v1988_v32 = vor.u32 %v2174_v28, %v1987_v27  ;;  %v2116_v34 = vld [vmem:[%s2377_s19 + $0x8] sm:$0xf0] }
  0x14   : > { %v1815_v35 = vld [vmem:[%s2377_s19 + $0x78] sm:$0xf]  ;;  %v2131_v36 = vld [vmem:[%s2377_s19 + $0x80] sm:$0xf0]  ;;  %v1972_v37 = vor.u32 %v2170_v30, %v1971_v29  ;;  %v2168_v39 = vld [vmem:[%s3078_s1 + $0xe4] sm:$0xf0]  ;;  %v2404_v40 = vor.u32 %v2116_v34, %v1755_v31 }
  0x15   : > { %2218 = vmatpush.bf16.msra.mxu2 %v1988_v32  ;;  %v2406_v41 = vor.u32 %v2131_v36, %v1815_v35  ;;  %v1964_v42 = vor.u32 %v2168_v39, %v1963_v38  ;;  %v1955_v43 = vld [vmem:[%s3078_s1 + $0xd0] sm:$0xf]  ;;  %v2166_v44 = vld [vmem:[%s3078_s1 + $0xd4] sm:$0xf0]  ;;  %v1947_v46 = vld [vmem:[%s3078_s1 + $0xc0] sm:$0xf] }
  0x16   : > { %704 = vmatpush.bf16.msra.mxu0 %v1892_v9  ;;  %2205 = vmatpush.bf16.msra.mxu1 %v1892_v9  ;;  %v1956_v45 = vor.u32 %v2166_v44, %v1955_v43  ;;  %v2164_v47 = vld [vmem:[%s3078_s1 + $0xc4] sm:$0xf0]  ;;  %v1939_v49 = vld [vmem:[%s3078_s1 + $0xb0] sm:$0xf]  ;;  %v2162_v50 = vld [vmem:[%s3078_s1 + $0xb4] sm:$0xf0] }
  0x17   : > { %2206 = vmatpush.bf16.msra.mxu3 %v1892_v9  ;;  %v1948_v48 = vor.u32 %v2164_v47, %v1947_v46  ;;  %v1767_v51 = vld [vmem:[%s2377_s19 + $0x18] sm:$0xf]  ;;  %v2119_v52 = vld [vmem:[%s2377_s19 + $0x20] sm:$0xf0]  ;;  %v1827_v53 = vld [vmem:[%s2377_s19 + $0x90] sm:$0xf]  ;;  %v1940_v57 = vor.u32 %v2162_v50, %v1939_v49 }
  0x18   : > { %v2134_v54 = vld [vmem:[%s2377_s19 + $0x98] sm:$0xf0]  ;;  %v2175_v55 = vld [vmem:[%s3078_s1 + $0x124] sm:$0xf]  ;;  %v1997_v56 = vld [vmem:[%s3078_s1 + $0x128] sm:$0x30]  ;;  %v2444_v60 = vor.u32 %v2119_v52, %v1767_v51 }
  0x19   : > { %v1931_v58 = vld [vmem:[%s3078_s1 + $0xa0] sm:$0xf]  ;;  %v2160_v59 = vld [vmem:[%s3078_s1 + $0xa4] sm:$0xf0]  ;;  %v2446_v61 = vor.u32 %v2134_v54, %v1827_v53  ;;  %v2000_v62 = vor.u32 %v2175_v55, %v1997_v56  ;;  %v1923_v0 = vld [vmem:[%s3078_s1 + $0x90] sm:$0xf] }
  0x1a   : > { %705 = vmatpush.bf16.msra.mxu0 %v1884_v14  ;;  %2207 = vmatpush.bf16.msra.mxu1 %v1884_v14  ;;  %v1932_v63 = vor.u32 %v2160_v59, %v1931_v58  ;;  %v2158_v1 = vld [vmem:[%s3078_s1 + $0x94] sm:$0xf0]  ;;  %v1979_v2 = vld [vmem:[%s3078_s1 + $0x100] sm:$0xf]  ;;  %v2172_v3 = vld [vmem:[%s3078_s1 + $0x104] sm:$0xf0] }
  0x1b   : > { %2208 = vmatpush.bf16.msra.mxu3 %v1884_v14  ;;  %v700_v4 = vsel %vm695_vm0, %v2000_v62, 0  ;;  %v1980_v5 = vor.u32 %v2172_v3, %v1979_v2  ;;  %v1924_v6 = vor.u32 %v2158_v1, %v1923_v0  ;;  %v1915_v7 = vld [vmem:[%s3078_s1 + $0x80] sm:$0xf]  ;;  %v2156_v8 = vld [vmem:[%s3078_s1 + $0x84] sm:$0xf0]  ;;  %vm670_vm1 = vcmask 359424  }
  0x1c   : > { %v1916_v9 = vor.u32 %v2156_v8, %v1915_v7  ;;  %v1779_v10 = vld [vmem:[%s2377_s19 + $0x30] sm:$0xf]  ;;  %v2122_v11 = vld [vmem:[%s2377_s19 + $0x38] sm:$0xf0]  ;;  %v2115_v12 = vld [vmem:[%s2377_s19 + $0x4] sm:$0xf] }
  0x1d   : > { %2219 = vmatpush.bf16.msra.mxu2 %v1980_v5  ;;  %v1757_v13 = vld [vmem:[%s2377_s19 + $0xc] sm:$0xf0]  ;;  %v2473_v14 = vor.u32 %v2122_v11, %v1779_v10  ;;  %v1791_v16 = vld [vmem:[%s2377_s19 + $0x48] sm:$0xf]  ;;  %v2125_v17 = vld [vmem:[%s2377_s19 + $0x50] sm:$0xf0] }
  0x1e   : > { %706 = vmatpush.bf16.msra.mxu0 %v1876_v18  ;;  %2209 = vmatpush.bf16.msra.mxu1 %v1876_v18  ;;  %v1769_v19 = vld [vmem:[%s2377_s19 + $0x24] sm:$0xf0]  ;;  %v2483_v20 = vor.u32 %v2125_v17, %v1791_v16  ;;  %v1803_v22 = vld [vmem:[%s2377_s19 + $0x60] sm:$0xf]  ;;  %v2128_v23 = vld [vmem:[%s2377_s19 + $0x68] sm:$0xf0] }
  0x1f   : > { %2210 = vmatpush.bf16.msra.mxu3 %v1876_v18  ;;  %v2118_v18 = vld [vmem:[%s2377_s19 + $0x1c] sm:$0xf]  ;;  %v1781_v25 = vld [vmem:[%s2377_s19 + $0x3c] sm:$0xf0]  ;;  %v2493_v26 = vor.u32 %v2128_v23, %v1803_v22  ;;  %v2132_v29 = vld [vmem:[%s2377_s19 + $0x88] sm:$0xf0] }
  0x20   : > { %v1823_v28 = vld [vmem:[%s2377_s19 + $0x80] sm:$0xf]  ;;  %v2169_v31 = vld [vmem:[%s3078_s1 + $0xf4] sm:$0xf]  ;;  %v1989_v35 = vld [vmem:[%s3078_s1 + $0x118] sm:$0xf0] }
  0x21   : > { %v2499_v30 = vor.u32 %v2132_v29, %v1823_v28  ;;  %v2167_v36 = vld [vmem:[%s3078_s1 + $0xe4] sm:$0xf]  ;;  %v2153_v39 = vld [vmem:[%s3078_s1 + $0x74] sm:$0xf]  ;;  %v1793_v46 = vld [vmem:[%s2377_s19 + $0x54] sm:$0xf0] }
  0x22   : > { %707 = vmatpush.bf16.msra.mxu0 %v1868_v21  ;;  %2211 = vmatpush.bf16.msra.mxu1 %v1868_v21  ;;  %v1763_v47 = vld [vmem:[%s2377_s19 + $0x8] sm:$0xf]  ;;  %v1835_v51 = vld [vmem:[%s2377_s19 + $0x98] sm:$0xf]  ;;  %v2135_v52 = vld [vmem:[%s2377_s19 + $0xa0] sm:$0xf0] }
  0x23   : > { %2212 = vmatpush.bf16.msra.mxu3 %v1868_v21  ;;  %v2485_v21 = vor.u32 %v2118_v18, %v1769_v19  ;;  %2006 = vmatmul.msk.bf16.vlgmr.msra.gmra.mxu2 %vm670_vm1, %v2499_v30  ;;  %v2539_v53 = vor.u32 %v2135_v52, %v1835_v51  ;;  %v2151_v54 = vld [vmem:[%s3078_s1 + $0x64] sm:$0xf]  ;;  %v1901_v55 = vld [vmem:[%s3078_s1 + $0x68] sm:$0xf0]  ;;  %v2165_v56 = vld [vmem:[%s3078_s1 + $0xd4] sm:$0xf] }
  0x24   : > { %v1957_v58 = vld [vmem:[%s3078_s1 + $0xd8] sm:$0xf0]  ;;  %v2149_v59 = vld [vmem:[%s3078_s1 + $0x54] sm:$0xf]  ;;  %v2163_v0 = vld [vmem:[%s3078_s1 + $0xc4] sm:$0xf] }
  0x25   : > { %v1893_v62 = vld [vmem:[%s3078_s1 + $0x58] sm:$0xf0]  ;;  %v1949_v1 = vld [vmem:[%s3078_s1 + $0xc8] sm:$0xf0]  ;;  %v2127_v7 = vld [vmem:[%s2377_s19 + $0x64] sm:$0xf] }
  0x26   : > { %708 = vmatpush.bf16.msra.mxu0 %v1860_v24  ;;  %2213 = vmatpush.bf16.msra.mxu1 %v1860_v24  ;;  %v1896_v2 = vor.u32 %v2149_v59, %v1893_v62  ;;  %v1952_v3 = vor.u32 %v2163_v0, %v1949_v1  ;;  %v1805_v8 = vld [vmem:[%s2377_s19 + $0x6c] sm:$0xf0]  ;;  %v2120_v10 = vld [vmem:[%s2377_s19 + $0x28] sm:$0xf0]  ;;  %v1839_v11 = vld [vmem:[%s2377_s19 + $0xa8] sm:$0xf] }
  0x27   : > { %2214 = vmatpush.bf16.msra.mxu3 %v1860_v24  ;;  %v2121_v24 = vld [vmem:[%s2377_s19 + $0x34] sm:$0xf]  ;;  %v1877_v19 = vld [vmem:[%s3078_s1 + $0x38] sm:$0xf0]  ;;  %v1847_v23 = vld [vmem:[%s2377_s19 + $0xb0] sm:$0xf] }
  0x28   : > { %v2495_v27 = vor.u32 %v2121_v24, %v1781_v25  ;;  %v2145_v18 = vld [vmem:[%s3078_s1 + $0x34] sm:$0xf]  ;;  %v2138_v24 = vld [vmem:[%s2377_s19 + $0xb8] sm:$0xf0]  ;;  %v1853_v51 = vld [vmem:[%s3078_s1 + $0x8] sm:$0xf0] }
  0x29   : > { %v1880_v22 = vor.u32 %v2145_v18, %v1877_v19  ;;  %v2597_v25 = vor.u32 %v2138_v24, %v1847_v23  ;;  %v2161_v28 = vld [vmem:[%s3078_s1 + $0xb4] sm:$0xf]  ;;  %v1941_v29 = vld [vmem:[%s3078_s1 + $0xb8] sm:$0xf0]  ;;  %v2155_v59 = vld [vmem:[%s3078_s1 + $0x84] sm:$0xf] }
  0x2a   : > { %709 = vmatpush.bf16.msra.mxu0 %v1852_v33  ;;  %2215 = vmatpush.bf16.msra.mxu1 %v1852_v33  ;;  %v2130_v52 = vld [vmem:[%s2377_s19 + $0x7c] sm:$0xf]  ;;  %v1917_v62 = vld [vmem:[%s3078_s1 + $0x88] sm:$0xf0]  ;;  %v1811_v18 = vld [vmem:[%s2377_s19 + $0x68] sm:$0xf] }
  0x2b   : > { %2216 = vmatpush.bf16.msra.mxu3 %v1852_v33  ;;  %v2173_v33 = vld [vmem:[%s3078_s1 + $0x114] sm:$0xf]  ;;  %vm1431_vm2 = vcmask 523264   ;;  %s1752_s8 = sshll.u32 %s3086_s23, 3 }
  0x2c   : > { %v1992_v38 = vor.u32 %v2173_v33, %v1989_v35  ;;  %v1869_v33 = vld [vmem:[%s3078_s1 + $0x28] sm:$0xf0]  ;;  %v2159_v35 = vld [vmem:[%s3078_s1 + $0xa4] sm:$0xf]  ;;  %s3024_s11 = scalar_lea.vmem %s3084_s7, %s1752_s8 }
  0x2d   : > { %710 = vmatmul.bf16.vlgmr.msra.gmra.mxu0 %v2404_v40  ;;  %735 = vmatmul.bf16.vlgmr.msra.gmra.mxu1 %v2406_v41 }
  0x2e   : > { %805 = vmatpush.bf16.msrb.mxu0 %v697_v15  ;;  %751 = vmatpush.bf16.msrb.mxu1 %v1972_v37  ;;  %v2475_v15 = vor.u32 %v2115_v12, %v1757_v13  ;;  %v1965_v37 = vld [vmem:[%s3078_s1 + $0xe8] sm:$0xf0]  ;;  %v2137_v12 = vld [vmem:[%s2377_s19 + $0xb0] sm:$0xf0]  ;;  %v2582_v13 = vor.u32 %v2127_v7, %v1805_v8 }
  0x2f   : > { %v1968_v43 = vor.u32 %v2167_v36, %v1965_v37  ;;  %v2586_v17 = vor.u32 %v2137_v12, %v1839_v11  ;;  %v1933_v36 = vld [vmem:[%s3078_s1 + $0xa8] sm:$0xf0]  ;;  %v1841_v12 = vld [vmem:[%s2377_s19 + $0xb4] sm:$0xf0] }
  0x30   : > { %v1936_v37 = vor.u32 %v2159_v35, %v1933_v36  ;;  %v2136_v11 = vld [vmem:[%s2377_s19 + $0xac] sm:$0xf] }
  0x31   : > { %745 = vmatmul.bf16.vlgmr.msra.gmra.mxu3 %v2586_v17  ;;  %v2693_v19 = vor.u32 %v2136_v11, %v1841_v12  ;;  %v2190_v35 = vld [vmem:[%s3080_s3 + $0x68] sm:$0xff] }
  0x32   : > { %752 = vmatpush.bf16.msrb.mxu1 %v1964_v42  ;;  %806 = vmatpush.bf16.msrb.mxu0 %v1988_v32  ;;  %v1973_v32 = vld [vmem:[%s3078_s1 + $0xf8] sm:$0xf0] }
  0x33   : > { %v1976_v34 = vor.u32 %v2169_v31, %v1973_v32  ;;  %v1909_v42 = vld [vmem:[%s3078_s1 + $0x78] sm:$0xf0]  ;;  %2007 = vmatmul.msk.bf16.gmra.mxu2 %vm670_vm1, %v2539_v53  ;;  %v1944_v31 = vor.u32 %v2161_v28, %v1941_v29  ;;  %v2143_v32 = vld [vmem:[%s3078_s1 + $0x24] sm:$0xf] }
  0x34   : > { %v1912_v44 = vor.u32 %v2153_v39, %v1909_v42  ;;  %v1861_v39 = vld [vmem:[%s3078_s1 + $0x18] sm:$0xf0] }
  0x35   : > { %898 = vmatpush.bf16.msrb.mxu2 %v1976_v34  ;;  %v1872_v34 = vor.u32 %v2143_v32, %v1869_v33  ;;  %v2183_v32 = vld [vmem:[%s3080_s3 + $0x30] sm:$0xff] }
  0x36   : > { %753 = vmatpush.bf16.msrb.mxu1 %v1956_v45  ;;  %807 = vmatpush.bf16.msrb.mxu0 %v1980_v5  ;;  %v2124_v45 = vld [vmem:[%s2377_s19 + $0x4c] sm:$0xf] }
  0x37   : > { %849 = vmatpush.bf16.msrb.mxu3 %v1912_v44  ;;  %v2533_v49 = vor.u32 %v2124_v45, %v1793_v46  ;;  %v1885_v5 = vld [vmem:[%s3078_s1 + $0x48] sm:$0xf0]  ;;  %v2157_v45 = vld [vmem:[%s3078_s1 + $0x94] sm:$0xf] }
  0x38   : > { %v1981_v44 = vld [vmem:[%s3078_s1 + $0x108] sm:$0xf0] }
  0x39   : > { %899 = vmatpush.bf16.msrb.mxu2 %v1968_v43  ;;  %v2171_v43 = vld [vmem:[%s3078_s1 + $0x104] sm:$0xf] }
  0x3a   : > { %754 = vmatpush.bf16.msrb.mxu1 %v1948_v48  ;;  %952 = vmatpush.bf16.msra.mxu0 %v700_v4  ;;  %v2117_v48 = vld [vmem:[%s2377_s19 + $0x10] sm:$0xf0]  ;;  %v2147_v4 = vld [vmem:[%s3078_s1 + $0x44] sm:$0xf]  ;;  %v1984_v46 = vor.u32 %v2171_v43, %v1981_v44 }
  0x3b   : > { %v2535_v50 = vor.u32 %v2117_v48, %v1763_v47  ;;  %v1925_v47 = vld [vmem:[%s3078_s1 + $0x98] sm:$0xf0]  ;;  %v2139_v48 = vld [vmem:[%s3078_s1 + $0x4] sm:$0xf] }
  0x3d   : > { %715 = vmatmul.bf16.gmra.mxu0 %v2444_v60  ;;  %740 = vmatmul.bf16.gmra.mxu1 %v2446_v61 }
  0x3e   : > { %755 = vmatpush.bf16.msrb.mxu1 %v1940_v57  ;;  %953 = vmatpush.bf16.msra.mxu0 %v1992_v38  ;;  %v1904_v57 = vor.u32 %v2151_v54, %v1901_v55  ;;  %v2141_v38 = vld [vmem:[%s3078_s1 + $0x14] sm:$0xf]  ;;  %v1928_v54 = vor.u32 %v2157_v45, %v1925_v47  ;;  %v1856_v55 = vor.u32 %v2139_v48, %v1853_v51 }
  0x3f   : > { %v1864_v42 = vor.u32 %v2141_v38, %v1861_v39  ;;  %v2178_v38 = vld [vmem:[%s3080_s3 + $0x8] sm:$0xff] }
  0x40   : > { %850 = vmatpush.bf16.msrb.mxu3 %v1904_v57  ;;  %v1787_v57 = vld [vmem:[%s2377_s19 + $0x38] sm:$0xf] }
  0x42   : > { %756 = vmatpush.bf16.msrb.mxu1 %v1932_v63  ;;  %v1960_v63 = vor.u32 %v2165_v56, %v1957_v58  ;;  %v1817_v56 = vld [vmem:[%s2377_s19 + $0x84] sm:$0xf0]  ;;  %v2123_v58 = vld [vmem:[%s2377_s19 + $0x40] sm:$0xf0]  ;;  %954 = vmatpush.bf16.msra.mxu0 %v1984_v46  ;;  %v2772_v46 = vld [vmem:[%s3079_s2] sm:$0x3] }
  0x43   : > { %2008 = vmatmul.msk.bf16.gmra.mxu2 %vm670_vm1, %v2597_v25  ;;  %v2656_v0 = vor.u32 %v2130_v52, %v1817_v56  ;;  %v2658_v1 = vor.u32 %v2123_v58, %v1787_v57  ;;  %v2775_v47 = vperm.slane %v2772_v46, 0 }
  0x44   : > { %900 = vmatpush.bf16.msrb.mxu2 %v1960_v63  ;;  %851 = vmatpush.bf16.msrb.mxu3 %v1896_v2  ;;  %v1920_v63 = vor.u32 %v2155_v59, %v1917_v62  ;;  %v2133_v2 = vld [vmem:[%s2377_s19 + $0x94] sm:$0xf] }
  0x46   : > { %757 = vmatpush.bf16.msrb.mxu1 %v1924_v6  ;;  %v1888_v6 = vor.u32 %v2147_v4, %v1885_v5  ;;  %v1799_v4 = vld [vmem:[%s2377_s19 + $0x50] sm:$0xf]  ;;  %v2126_v5 = vld [vmem:[%s2377_s19 + $0x58] sm:$0xf0] }
  0x47   : > { %v2671_v7 = vor.u32 %v2126_v5, %v1799_v4 }
  0x48   : > { %901 = vmatpush.bf16.msrb.mxu2 %v1952_v3  ;;  %852 = vmatpush.bf16.msrb.mxu3 %v1888_v6  ;;  %v1829_v3 = vld [vmem:[%s2377_s19 + $0x9c] sm:$0xf0] }
  0x49   : > { %v2669_v6 = vor.u32 %v2133_v2, %v1829_v3  ;;  %v2187_v3 = vld [vmem:[%s3080_s3 + $0x50] sm:$0xff] }
  0x4a   : > { %758 = vmatpush.bf16.msrb.mxu1 %v1916_v9  ;;  %v1775_v9 = vld [vmem:[%s2377_s19 + $0x20] sm:$0xf] }
  0x4b   : > { %v2584_v16 = vor.u32 %v2120_v10, %v1775_v9  ;;  %v2192_v9 = vld [vmem:[%s3080_s3 + $0x78] sm:$0xff] }
  0x4c   : > { %853 = vmatpush.bf16.msrb.mxu3 %v1880_v22  ;;  %902 = vmatpush.bf16.msrb.mxu2 %v1944_v31 }
  0x4d   : > { %720 = vmatmul.bf16.gmra.mxu0 %v2473_v14  ;;  %759 = vmatmul.bf16.vlgmr.msrb.gmra.mxu1 %v2475_v15 }
  0x50   : > { %854 = vmatpush.bf16.msrb.mxu3 %v1872_v34  ;;  %903 = vmatpush.bf16.msrb.mxu2 %v1936_v37  ;;  %v2179_v37 = vld [vmem:[%s3080_s3 + $0x10] sm:$0xff] }
  0x54   : > { %855 = vmatpush.bf16.msrb.mxu3 %v1864_v42  ;;  %904 = vmatpush.bf16.msrb.mxu2 %v1928_v54 }
  0x58   : > { %856 = vmatpush.bf16.msrb.mxu3 %v1856_v55  ;;  %905 = vmatpush.bf16.msrb.mxu2 %v1920_v63 }
  0x5b   : > { %857 = vmatmul.bf16.vlgmr.msrb.gmra.mxu3 %v2404_v40  ;;  %906 = vmatmul.bf16.vlgmr.msrb.gmra.mxu2 %v2475_v15 }
  0x5c   : > { %1225 = vmatpush.bf16.msra.mxu3 %v2192_v9 }
  0x5d   : > { %725 = vmatmul.bf16.gmra.mxu0 %v2483_v20  ;;  %764 = vmatmul.bf16.gmra.mxu1 %v2485_v21 }
  0x6b   : > { %862 = vmatmul.bf16.gmra.mxu3 %v2444_v60  ;;  %911 = vmatmul.bf16.gmra.mxu2 %v2485_v21  ;;  %v2129_v60 = vld [vmem:[%s2377_s19 + $0x70] sm:$0xf0]  ;;  %v2184_v21 = vld [vmem:[%s3080_s3 + $0x38] sm:$0xff] }
  0x6c   : > { %v2695_v22 = vor.u32 %v2129_v60, %v1811_v18  ;;  %1176 = vmatpush.bf16.msra.mxu1 %v2184_v21 }
  0x6d   : > { %730 = vmatmul.bf16.gmra.mxu0 %v2493_v26  ;;  %769 = vmatmul.bf16.gmra.mxu1 %v2495_v27 }
  0x70   : > { %1177 = vmatpush.bf16.msra.mxu1 %v2183_v32 }
  0x7b   : > { %867 = vmatmul.bf16.gmra.mxu3 %v2473_v14  ;;  %916 = vmatmul.bf16.gmra.mxu2 %v2495_v27  ;;  %v2191_v14 = vld [vmem:[%s3080_s3 + $0x70] sm:$0xff]  ;;  %v2182_v27 = vld [vmem:[%s3080_s3 + $0x28] sm:$0xff] }
  0x7c   : > { %1226 = vmatpush.bf16.msra.mxu3 %v2191_v14  ;;  %1178 = vmatpush.bf16.msra.mxu1 %v2182_v27 }
  0x7d   : > { %774 = vmatmul.bf16.gmra.mxu1 %v2533_v49  ;;  %2001 = vmatmul.msk.bf16.vlgmr.msrb.gmra.mxu0 %vm670_vm1, %v2535_v50 }
  0x80   : > { %1227 = vmatpush.bf16.msra.mxu3 %v2190_v35 }
  0x8b   : > { %872 = vmatmul.bf16.gmra.mxu3 %v2483_v20  ;;  %921 = vmatmul.bf16.gmra.mxu2 %v2533_v49  ;;  %v2181_v20 = vld [vmem:[%s3080_s3 + $0x20] sm:$0xff]  ;;  %v2180_v49 = vld [vmem:[%s3080_s3 + $0x18] sm:$0xff] }
  0x8c   : > { %1179 = vmatpush.bf16.msra.mxu1 %v2181_v20 }
  0x8d   : > { %779 = vmatmul.bf16.gmra.mxu1 %v2582_v13  ;;  %2002 = vmatmul.msk.bf16.gmra.mxu0 %vm670_vm1, %v2584_v16 }
  0x90   : > { %1180 = vmatpush.bf16.msra.mxu1 %v2180_v49 }
  0x94   : > { %1181 = vmatpush.bf16.msra.mxu1 %v2179_v37 }
  0x98   : > { %1182 = vmatpush.bf16.msra.mxu1 %v2178_v38 }
  0x9b   : > { %877 = vmatmul.bf16.gmra.mxu3 %v2493_v26  ;;  %926 = vmatmul.bf16.gmra.mxu2 %v2582_v13  ;;  %v2177_v26 = vld [vmem:[%s3080_s3] sm:$0xff] }
  0x9c   : > { %1183 = vmatpush.bf16.msra.mxu1 %v2177_v26 }
  0x9d   : > { %784 = vmatmul.bf16.gmra.mxu1 %v2656_v0  ;;  %2003 = vmatmul.msk.bf16.gmra.mxu0 %vm670_vm1, %v2658_v1 }
  0xa6   : > { %v2765_v44 = vpop.f32.mrf.mxu2 }
  0xaa   : > { %v2673_v40 = vpop.f32.mrf.mxu0  ;;  %v2675_v8 = vpop.f32.mrf.mxu1 }
  0xab   : > { %882 = vmatmul.bf16.gmra.mxu3 %v2406_v41  ;;  %931 = vmatmul.bf16.gmra.mxu2 %v2656_v0  ;;  %v2188_v41 = vld [vmem:[%s3080_s3 + $0x58] sm:$0xff]  ;;  %v712_v54 = vadd.f32 %v2673_v40, %v2775_v47 }
  0xad   : > { %789 = vmatmul.bf16.gmra.mxu1 %v2669_v6  ;;  %2004 = vmatmul.msk.bf16.gmra.mxu0 %vm670_vm1, %v2671_v7 }
  0xae   : > { %v2777_v48 = vpop.f32.mrf.mxu2 }
  0xb2   : > { %v2682_v15 = vpop.f32.mrf.mxu0  ;;  %v2687_v10 = vpop.f32.mrf.mxu1 }
  0xb3   : > { %v714_v55 = vadd.f32 %v2682_v15, %v2775_v47 }
  0xb4   : > { %v2805_v9 = vpop.f32.mrf.mxu3 }
  0xb6   : > { %v2790_v59 = vpop.f32.mrf.mxu2 }
  0xba   : > { %v2697_v23 = vpop.f32.mrf.mxu0  ;;  %v2706_v24 = vpop.f32.mrf.mxu1 }
  0xbb   : > { %887 = vmatmul.bf16.gmra.mxu3 %v2446_v61  ;;  %936 = vmatmul.bf16.gmra.mxu2 %v2669_v6  ;;  %v717_v6 = vadd.f32 %v2697_v23, %v2775_v47 }
  0xbd   : > { %794 = vmatmul.bf16.gmra.mxu1 %v2693_v19  ;;  %2005 = vmatmul.msk.bf16.gmra.mxu0 %vm670_vm1, %v2695_v22 }
  0xbe   : > { %v2795_v5 = vpop.f32.mrf.mxu2 }
  0xc2   : > { %v2709_v28 = vpop.f32.mrf.mxu0  ;;  %v2714_v29 = vpop.f32.mrf.mxu1 }
  0xc3   : > { %v719_v40 = vadd.f32 %v2709_v28, %v2775_v47  ;;  %v2812_v28 = vpop.f32.mrf.mxu3 }
  0xca   : > { %v2716_v31 = vpop.f32.mrf.mxu0  ;;  %v760_v33 = vpop.f32.mrf.mxu1 }
  0xcb   : > { %v761_v56 = vadd.f32 %v760_v33, %v712_v54  ;;  %892 = vmatmul.bf16.gmra.mxu3 %v2586_v17  ;;  %941 = vmatmul.bf16.gmra.mxu2 %v2693_v19  ;;  %v2807_v17 = vpop.f32.mrf.mxu2  ;;  %v2186_v19 = vld [vmem:[%s3080_s3 + $0x48] sm:$0xff]  ;;  %v722_v27 = vadd.f32 %v2716_v31, %v2775_v47 }
  0xcd   : > { %2009 = vmatmul.msk.bf16.vlgmr.msra.gmra.mxu0 %vm670_vm1, %v2535_v50 }
  0xd2   : > { %v2728_v34 = vpop.f32.mrf.mxu0  ;;  %v762_v36 = vpop.f32.mrf.mxu1 }
  0xd3   : > { %v763_v57 = vadd.f32 %v762_v36, %v714_v55  ;;  %v2818_v33 = vpop.f32.mrf.mxu2  ;;  %v724_v20 = vadd.f32 %v2728_v34, %v2775_v47 }
  0xda   : > { %v2739_v50 = vpop.f32.mrf.mxu0  ;;  %v765_v42 = vpop.f32.mrf.mxu1 }
  0xdb   : > { %v766_v15 = vadd.f32 %v765_v42, %v717_v6  ;;  %v727_v34 = vadd.f32 %v2739_v50, %v2775_v47 }
  0xdd   : > { %2010 = vmatmul.msk.bf16.gmra.mxu0 %vm670_vm1, %v2584_v16  ;;  %v2189_v16 = vld [vmem:[%s3080_s3 + $0x60] sm:$0xff] }
  0xde   : > { %1228 = vmatpush.bf16.msra.mxu3 %v2189_v16  ;;  %v858_v42 = vpop.f32.mrf.mxu3 }
  0xe2   : > { %v2751_v39 = vpop.f32.mrf.mxu0  ;;  %v767_v13 = vpop.f32.mrf.mxu1  ;;  %1229 = vmatpush.bf16.msra.mxu3 %v2188_v41 }
  0xe3   : > { %v768_v11 = vadd.f32 %v767_v13, %v719_v40  ;;  %v729_v55 = vadd.f32 %v2751_v39, %v2775_v47 }
  0xe6   : > { %1230 = vmatpush.bf16.msra.mxu3 %v2187_v3 }
  0xea   : > { %v2759_v43 = vpop.f32.mrf.mxu0  ;;  %v770_v51 = vpop.f32.mrf.mxu1  ;;  %1231 = vmatpush.bf16.msra.mxu3 %v2186_v19 }
  0xeb   : > { %v771_v35 = vadd.f32 %v770_v51, %v722_v27  ;;  %v860_v51 = vpop.f32.mrf.mxu3 }
  0xed   : > { %2011 = vmatmul.msk.bf16.gmra.mxu0 %vm670_vm1, %v2658_v1 }
  0xf2   : > { %v2767_v45 = vpop.f32.mrf.mxu0  ;;  %v772_v0 = vpop.f32.mrf.mxu1 }
  0xf3   : > { %v773_v49 = vadd.f32 %v772_v0, %v724_v20  ;;  %v734_v39 = vadd.f32 %v2767_v45, %v2775_v47  ;;  %v737_v45 = vadd.f32 %v2675_v8, %v2775_v47 }
  0xfa   : > { %v809_v52 = vpop.f32.mrf.mxu0 }
  0xfb   : > { %v810_v58 = vadd.f32 %v809_v52, %v761_v56  ;;  %v907_v52 = vpop.f32.mrf.mxu2 }
  0xfd   : > { %2012 = vmatmul.msk.bf16.gmra.mxu0 %vm670_vm1, %v2671_v7  ;;  %v996_v61 = vmax.f32 %v810_v58, 0.0  ;;  %v775_v7 = vpop.f32.mrf.mxu1 }
  0xfe   : > { %v776_v56 = vadd.f32 %v775_v7, %v727_v34 }
 0x102   : > { %v811_v62 = vpop.f32.mrf.mxu0 }
 0x103   : > { %v812_v63 = vadd.f32 %v811_v62, %v763_v57 }
 0x105   : > { %v998_v1 = vmax.f32 %v812_v63, 0.0  ;;  %v777_v32 = vpop.f32.mrf.mxu1  ;;  %v909_v63 = vpop.f32.mrf.mxu2 }
 0x106   : > { %v778_v57 = vadd.f32 %v777_v32, %v729_v55 }
 0x107   : > { %v1028_v2 = vpack.c.bf16 %v998_v1, %v996_v61 }
 0x109   : > { %1184 = vmatmul.bf16.vlgmr.msra.gmra.mxu1 %v1028_v2 }
 0x10a   : > { %v814_v4 = vpop.f32.mrf.mxu0 }
 0x10b   : > { %v815_v12 = vadd.f32 %v814_v4, %v766_v15  ;;  %v863_v4 = vpop.f32.mrf.mxu3 }
 0x10d   : > { %2013 = vmatmul.msk.bf16.gmra.mxu0 %vm670_vm1, %v2695_v22  ;;  %v1000_v21 = vmax.f32 %v815_v12, 0.0  ;;  %v780_v37 = vpop.f32.mrf.mxu1  ;;  %v912_v6 = vpop.f32.mrf.mxu2 }
 0x112   : > { %v816_v18 = vpop.f32.mrf.mxu0 }
 0x113   : > { %v817_v60 = vadd.f32 %v816_v18, %v768_v11  ;;  %v865_v18 = vpop.f32.mrf.mxu3 }
 0x115   : > { %v1002_v23 = vmax.f32 %v817_v60, 0.0  ;;  %v782_v54 = vpop.f32.mrf.mxu1  ;;  %v914_v32 = vpop.f32.mrf.mxu2 }
 0x116   : > { %v783_v15 = vadd.f32 %v782_v54, %v734_v39 }
 0x117   : > { %v1030_v14 = vpack.c.bf16 %v1002_v23, %v1000_v21  ;;  %v2838_v23 = vperm.slane %v2772_v46, 1 }
 0x119   : > { %1189 = vmatmul.bf16.gmra.mxu1 %v1030_v14  ;;  %v859_v19 = vadd.f32 %v858_v42, %v2838_v23  ;;  %v861_v46 = vadd.f32 %v860_v51, %v2838_v23  ;;  %v744_v51 = vadd.f32 %v2714_v29, %v2775_v47  ;;  %v2199_v29 = vld [vmem:[%s3082_s5 + $0x30] sm:$0xff] }
 0x11a   : > { %v819_v22 = vpop.f32.mrf.mxu0 }
 0x11b   : > { %v820_v36 = vadd.f32 %v819_v22, %v771_v35  ;;  %v868_v35 = vpop.f32.mrf.mxu3 }
 0x11d   : > { %2014 = vmatmul.msk.bf16.gmra.mxu0 %vm670_vm1, %v2499_v30  ;;  %v1004_v16 = vmax.f32 %v820_v36, 0.0  ;;  %v2185_v30 = vld [vmem:[%s3080_s3 + $0x40] sm:$0xff]  ;;  %v785_v2 = vpop.f32.mrf.mxu1  ;;  %v908_v36 = vadd.f32 %v907_v52, %v859_v19 }
 0x11e   : > { %1232 = vmatpush.bf16.msra.mxu3 %v2185_v30 }
 0x122   : > { %v821_v38 = vpop.f32.mrf.mxu0 }
 0x123   : > { %v822_v26 = vadd.f32 %v821_v38, %v773_v49  ;;  %v786_v49 = vadd.f32 %v785_v2, %v737_v45  ;;  %v917_v38 = vpop.f32.mrf.mxu2  ;;  %v870_v34 = vpop.f32.mrf.mxu3 }
 0x124   : > { %v871_v19 = vadd.f32 %v870_v34, %v2838_v23 }
 0x125   : > { %v1006_v13 = vmax.f32 %v822_v26, 0.0  ;;  %v787_v40 = vpop.f32.mrf.mxu1  ;;  %v835_v8 = vadd.f32 %v2765_v44, %v786_v49  ;;  %v910_v26 = vadd.f32 %v909_v63, %v861_v46  ;;  %v864_v44 = vadd.f32 %v863_v4, %v2838_v23 }
 0x127   : > { %v1032_v41 = vpack.c.bf16 %v1006_v13, %v1004_v16 }
 0x129   : > { %1194 = vmatmul.bf16.gmra.mxu1 %v1032_v41 }
 0x12a   : > { %v824_v31 = vpop.f32.mrf.mxu0 }
 0x12b   : > { %v825_v58 = vadd.f32 %v824_v31, %v776_v56  ;;  %v1016_v31 = vmax.f32 %v835_v8, 0.0 }
 0x12d   : > { %2015 = vmatmul.msk.bf16.gmra.mxu0 %vm670_vm1, %v2539_v53  ;;  %v1008_v61 = vmax.f32 %v825_v58, 0.0  ;;  %v732_v53 = vadd.f32 %v2759_v43, %v2775_v47  ;;  %v739_v43 = vadd.f32 %v2687_v10, %v2775_v47  ;;  %v790_v22 = vpop.f32.mrf.mxu1  ;;  %v919_v58 = vpop.f32.mrf.mxu2 }
 0x12f   : > { %v781_v7 = vadd.f32 %v780_v37, %v732_v53  ;;  %v788_v20 = vadd.f32 %v787_v40, %v739_v43  ;;  %v2200_v37 = vld [vmem:[%s3082_s5 + $0x38] sm:$0xff] }
 0x130   : > { %1366 = vmatpush.bf16.msra.mxu2 %v2200_v37 }
 0x131   : > { %v837_v10 = vadd.f32 %v2777_v48, %v788_v20  ;;  %v742_v48 = vadd.f32 %v2706_v24, %v2775_v47  ;;  %v873_v24 = vpop.f32.mrf.mxu3 }
 0x132   : > { %v826_v62 = vpop.f32.mrf.mxu0 }
 0x133   : > { %v827_v0 = vadd.f32 %v826_v62, %v778_v57  ;;  %v1018_v13 = vmax.f32 %v837_v10, 0.0  ;;  %v791_v63 = vadd.f32 %v790_v22, %v742_v48  ;;  %v2198_v22 = vld [vmem:[%s3082_s5 + $0x28] sm:$0xff] }
 0x134   : > { %1367 = vmatpush.bf16.msra.mxu2 %v2199_v29 }
 0x135   : > { %v1010_v1 = vmax.f32 %v827_v0, 0.0  ;;  %v792_v30 = vpop.f32.mrf.mxu1  ;;  %v1038_v56 = vpack.c.bf16 %v1018_v13, %v1016_v31  ;;  %v913_v0 = vadd.f32 %v912_v6, %v864_v44  ;;  %v922_v40 = vpop.f32.mrf.mxu2 }
 0x136   : > { %v793_v62 = vadd.f32 %v792_v30, %v744_v51 }
 0x137   : > { %v1034_v3 = vpack.c.bf16 %v1010_v1, %v1008_v61  ;;  %v866_v61 = vadd.f32 %v865_v18, %v2838_v23 }
 0x138   : > { %v842_v2 = vadd.f32 %v2795_v5, %v793_v62  ;;  %v869_v5 = vadd.f32 %v868_v35, %v2838_v23  ;;  %1368 = vmatpush.bf16.msra.mxu2 %v2198_v22  ;;  %v920_v35 = vadd.f32 %v919_v58, %v871_v19  ;;  %v2194_v19 = vld [vmem:[%s3082_s5 + $0x8] sm:$0xff] }
 0x139   : > { %1199 = vmatmul.bf16.gmra.mxu1 %v1034_v3  ;;  %v840_v3 = vadd.f32 %v2790_v59, %v791_v63  ;;  %v915_v4 = vadd.f32 %v914_v32, %v866_v61  ;;  %v747_v32 = vadd.f32 %v2805_v9, %v2775_v47  ;;  %v2196_v61 = vld [vmem:[%s3082_s5 + $0x18] sm:$0xff] }
 0x13a   : > { %v829_v50 = vpop.f32.mrf.mxu0  ;;  %v1022_v39 = vmax.f32 %v842_v2, 0.0  ;;  %v918_v45 = vadd.f32 %v917_v38, %v869_v5 }
 0x13b   : > { %v830_v11 = vadd.f32 %v829_v50, %v781_v7  ;;  %v1020_v6 = vmax.f32 %v840_v3, 0.0 }
 0x13d   : > { %2016 = vmatmul.msk.bf16.gmra.mxu0 %vm670_vm1, %v2597_v25  ;;  %v1012_v21 = vmax.f32 %v830_v11, 0.0  ;;  %v795_v1 = vpop.f32.mrf.mxu1 }
 0x142   : > { %v831_v12 = vpop.f32.mrf.mxu0 }
 0x143   : > { %v832_v60 = vadd.f32 %v831_v12, %v783_v15  ;;  %v1040_v12 = vpack.c.bf16 %v1022_v39, %v1020_v6 }
 0x145   : > { %v1014_v14 = vmax.f32 %v832_v60, 0.0  ;;  %v797_v60 = vpop.f32.mrf.mxu1 }
 0x147   : > { %v1036_v25 = vpack.c.bf16 %v1014_v14, %v1012_v21  ;;  %v749_v21 = vadd.f32 %v2812_v28, %v2775_v47  ;;  %v875_v14 = vpop.f32.mrf.mxu3 }
 0x149   : > { %1204 = vmatmul.bf16.gmra.mxu1 %v1036_v25  ;;  %v798_v43 = vadd.f32 %v797_v60, %v749_v21  ;;  %v796_v25 = vadd.f32 %v795_v1, %v747_v32 }
 0x14a   : > { %v956_v27 = vpop.f32.mrf.mxu0 }
 0x14b   : > { %v957_v42 = vadd.f32 %v956_v27, %v908_v36  ;;  %v924_v27 = vpop.f32.mrf.mxu2  ;;  %v847_v28 = vadd.f32 %v2818_v33, %v798_v43  ;;  %v845_v20 = vadd.f32 %v2807_v17, %v796_v25  ;;  %v876_v17 = vadd.f32 %v875_v14, %v2838_v23 }
 0x14d   : > { %v997_v52 = vmax.f32 %v957_v42, 0.0  ;;  %v1026_v46 = vmax.f32 %v847_v28, 0.0  ;;  %v1024_v37 = vmax.f32 %v845_v20, 0.0  ;;  %v925_v31 = vadd.f32 %v924_v27, %v876_v17 }
 0x14f   : > { %v878_v9 = vpop.f32.mrf.mxu3  ;;  %v1042_v8 = vpack.c.bf16 %v1026_v46, %v1024_v37 }
 0x152   : > { %v958_v16 = vpop.f32.mrf.mxu0 }
 0x153   : > { %v959_v41 = vadd.f32 %v958_v16, %v910_v26  ;;  %v927_v42 = vpop.f32.mrf.mxu2  ;;  %v874_v16 = vadd.f32 %v873_v24, %v2838_v23 }
 0x155   : > { %v999_v54 = vmax.f32 %v959_v41, 0.0  ;;  %v923_v13 = vadd.f32 %v922_v40, %v874_v16  ;;  %v2197_v41 = vld [vmem:[%s3082_s5 + $0x20] sm:$0xff] }
 0x156   : > { %1369 = vmatpush.bf16.msra.mxu2 %v2197_v41 }
 0x157   : > { %v1029_v55 = vpack.c.bf16 %v999_v54, %v997_v52  ;;  %v880_v30 = vpop.f32.mrf.mxu3 }
 0x159   : > { %1209 = vmatmul.bf16.gmra.mxu1 %v1038_v56  ;;  %1233 = vmatmul.bf16.vlgmr.msra.gmra.mxu3 %v1029_v55 }
 0x15a   : > { %v961_v57 = vpop.f32.mrf.mxu0  ;;  %1370 = vmatpush.bf16.msra.mxu2 %v2196_v61 }
 0x15b   : > { %v962_v50 = vadd.f32 %v961_v57, %v913_v0  ;;  %v929_v34 = vpop.f32.mrf.mxu2  ;;  %v879_v57 = vadd.f32 %v878_v9, %v2838_v23  ;;  %v881_v0 = vadd.f32 %v880_v30, %v2838_v23 }
 0x15d   : > { %v1001_v15 = vmax.f32 %v962_v50, 0.0  ;;  %v928_v63 = vadd.f32 %v927_v42, %v879_v57  ;;  %v930_v29 = vadd.f32 %v929_v34, %v881_v0 }
 0x15f   : > { %v883_v44 = vpop.f32.mrf.mxu3 }
 0x162   : > { %v963_v53 = vpop.f32.mrf.mxu0 }
 0x163   : > { %v964_v7 = vadd.f32 %v963_v53, %v915_v4  ;;  %v932_v62 = vpop.f32.mrf.mxu2 }
 0x165   : > { %v1003_v11 = vmax.f32 %v964_v7, 0.0  ;;  %v884_v7 = vadd.f32 %v883_v44, %v2838_v23 }
 0x167   : > { %v1031_v18 = vpack.c.bf16 %v1003_v11, %v1001_v15  ;;  %v885_v24 = vpop.f32.mrf.mxu3  ;;  %v933_v15 = vadd.f32 %v932_v62, %v884_v7 }
 0x168   : > { %v886_v11 = vadd.f32 %v885_v24, %v2838_v23 }
 0x169   : > { %1214 = vmatmul.bf16.gmra.mxu1 %v1040_v12  ;;  %1238 = vmatmul.bf16.gmra.mxu3 %v1031_v18  ;;  %v2195_v12 = vld [vmem:[%s3082_s5 + $0x10] sm:$0xff] }
 0x16a   : > { %v966_v59 = vpop.f32.mrf.mxu0  ;;  %1371 = vmatpush.bf16.msra.mxu2 %v2195_v12 }
 0x16b   : > { %v967_v49 = vadd.f32 %v966_v59, %v918_v45  ;;  %v934_v53 = vpop.f32.mrf.mxu2 }
 0x16c   : > { %v935_v60 = vadd.f32 %v934_v53, %v886_v11 }
 0x16d   : > { %v1005_v10 = vmax.f32 %v967_v49, 0.0 }
 0x16e   : > { %1372 = vmatpush.bf16.msra.mxu2 %v2194_v19 }
 0x16f   : > { %v888_v6 = vpop.f32.mrf.mxu3 }
 0x170   : > { %v889_v45 = vadd.f32 %v888_v6, %v2838_v23 }
 0x172   : > { %v968_v36 = vpop.f32.mrf.mxu0 }
 0x173   : > { %v969_v47 = vadd.f32 %v968_v36, %v920_v35  ;;  %v937_v18 = vpop.f32.mrf.mxu2 }
 0x174   : > { %v938_v28 = vadd.f32 %v937_v18, %v889_v45 }
 0x175   : > { %v1007_v38 = vmax.f32 %v969_v47, 0.0 }
 0x177   : > { %v1033_v26 = vpack.c.bf16 %v1007_v38, %v1005_v10  ;;  %v890_v43 = vpop.f32.mrf.mxu3 }
 0x178   : > { %v891_v20 = vadd.f32 %v890_v43, %v2838_v23 }
 0x179   : > { %1219 = vmatmul.bf16.gmra.mxu1 %v1042_v8  ;;  %1243 = vmatmul.bf16.gmra.mxu3 %v1033_v26  ;;  %v2193_v8 = vld [vmem:[%s3082_s5] sm:$0xff] }
 0x17a   : > { %v971_v33 = vpop.f32.mrf.mxu0  ;;  %1373 = vmatpush.bf16.msra.mxu2 %v2193_v8 }
 0x17b   : > { %v972_v52 = vadd.f32 %v971_v33, %v923_v13  ;;  %v939_v22 = vpop.f32.mrf.mxu2 }
 0x17c   : > { %v940_v49 = vadd.f32 %v939_v22, %v891_v20 }
 0x17d   : > { %v1009_v55 = vmax.f32 %v972_v52, 0.0 }
 0x17f   : > { %v893_v35 = vpop.f32.mrf.mxu3 }
 0x180   : > { %v894_v42 = vadd.f32 %v893_v35, %v2838_v23 }
 0x182   : > { %v973_v54 = vpop.f32.mrf.mxu0 }
 0x183   : > { %v974_v51 = vadd.f32 %v973_v54, %v925_v31  ;;  %v942_v9 = vpop.f32.mrf.mxu2 }
 0x184   : > { %v943_v13 = vadd.f32 %v942_v9, %v894_v42 }
 0x185   : > { %v1011_v56 = vmax.f32 %v974_v51, 0.0 }
 0x186   : > { %v1185_v26 = vpop.f32.mrf.mxu1 }
 0x187   : > { %v1035_v48 = vpack.c.bf16 %v1011_v56, %v1009_v55  ;;  %v895_v16 = vpop.f32.mrf.mxu3 }
 0x188   : > { %v896_v17 = vadd.f32 %v895_v16, %v2838_v23 }
 0x189   : > { %1248 = vmatmul.bf16.gmra.mxu3 %v1035_v48 }
 0x18a   : > { %v976_v58 = vpop.f32.mrf.mxu0 }
 0x18b   : > { %v977_v1 = vadd.f32 %v976_v58, %v928_v63  ;;  %v944_v41 = vpop.f32.mrf.mxu2  ;;  %v2901_v58 = vld [vmem:[%s3081_s4] ss:$0 sm:$0xff] }
 0x18c   : > { %v945_v30 = vadd.f32 %v944_v41, %v896_v17  ;;  %v1186_v23 = vadd.f32 %v2901_v58, %v1185_v26 }
 0x18d   : > { %v1013_v4 = vmax.f32 %v977_v1, 0.0 }
 0x18e   : > { %v1187_v34 = vpop.f32.mrf.mxu1 }
 0x18f   : > { %v1188_v63 = vadd.f32 %v2901_v58, %v1187_v34 }
 0x192   : > { %v978_v2 = vpop.f32.mrf.mxu0 }
 0x193   : > { %v979_v3 = vadd.f32 %v978_v2, %v930_v29 }
 0x195   : > { %v1015_v50 = vmax.f32 %v979_v3, 0.0 }
 0x196   : > { %v1190_v48 = vpop.f32.mrf.mxu1 }
 0x197   : > { %v1037_v39 = vpack.c.bf16 %v1015_v50, %v1013_v4  ;;  %v1191_v50 = vadd.f32 %v2901_v58, %v1190_v48 }
 0x199   : > { %1253 = vmatmul.bf16.gmra.mxu3 %v1037_v39 }
 0x19a   : > { %v981_v40 = vpop.f32.mrf.mxu0 }
 0x19b   : > { %v982_v21 = vadd.f32 %v981_v40, %v933_v15 }
 0x19d   : > { %v1017_v14 = vmax.f32 %v982_v21, 0.0 }
 0x19e   : > { %v1192_v44 = vpop.f32.mrf.mxu1 }
 0x19f   : > { %v1193_v53 = vadd.f32 %v2901_v58, %v1192_v44 }
 0x1a2   : > { %v983_v5 = vpop.f32.mrf.mxu0 }
 0x1a3   : > { %v984_v59 = vadd.f32 %v983_v5, %v935_v60 }
 0x1a5   : > { %v1019_v32 = vmax.f32 %v984_v59, 0.0 }
 0x1a6   : > { %v1195_v62 = vpop.f32.mrf.mxu1 }
 0x1a7   : > { %v1039_v25 = vpack.c.bf16 %v1019_v32, %v1017_v14  ;;  %v1196_v21 = vadd.f32 %v2901_v58, %v1195_v62 }
 0x1a9   : > { %1258 = vmatmul.bf16.gmra.mxu3 %v1039_v25 }
 0x1aa   : > { %v986_v27 = vpop.f32.mrf.mxu0 }
 0x1ab   : > { %v987_v36 = vadd.f32 %v986_v27, %v938_v28 }
 0x1ad   : > { %v1021_v37 = vmax.f32 %v987_v36, 0.0 }
 0x1ae   : > { %v1197_v3 = vpop.f32.mrf.mxu1 }
 0x1af   : > { %v1198_v5 = vadd.f32 %v2901_v58, %v1197_v3 }
 0x1b2   : > { %v988_v46 = vpop.f32.mrf.mxu0 }
 0x1b3   : > { %v989_v47 = vadd.f32 %v988_v46, %v940_v49 }
 0x1b5   : > { %v1023_v10 = vmax.f32 %v989_v47, 0.0 }
 0x1b6   : > { %v1200_v6 = vpop.f32.mrf.mxu1 }
 0x1b7   : > { %v1041_v38 = vpack.c.bf16 %v1023_v10, %v1021_v37  ;;  %v1201_v27 = vadd.f32 %v2901_v58, %v1200_v6 }
 0x1b9   : > { %1263 = vmatmul.bf16.gmra.mxu3 %v1041_v38 }
 0x1ba   : > { %v991_v33 = vpop.f32.mrf.mxu0 }
 0x1bb   : > { %v992_v31 = vadd.f32 %v991_v33, %v943_v13 }
 0x1bd   : > { %v1025_v51 = vmax.f32 %v992_v31, 0.0 }
 0x1be   : > { %v1202_v60 = vpop.f32.mrf.mxu1 }
 0x1bf   : > { %v1203_v28 = vadd.f32 %v2901_v58, %v1202_v60 }
 0x1c2   : > { %v993_v52 = vpop.f32.mrf.mxu0 }
 0x1c3   : > { %v994_v54 = vadd.f32 %v993_v52, %v945_v30 }
 0x1c5   : > { %v1027_v55 = vmax.f32 %v994_v54, 0.0 }
 0x1c6   : > { %v1205_v19 = vpop.f32.mrf.mxu1 }
 0x1c7   : > { %v1043_v56 = vpack.c.bf16 %v1027_v55, %v1025_v51  ;;  %v1206_v38 = vadd.f32 %v2901_v58, %v1205_v19 }
 0x1c9   : > { %1268 = vmatmul.bf16.gmra.mxu3 %v1043_v56 }
 0x1ce   : > { %v1207_v35 = vpop.f32.mrf.mxu1 }
 0x1cf   : > { %v1208_v8 = vadd.f32 %v2901_v58, %v1207_v35 }
 0x1d6   : > { %v1210_v10 = vpop.f32.mrf.mxu1 }
 0x1d7   : > { %v1211_v31 = vadd.f32 %v2901_v58, %v1210_v10 }
 0x1dc   : > { %v1234_v57 = vpop.f32.mrf.mxu3 }
 0x1dd   : > { %v1235_v0 = vadd.f32 %v1234_v57, %v1186_v23 }
 0x1de   : > { %v1212_v17 = vpop.f32.mrf.mxu1 }
 0x1df   : > { %v1274_v1 = vmax.f32 %v1235_v0, 0.0  ;;  %v1213_v54 = vadd.f32 %v2901_v58, %v1212_v17 }
 0x1e4   : > { %v1236_v61 = vpop.f32.mrf.mxu3 }
 0x1e5   : > { %v1237_v29 = vadd.f32 %v1236_v61, %v1188_v63 }
 0x1e6   : > { %v1215_v52 = vpop.f32.mrf.mxu1 }
 0x1e7   : > { %v1275_v2 = vmax.f32 %v1237_v29, 0.0  ;;  %v1216_v62 = vadd.f32 %v2901_v58, %v1215_v52 }
 0x1e9   : > { %v1290_v24 = vpack.c.bf16 %v1275_v2, %v1274_v1 }
 0x1eb   : > { %1374 = vmatmul.bf16.vlgmr.msra.gmra.mxu2 %v1290_v24 }
 0x1ec   : > { %v1239_v4 = vpop.f32.mrf.mxu3 }
 0x1ed   : > { %v1240_v39 = vadd.f32 %v1239_v4, %v1191_v50 }
 0x1ee   : > { %v1217_v57 = vpop.f32.mrf.mxu1 }
 0x1ef   : > { %v1276_v15 = vmax.f32 %v1240_v39, 0.0  ;;  %v1218_v63 = vadd.f32 %v2901_v58, %v1217_v57 }
 0x1f4   : > { %v1241_v7 = vpop.f32.mrf.mxu3 }
 0x1f5   : > { %v1242_v40 = vadd.f32 %v1241_v7, %v1193_v53 }
 0x1f6   : > { %v1220_v1 = vpop.f32.mrf.mxu1 }
 0x1f7   : > { %v1277_v11 = vmax.f32 %v1242_v40, 0.0  ;;  %v1221_v53 = vadd.f32 %v2901_v58, %v1220_v1 }
 0x1f9   : > { %v1291_v12 = vpack.c.bf16 %v1277_v11, %v1276_v15 }
 0x1fb   : > { %1379 = vmatmul.bf16.gmra.mxu2 %v1291_v12 }
 0x1fc   : > { %v1244_v18 = vpop.f32.mrf.mxu3 }
 0x1fd   : > { %v1245_v59 = vadd.f32 %v1244_v18, %v1196_v21  ;;  %v2922_v18 = vld [vmem:[%s3083_s6] ss:$0 sm:$0xff] }
 0x1fe   : > { %v1222_v50 = vpop.f32.mrf.mxu1 }
 0x1ff   : > { %v1278_v43 = vmax.f32 %v1245_v59, 0.0  ;;  %v1223_v39 = vadd.f32 %v2901_v58, %v1222_v50 }
 0x204   : > { %v1246_v14 = vpop.f32.mrf.mxu3 }
 0x205   : > { %v1247_v32 = vadd.f32 %v1246_v14, %v1198_v5 }
 0x207   : > { %v1279_v25 = vmax.f32 %v1247_v32, 0.0 }
 0x209   : > { %v1292_v45 = vpack.c.bf16 %v1279_v25, %v1278_v43 }
 0x20b   : > { %1384 = vmatmul.bf16.gmra.mxu2 %v1292_v45 }
 0x20c   : > { %v1249_v22 = vpop.f32.mrf.mxu3 }
 0x20d   : > { %v1250_v20 = vadd.f32 %v1249_v22, %v1201_v27 }
 0x20f   : > { %v1280_v46 = vmax.f32 %v1250_v20, 0.0 }
 0x214   : > { %v1251_v49 = vpop.f32.mrf.mxu3 }
 0x215   : > { %v1252_v36 = vadd.f32 %v1251_v49, %v1203_v28 }
 0x217   : > { %v1281_v47 = vmax.f32 %v1252_v36, 0.0 }
 0x219   : > { %v1293_v9 = vpack.c.bf16 %v1281_v47, %v1280_v46 }
 0x21b   : > { %1389 = vmatmul.bf16.gmra.mxu2 %v1293_v9 }
 0x21c   : > { %v1254_v37 = vpop.f32.mrf.mxu3 }
 0x21d   : > { %v1255_v26 = vadd.f32 %v1254_v37, %v1206_v38 }
 0x21f   : > { %v1282_v33 = vmax.f32 %v1255_v26, 0.0 }
 0x224   : > { %v1256_v42 = vpop.f32.mrf.mxu3 }
 0x225   : > { %v1257_v16 = vadd.f32 %v1256_v42, %v1208_v8 }
 0x227   : > { %v1283_v13 = vmax.f32 %v1257_v16, 0.0 }
 0x229   : > { %v1294_v41 = vpack.c.bf16 %v1283_v13, %v1282_v33 }
 0x22b   : > { %1394 = vmatmul.bf16.gmra.mxu2 %v1294_v41 }
 0x22c   : > { %v1259_v30 = vpop.f32.mrf.mxu3 }
 0x22d   : > { %v1260_v34 = vadd.f32 %v1259_v30, %v1211_v31 }
 0x22f   : > { %v1284_v56 = vmax.f32 %v1260_v34, 0.0 }
 0x234   : > { %v1261_v51 = vpop.f32.mrf.mxu3 }
 0x235   : > { %v1262_v55 = vadd.f32 %v1261_v51, %v1213_v54 }
 0x237   : > { %v1285_v48 = vmax.f32 %v1262_v55, 0.0 }
 0x239   : > { %v1295_v44 = vpack.c.bf16 %v1285_v48, %v1284_v56 }
 0x23b   : > { %1399 = vmatmul.bf16.gmra.mxu2 %v1295_v44 }
 0x23c   : > { %v1264_v23 = vpop.f32.mrf.mxu3 }
 0x23d   : > { %v1265_v0 = vadd.f32 %v1264_v23, %v1216_v62 }
 0x23f   : > { %v1286_v2 = vmax.f32 %v1265_v0, 0.0 }
 0x244   : > { %v1266_v61 = vpop.f32.mrf.mxu3 }
 0x245   : > { %v1267_v29 = vadd.f32 %v1266_v61, %v1218_v63 }
 0x247   : > { %v1287_v24 = vmax.f32 %v1267_v29, 0.0 }
 0x249   : > { %v1296_v3 = vpack.c.bf16 %v1287_v24, %v1286_v2 }
 0x24b   : > { %1404 = vmatmul.bf16.gmra.mxu2 %v1296_v3 }
 0x24c   : > { %v1269_v4 = vpop.f32.mrf.mxu3 }
 0x24d   : > { %v1270_v7 = vadd.f32 %v1269_v4, %v1221_v53 }
 0x24f   : > { %v1288_v15 = vmax.f32 %v1270_v7, 0.0 }
 0x254   : > { %v1271_v40 = vpop.f32.mrf.mxu3 }
 0x255   : > { %v1272_v6 = vadd.f32 %v1271_v40, %v1223_v39 }
 0x257   : > { %v1289_v11 = vmax.f32 %v1272_v6, 0.0 }
 0x259   : > { %v1297_v12 = vpack.c.bf16 %v1289_v11, %v1288_v15 }
 0x25b   : > { %1409 = vmatmul.bf16.gmra.mxu2 %v1297_v12 }
 0x26e   : > { %v1375_v60 = vpop.f32.mrf.mxu2 }
 0x26f   : > { %v2925_v21 = vadd.f32 %v2922_v18, %v1375_v60 }
 0x271   : > { %v1415_v58 = vmul.f32 %v2925_v21, %v2925_v21 }
 0x273   : > { %v1432_v5 = vsel %vm1431_vm2, %v1415_v58, 0.0 }
 0x274   : > { %1433 = vadd.xlane.f32.xlu0 %v1432_v5 }
 0x276   : > { %v1377_v59 = vpop.f32.mrf.mxu2 }
 0x277   : > { %v2931_v14 = vadd.f32 %v2922_v18, %v1377_v59 }
 0x279   : > { %v1416_v32 = vmul.f32 %v2931_v14, %v2931_v14 }
 0x27b   : > { %v1435_v43 = vsel %vm1431_vm2, %v1416_v32, 0.0 }
 0x27c   : > { %1436 = vadd.xlane.f32.xlu0 %v1435_v43 }
 0x27e   : > { %v1380_v25 = vpop.f32.mrf.mxu2 }
 0x27f   : > { %v2937_v45 = vadd.f32 %v2922_v18, %v1380_v25 }
 0x281   : > { %v1417_v19 = vmul.f32 %v2937_v45, %v2937_v45 }
 0x283   : > { %v1438_v22 = vsel %vm1431_vm2, %v1417_v19, 0.0 }
 0x284   : > { %1439 = vadd.xlane.f32.xlu1 %v1438_v22 }
 0x286   : > { %v1382_v27 = vpop.f32.mrf.mxu2 }
 0x287   : > { %v2943_v28 = vadd.f32 %v2922_v18, %v1382_v27 }
 0x289   : > { %v1418_v20 = vmul.f32 %v2943_v28, %v2943_v28 }
 0x28b   : > { %v1441_v35 = vsel %vm1431_vm2, %v1418_v20, 0.0 }
 0x28c   : > { %1442 = vadd.xlane.f32.xlu1 %v1441_v35 }
 0x28e   : > { %v1385_v49 = vpop.f32.mrf.mxu2 }
 0x28f   : > { %v2949_v36 = vadd.f32 %v2922_v18, %v1385_v49 }
 0x291   : > { %v1419_v46 = vmul.f32 %v2949_v36, %v2949_v36 }
 0x293   : > { %v1444_v47 = vsel %vm1431_vm2, %v1419_v46, 0.0 }
 0x294   : > { %1445 = vadd.xlane.f32.xlu2 %v1444_v47 }
 0x296   : > { %v1387_v9 = vpop.f32.mrf.mxu2 }
 0x297   : > { %v2955_v37 = vadd.f32 %v2922_v18, %v1387_v9 }
 0x299   : > { %v1420_v10 = vmul.f32 %v2955_v37, %v2955_v37 }
 0x29b   : > { %v1447_v38 = vsel %vm1431_vm2, %v1420_v10, 0.0 }
 0x29c   : > { %1448 = vadd.xlane.f32.xlu2 %v1447_v38 }
 0x29e   : > { %v1390_v8 = vpop.f32.mrf.mxu2 }
 0x29f   : > { %v2961_v26 = vadd.f32 %v2922_v18, %v1390_v8 }
 0x2a1   : > { %v1421_v42 = vmul.f32 %v2961_v26, %v2961_v26 }
 0x2a3   : > { %v1450_v16 = vsel %vm1431_vm2, %v1421_v42, 0.0 }
 0x2a4   : > { %1451 = vadd.xlane.f32.xlu0 %v1450_v16 }
 0x2a6   : > { %v1392_v33 = vpop.f32.mrf.mxu2 }
 0x2a7   : > { %v2967_v13 = vadd.f32 %v2922_v18, %v1392_v33 }
 0x2a9   : > { %v1422_v17 = vmul.f32 %v2967_v13, %v2967_v13 }
 0x2ab   : > { %v1453_v41 = vsel %vm1431_vm2, %v1422_v17, 0.0 }
 0x2ac   : > { %1454 = vadd.xlane.f32.xlu1 %v1453_v41 }
 0x2ae   : > { %v1395_v30 = vpop.f32.mrf.mxu2 }
 0x2af   : > { %v2973_v31 = vadd.f32 %v2922_v18, %v1395_v30 }
 0x2b1   : > { %v1423_v52 = vmul.f32 %v2973_v31, %v2973_v31 }
 0x2b3   : > { %v1456_v54 = vsel %vm1431_vm2, %v1423_v52, 0.0 }
 0x2b4   : > { %1457 = vadd.xlane.f32.xlu2 %v1456_v54 }
 0x2b6   : > { %v1397_v34 = vpop.f32.mrf.mxu2 }
 0x2b7   : > { %v2979_v51 = vadd.f32 %v2922_v18, %v1397_v34 }
 0x2b9   : > { %v1424_v55 = vmul.f32 %v2979_v51, %v2979_v51 }
 0x2bb   : > { %v1459_v56 = vsel %vm1431_vm2, %v1424_v55, 0.0 }
 0x2bc   : > { %1460 = vadd.xlane.f32.xlu0 %v1459_v56 }
 0x2be   : > { %v1400_v48 = vpop.f32.mrf.mxu2 }
 0x2bf   : > { %v2985_v44 = vadd.f32 %v2922_v18, %v1400_v48 }
 0x2c1   : > { %v1425_v57 = vmul.f32 %v2985_v44, %v2985_v44 }
 0x2c3   : > { %v1462_v23 = vsel %vm1431_vm2, %v1425_v57, 0.0 }
 0x2c4   : > { %1463 = vadd.xlane.f32.xlu1 %v1462_v23 }
 0x2c6   : > { %v1402_v62 = vpop.f32.mrf.mxu2 }
 0x2c7   : > { %v2991_v63 = vadd.f32 %v2922_v18, %v1402_v62 }
 0x2c9   : > { %v1426_v0 = vmul.f32 %v2991_v63, %v2991_v63 }
 0x2cb   : > { %v1465_v61 = vsel %vm1431_vm2, %v1426_v0, 0.0 }
 0x2cc   : > { %1466 = vadd.xlane.f32.xlu2 %v1465_v61 }
 0x2ce   : > { %v1405_v29 = vpop.f32.mrf.mxu2 }
 0x2cf   : > { %v2997_v1 = vadd.f32 %v2922_v18, %v1405_v29 }
 0x2d1   : > { %v1427_v2 = vmul.f32 %v2997_v1, %v2997_v1 }
 0x2d3   : > { %v1468_v24 = vsel %vm1431_vm2, %v1427_v2, 0.0 }
 0x2d4   : > { %1469 = vadd.xlane.f32.xlu0 %v1468_v24 }
 0x2d6   : > { %v1407_v3 = vpop.f32.mrf.mxu2 }
 0x2d7   : > { %v3003_v4 = vadd.f32 %v2922_v18, %v1407_v3 }
 0x2d9   : > { %v1428_v50 = vmul.f32 %v3003_v4, %v3003_v4 }
 0x2db   : > { %v1471_v53 = vsel %vm1431_vm2, %v1428_v50, 0.0 }
 0x2dc   : > { %1472 = vadd.xlane.f32.xlu1 %v1471_v53 }
 0x2de   : > { %v1410_v39 = vpop.f32.mrf.mxu2 }
 0x2df   : > { %v3009_v7 = vadd.f32 %v2922_v18, %v1410_v39 }
 0x2e1   : > { %v1429_v40 = vmul.f32 %v3009_v7, %v3009_v7 }
 0x2e3   : > { %v1474_v6 = vsel %vm1431_vm2, %v1429_v40, 0.0 }
 0x2e4   : > { %1475 = vadd.xlane.f32.xlu2 %v1474_v6 }
 0x2e6   : > { %v1412_v15 = vpop.f32.mrf.mxu2 }
 0x2e7   : > { %v3015_v11 = vadd.f32 %v2922_v18, %v1412_v15  ;;  %v1434_v12 = vpop.xlane.xlu0 %1433 }
 0x2e8   : > { %v1480_v60 = vmax.f32 %v1434_v12, 1e-24 }
 0x2e9   : > { %v1430_v58 = vmul.f32 %v3015_v11, %v3015_v11 }
 0x2ea   : > { %2231 = vrsqrt.f32 %v1480_v60  ;;  %vm1502_vm4 = vweird.f32 %v1480_v60 }
 0x2eb   : > { %v1477_v5 = vsel %vm1431_vm2, %v1430_v58, 0.0 }
 0x2ec   : > { %1478 = vadd.xlane.f32.xlu0 %v1477_v5 }
 0x2ef   : > { %v1437_v59 = vpop.xlane.xlu0 %1436 }
 0x2f0   : > { %v2232_v32 = vpop.eup %2231  ;;  %v1481_v43 = vmax.f32 %v1437_v59, 1e-24 }
 0x2f1   : > { %v1497_v25 = vmul.f32 %v2232_v32, %v1480_v60  ;;  %vm1503_vm3 = vweird.f32 %v2232_v32 }
 0x2f2   : > { %2233 = vrsqrt.f32 %v1481_v43  ;;  %vm1504_vm5 = vmor %vm1502_vm4, %vm1503_vm3  ;;  %vm1512_vm7 = vweird.f32 %v1481_v43 }
 0x2f3   : > { %v1498_v19 = vmul.f32 %v2232_v32, %v1497_v25 }
 0x2f5   : > { %v1499_v22 = vmul.f32 0.5, %v1498_v19 }
 0x2f7   : > { %v1500_v27 = vsub.f32 1.5, %v1499_v22  ;;  %v1440_v18 = vpop.xlane.xlu1 %1439 }
 0x2f8   : > { %v2234_v20 = vpop.eup %2233  ;;  %v1482_v35 = vmax.f32 %v1440_v18, 1e-24 }
 0x2f9   : > { %v1501_v49 = vmul.f32 %v2232_v32, %v1500_v27  ;;  %v1507_v46 = vmul.f32 %v2234_v20, %v1481_v43  ;;  %vm1513_vm6 = vweird.f32 %v2234_v20 }
 0x2fa   : > { %2235 = vrsqrt.f32 %v1482_v35  ;;  %vm1514_vm8 = vmor %vm1512_vm7, %vm1513_vm6  ;;  %vm1522_vm10 = vweird.f32 %v1482_v35 }
 0x2fb   : > { %v1505_v47 = vsel %vm1504_vm5, %v2232_v32, %v1501_v49  ;;  %v1508_v9 = vmul.f32 %v2234_v20, %v1507_v46 }
 0x2fc   : > { %v1656_v10 = vmul.f32 %v1505_v47, %v2925_v21 }
 0x2fd   : > { %v1509_v38 = vmul.f32 0.5, %v1508_v9 }
 0x2fe   : > { %1672 = vst.msk [vmem:[%s3024_s11] sm:$0xff] %vm1431_vm2, %v1656_v10 }
 0x2ff   : > { %v1510_v8 = vsub.f32 1.5, %v1509_v38  ;;  %v1443_v42 = vpop.xlane.xlu1 %1442 }
 0x300   : > { %v2236_v16 = vpop.eup %2235  ;;  %v1483_v33 = vmax.f32 %v1443_v42, 1e-24 }
 0x301   : > { %v1511_v17 = vmul.f32 %v2234_v20, %v1510_v8  ;;  %v1517_v41 = vmul.f32 %v2236_v16, %v1482_v35  ;;  %vm1523_vm9 = vweird.f32 %v2236_v16 }
 0x302   : > { %2237 = vrsqrt.f32 %v1483_v33  ;;  %vm1524_vm11 = vmor %vm1522_vm10, %vm1523_vm9  ;;  %vm1532_vm13 = vweird.f32 %v1483_v33 }
 0x303   : > { %v1515_v30 = vsel %vm1514_vm8, %v2234_v20, %v1511_v17  ;;  %v1518_v52 = vmul.f32 %v2236_v16, %v1517_v41 }
 0x304   : > { %v1657_v54 = vmul.f32 %v1515_v30, %v2931_v14 }
 0x305   : > { %v1519_v34 = vmul.f32 0.5, %v1518_v52 }
 0x306   : > { %1673 = vst.msk [vmem:[%s3024_s11 + $0x8] sm:$0xff] %vm1431_vm2, %v1657_v54 }
 0x307   : > { %v1520_v21 = vsub.f32 1.5, %v1519_v34  ;;  %v1446_v55 = vpop.xlane.xlu2 %1445 }
 0x308   : > { %v2238_v56 = vpop.eup %2237  ;;  %v1484_v48 = vmax.f32 %v1446_v55, 1e-24 }
 0x309   : > { %v1521_v57 = vmul.f32 %v2236_v16, %v1520_v21  ;;  %v1527_v23 = vmul.f32 %v2238_v56, %v1483_v33  ;;  %vm1533_vm12 = vweird.f32 %v2238_v56 }
 0x30a   : > { %2239 = vrsqrt.f32 %v1484_v48  ;;  %vm1534_vm14 = vmor %vm1532_vm13, %vm1533_vm12  ;;  %vm1542_vm0 = vweird.f32 %v1484_v48 }
 0x30b   : > { %v1525_v62 = vsel %vm1524_vm11, %v2236_v16, %v1521_v57  ;;  %v1528_v0 = vmul.f32 %v2238_v56, %v1527_v23 }
 0x30c   : > { %v1658_v61 = vmul.f32 %v1525_v62, %v2937_v45 }
 0x30d   : > { %v1529_v29 = vmul.f32 0.5, %v1528_v0 }
 0x30e   : > { %1674 = vst.msk [vmem:[%s3024_s11 + $0x10] sm:$0xff] %vm1431_vm2, %v1658_v61 }
 0x30f   : > { %v1530_v14 = vsub.f32 1.5, %v1529_v29  ;;  %v1449_v2 = vpop.xlane.xlu2 %1448 }
 0x310   : > { %v2240_v24 = vpop.eup %2239  ;;  %v1485_v3 = vmax.f32 %v1449_v2, 1e-24 }
 0x311   : > { %v1531_v50 = vmul.f32 %v2238_v56, %v1530_v14  ;;  %v1537_v53 = vmul.f32 %v2240_v24, %v1484_v48  ;;  %vm1543_vm15 = vweird.f32 %v2240_v24 }
 0x312   : > { %2241 = vrsqrt.f32 %v1485_v3  ;;  %vm1544_vm1 = vmor %vm1542_vm0, %vm1543_vm15  ;;  %vm1552_vm4 = vweird.f32 %v1485_v3 }
 0x313   : > { %v1535_v39 = vsel %vm1534_vm14, %v2238_v56, %v1531_v50  ;;  %v1538_v40 = vmul.f32 %v2240_v24, %v1537_v53 }
 0x314   : > { %v1659_v6 = vmul.f32 %v1535_v39, %v2943_v28 }
 0x315   : > { %v1539_v15 = vmul.f32 0.5, %v1538_v40 }
 0x316   : > { %1675 = vst.msk [vmem:[%s3024_s11 + $0x18] sm:$0xff] %vm1431_vm2, %v1659_v6 }
 0x317   : > { %v1540_v45 = vsub.f32 1.5, %v1539_v15  ;;  %v1452_v12 = vpop.xlane.xlu0 %1451 }
 0x318   : > { %v2242_v60 = vpop.eup %2241  ;;  %v1486_v58 = vmax.f32 %v1452_v12, 1e-24 }
 0x319   : > { %v1541_v5 = vmul.f32 %v2240_v24, %v1540_v45  ;;  %v1547_v59 = vmul.f32 %v2242_v60, %v1485_v3  ;;  %vm1553_vm3 = vweird.f32 %v2242_v60 }
 0x31a   : > { %2243 = vrsqrt.f32 %v1486_v58  ;;  %vm1554_vm5 = vmor %vm1552_vm4, %vm1553_vm3  ;;  %vm1562_vm7 = vweird.f32 %v1486_v58 }
 0x31b   : > { %v1545_v32 = vsel %vm1544_vm1, %v2240_v24, %v1541_v5  ;;  %v1548_v43 = vmul.f32 %v2242_v60, %v1547_v59 }
 0x31c   : > { %v1660_v25 = vmul.f32 %v1545_v32, %v2949_v36 }
 0x31d   : > { %v1549_v19 = vmul.f32 0.5, %v1548_v43 }
 0x31e   : > { %1676 = vst.msk [vmem:[%s3024_s11 + $0x20] sm:$0xff] %vm1431_vm2, %v1660_v25 }
 0x31f   : > { %v1550_v28 = vsub.f32 1.5, %v1549_v19  ;;  %v1455_v22 = vpop.xlane.xlu1 %1454 }
 0x320   : > { %v2244_v27 = vpop.eup %2243  ;;  %v1487_v18 = vmax.f32 %v1455_v22, 1e-24 }
 0x321   : > { %v1551_v20 = vmul.f32 %v2242_v60, %v1550_v28  ;;  %v1557_v35 = vmul.f32 %v2244_v27, %v1486_v58  ;;  %vm1563_vm6 = vweird.f32 %v2244_v27 }
 0x322   : > { %2245 = vrsqrt.f32 %v1487_v18  ;;  %vm1564_vm8 = vmor %vm1562_vm7, %vm1563_vm6  ;;  %vm1572_vm10 = vweird.f32 %v1487_v18 }
 0x323   : > { %v1555_v49 = vsel %vm1554_vm5, %v2242_v60, %v1551_v20  ;;  %v1558_v46 = vmul.f32 %v2244_v27, %v1557_v35 }
 0x324   : > { %v1661_v47 = vmul.f32 %v1555_v49, %v2955_v37 }
 0x325   : > { %v1559_v9 = vmul.f32 0.5, %v1558_v46 }
 0x326   : > { %1677 = vst.msk [vmem:[%s3024_s11 + $0x28] sm:$0xff] %vm1431_vm2, %v1661_v47 }
 0x327   : > { %v1560_v36 = vsub.f32 1.5, %v1559_v9  ;;  %v1458_v10 = vpop.xlane.xlu2 %1457 }
 0x328   : > { %v2246_v38 = vpop.eup %2245  ;;  %v1488_v8 = vmax.f32 %v1458_v10, 1e-24 }
 0x329   : > { %v1561_v42 = vmul.f32 %v2244_v27, %v1560_v36  ;;  %v1567_v16 = vmul.f32 %v2246_v38, %v1487_v18  ;;  %vm1573_vm9 = vweird.f32 %v2246_v38 }
 0x32a   : > { %2247 = vrsqrt.f32 %v1488_v8  ;;  %vm1574_vm11 = vmor %vm1572_vm10, %vm1573_vm9  ;;  %vm1582_vm13 = vweird.f32 %v1488_v8 }
 0x32b   : > { %v1565_v33 = vsel %vm1564_vm8, %v2244_v27, %v1561_v42  ;;  %v1568_v17 = vmul.f32 %v2246_v38, %v1567_v16 }
 0x32c   : > { %v1662_v41 = vmul.f32 %v1565_v33, %v2961_v26 }
 0x32d   : > { %v1569_v30 = vmul.f32 0.5, %v1568_v17 }
 0x32e   : > { %1678 = vst.msk [vmem:[%s3024_s11 + $0x30] sm:$0xff] %vm1431_vm2, %v1662_v41 }
 0x32f   : > { %v1570_v37 = vsub.f32 1.5, %v1569_v30  ;;  %v1461_v52 = vpop.xlane.xlu0 %1460 }
 0x330   : > { %v2248_v54 = vpop.eup %2247  ;;  %v1489_v34 = vmax.f32 %v1461_v52, 1e-24 }
 0x331   : > { %v1571_v21 = vmul.f32 %v2246_v38, %v1570_v37  ;;  %v1577_v55 = vmul.f32 %v2248_v54, %v1488_v8  ;;  %vm1583_vm12 = vweird.f32 %v2248_v54 }
 0x332   : > { %2249 = vrsqrt.f32 %v1489_v34  ;;  %vm1584_vm14 = vmor %vm1582_vm13, %vm1583_vm12  ;;  %vm1592_vm0 = vweird.f32 %v1489_v34 }
 0x333   : > { %v1575_v56 = vsel %vm1574_vm11, %v2246_v38, %v1571_v21  ;;  %v1578_v48 = vmul.f32 %v2248_v54, %v1577_v55 }
 0x334   : > { %v1663_v57 = vmul.f32 %v1575_v56, %v2967_v13 }
 0x335   : > { %v1579_v23 = vmul.f32 0.5, %v1578_v48 }
 0x336   : > { %1679 = vst.msk [vmem:[%s3024_s11 + $0x38] sm:$0xff] %vm1431_vm2, %v1663_v57 }
 0x337   : > { %v1580_v26 = vsub.f32 1.5, %v1579_v23  ;;  %v1464_v62 = vpop.xlane.xlu1 %1463 }
 0x338   : > { %v2250_v0 = vpop.eup %2249  ;;  %v1490_v61 = vmax.f32 %v1464_v62, 1e-24 }
 0x339   : > { %v1581_v29 = vmul.f32 %v2248_v54, %v1580_v26  ;;  %v1587_v14 = vmul.f32 %v2250_v0, %v1489_v34  ;;  %vm1593_vm15 = vweird.f32 %v2250_v0 }
 0x33a   : > { %2251 = vrsqrt.f32 %v1490_v61  ;;  %vm1594_vm1 = vmor %vm1592_vm0, %vm1593_vm15  ;;  %vm1602_vm4 = vweird.f32 %v1490_v61 }
 0x33b   : > { %v1585_v2 = vsel %vm1584_vm14, %v2248_v54, %v1581_v29  ;;  %v1588_v24 = vmul.f32 %v2250_v0, %v1587_v14 }
 0x33c   : > { %v1664_v3 = vmul.f32 %v1585_v2, %v2973_v31 }
 0x33d   : > { %v1589_v50 = vmul.f32 0.5, %v1588_v24 }
 0x33e   : > { %1680 = vst.msk [vmem:[%s3024_s11 + $0x40] sm:$0xff] %vm1431_vm2, %v1664_v3 }
 0x33f   : > { %v1590_v13 = vsub.f32 1.5, %v1589_v50  ;;  %v1467_v53 = vpop.xlane.xlu2 %1466 }
 0x340   : > { %v2252_v39 = vpop.eup %2251  ;;  %v1491_v40 = vmax.f32 %v1467_v53, 1e-24 }
 0x341   : > { %v1591_v6 = vmul.f32 %v2250_v0, %v1590_v13  ;;  %v1597_v15 = vmul.f32 %v2252_v39, %v1490_v61  ;;  %vm1603_vm3 = vweird.f32 %v2252_v39 }
 0x342   : > { %2253 = vrsqrt.f32 %v1491_v40  ;;  %vm1604_vm5 = vmor %vm1602_vm4, %vm1603_vm3  ;;  %vm1612_vm7 = vweird.f32 %v1491_v40 }
 0x343   : > { %v1595_v45 = vsel %vm1594_vm1, %v2250_v0, %v1591_v6  ;;  %v1598_v12 = vmul.f32 %v2252_v39, %v1597_v15 }
 0x344   : > { %v1665_v60 = vmul.f32 %v1595_v45, %v2979_v51 }
 0x345   : > { %v1599_v58 = vmul.f32 0.5, %v1598_v12 }
 0x346   : > { %1681 = vst.msk [vmem:[%s3024_s11 + $0x48] sm:$0xff] %vm1431_vm2, %v1665_v60 }
 0x347   : > { %v1600_v31 = vsub.f32 1.5, %v1599_v58  ;;  %v1470_v5 = vpop.xlane.xlu0 %1469 }
 0x348   : > { %v2254_v59 = vpop.eup %2253  ;;  %v1492_v32 = vmax.f32 %v1470_v5, 1e-24 }
 0x349   : > { %v1601_v43 = vmul.f32 %v2252_v39, %v1600_v31  ;;  %v1607_v25 = vmul.f32 %v2254_v59, %v1491_v40  ;;  %vm1613_vm6 = vweird.f32 %v2254_v59 }
 0x34a   : > { %2255 = vrsqrt.f32 %v1492_v32  ;;  %vm1614_vm8 = vmor %vm1612_vm7, %vm1613_vm6  ;;  %vm1622_vm10 = vweird.f32 %v1492_v32 }
 0x34b   : > { %v1605_v19 = vsel %vm1604_vm5, %v2252_v39, %v1601_v43  ;;  %v1608_v28 = vmul.f32 %v2254_v59, %v1607_v25 }
 0x34c   : > { %v1666_v22 = vmul.f32 %v1605_v19, %v2985_v44 }
 0x34d   : > { %v1609_v27 = vmul.f32 0.5, %v1608_v28 }
 0x34e   : > { %1682 = vst.msk [vmem:[%s3024_s11 + $0x50] sm:$0xff] %vm1431_vm2, %v1666_v22 }
 0x34f   : > { %v1610_v51 = vsub.f32 1.5, %v1609_v27  ;;  %v1473_v18 = vpop.xlane.xlu1 %1472 }
 0x350   : > { %v2256_v20 = vpop.eup %2255  ;;  %v1493_v35 = vmax.f32 %v1473_v18, 1e-24 }
 0x351   : > { %v1611_v49 = vmul.f32 %v2254_v59, %v1610_v51  ;;  %v1617_v46 = vmul.f32 %v2256_v20, %v1492_v32  ;;  %vm1623_vm9 = vweird.f32 %v2256_v20 }
 0x352   : > { %2257 = vrsqrt.f32 %v1493_v35  ;;  %vm1624_vm11 = vmor %vm1622_vm10, %vm1623_vm9  ;;  %vm1632_vm13 = vweird.f32 %v1493_v35 }
 0x353   : > { %v1615_v47 = vsel %vm1614_vm8, %v2254_v59, %v1611_v49  ;;  %v1618_v9 = vmul.f32 %v2256_v20, %v1617_v46 }
 0x354   : > { %v1667_v36 = vmul.f32 %v1615_v47, %v2991_v63 }
 0x355   : > { %v1619_v10 = vmul.f32 0.5, %v1618_v9 }
 0x356   : > { %1683 = vst.msk [vmem:[%s3024_s11 + $0x58] sm:$0xff] %vm1431_vm2, %v1667_v36 }
 0x357   : > { %v1620_v44 = vsub.f32 1.5, %v1619_v10  ;;  %v1476_v38 = vpop.xlane.xlu2 %1475 }
 0x358   : > { %v2258_v8 = vpop.eup %2257  ;;  %v1494_v42 = vmax.f32 %v1476_v38, 1e-24 }
 0x359   : > { %v1621_v16 = vmul.f32 %v2256_v20, %v1620_v44  ;;  %v1627_v33 = vmul.f32 %v2258_v8, %v1493_v35  ;;  %vm1633_vm12 = vweird.f32 %v2258_v8 }
 0x35a   : > { %2259 = vrsqrt.f32 %v1494_v42  ;;  %vm1634_vm14 = vmor %vm1632_vm13, %vm1633_vm12  ;;  %vm1642_vm0 = vweird.f32 %v1494_v42 }
 0x35b   : > { %v1625_v17 = vsel %vm1624_vm11, %v2256_v20, %v1621_v16  ;;  %v1628_v41 = vmul.f32 %v2258_v8, %v1627_v33 }
 0x35c   : > { %v1668_v30 = vmul.f32 %v1625_v17, %v2997_v1 }
 0x35d   : > { %v1629_v37 = vmul.f32 0.5, %v1628_v41 }
 0x35e   : > { %1684 = vst.msk [vmem:[%s3024_s11 + $0x60] sm:$0xff] %vm1431_vm2, %v1668_v30 }
 0x35f   : > { %v1630_v63 = vsub.f32 1.5, %v1629_v37  ;;  %v1479_v52 = vpop.xlane.xlu0 %1478 }
 0x360   : > { %v2260_v54 = vpop.eup %2259  ;;  %v1495_v34 = vmax.f32 %v1479_v52, 1e-24 }
 0x361   : > { %v1631_v21 = vmul.f32 %v2258_v8, %v1630_v63  ;;  %v1637_v55 = vmul.f32 %v2260_v54, %v1494_v42  ;;  %vm1643_vm15 = vweird.f32 %v2260_v54 }
 0x362   : > { %2261 = vrsqrt.f32 %v1495_v34  ;;  %vm1644_vm1 = vmor %vm1642_vm0, %vm1643_vm15  ;;  %vm1652_vm4 = vweird.f32 %v1495_v34 }
 0x363   : > { %v1635_v56 = vsel %vm1634_vm14, %v2258_v8, %v1631_v21  ;;  %v1638_v48 = vmul.f32 %v2260_v54, %v1637_v55 }
 0x364   : > { %v1669_v57 = vmul.f32 %v1635_v56, %v3003_v4 }
 0x365   : > { %v1639_v1 = vmul.f32 0.5, %v1638_v48 }
 0x366   : > { %1685 = vst.msk [vmem:[%s3024_s11 + $0x68] sm:$0xff] %vm1431_vm2, %v1669_v57 }
 0x367   : > { %v1640_v23 = vsub.f32 1.5, %v1639_v1 }
 0x368   : > { %v2262_v26 = vpop.eup %2261 }
 0x369   : > { %v1641_v62 = vmul.f32 %v2260_v54, %v1640_v23  ;;  %v1647_v0 = vmul.f32 %v2262_v26, %v1495_v34  ;;  %vm1653_vm3 = vweird.f32 %v2262_v26 }
 0x36a   : > { %vm1654_vm5 = vmor %vm1652_vm4, %vm1653_vm3 }
 0x36b   : > { %v1645_v61 = vsel %vm1644_vm1, %v2260_v54, %v1641_v62  ;;  %v1648_v29 = vmul.f32 %v2262_v26, %v1647_v0 }
 0x36c   : > { %v1670_v14 = vmul.f32 %v1645_v61, %v3009_v7 }
 0x36d   : > { %v1649_v2 = vmul.f32 0.5, %v1648_v29 }
 0x36e   : > { %1686 = vst.msk [vmem:[%s3024_s11 + $0x70] sm:$0xff] %vm1431_vm2, %v1670_v14 }
 0x36f   : > { %v1650_v24 = vsub.f32 1.5, %v1649_v2 }
 0x371   : > { %v1651_v4 = vmul.f32 %v2262_v26, %v1650_v24 }
 0x373   : > { %v1655_v3 = vsel %vm1654_vm5, %v2262_v26, %v1651_v4 }
 0x374   : > { %v1671_v50 = vmul.f32 %v1655_v3, %v3015_v11 }
 0x376   : > { %1687 = vst.msk [vmem:[%s3024_s11 + $0x78] sm:$0xff] %vm1431_vm2, %v1671_v50 }
 0x377 PF: > { %s17_s24 = sadd.s32 1, %s2269_s24  }
 0x378   : > { %p14_p4 = scmp.ge.s32.totalorder %s17_s24, 4  }
 0x37a   :  { %16 = sbr.rel (!%p14_p4) target bundleno = 1 (0x1), region = 78 }

// kernel: tpu_custom_call.1
= control target key start
LH: loop header
LB: loop body
LE: loop exit
PB: predicated region body
PF: predicated region fallthrough
CT: control target
= control target key end

     0   :  { %s2311_s24 = smov 0   ;;  %s3077_s0 = inlined_call_operand.vmem [shape: bf16[256,300], index: 0, kind: input, shape index: {}]   ;;  %s3078_s1 = inlined_call_operand.vmem [shape: bf16[300,256], index: 1, kind: input, shape index: {}]   ;;  %s3079_s2 = inlined_call_operand.vmem [shape: f32[1,256], index: 2, kind: input, shape index: {}]   ;;  %s3080_s3 = inlined_call_operand.vmem [shape: bf16[256,128], index: 3, kind: input, shape index: {}]   ;;  %s3081_s4 = inlined_call_operand.vmem [shape: f32[1,128], index: 4, kind: input, shape index: {}]   ;;  %s3082_s5 = inlined_call_operand.vmem [shape: bf16[128,64], index: 5, kind: input, shape index: {}]   ;;  %s3083_s6 = inlined_call_operand.vmem [shape: f32[1,64], index: 6, kind: input, shape index: {}]   ;;  %s3084_s7 = inlined_call_operand.vmem [shape: f32[256,64], index: 7, kind: output, shape index: {}]  }
   0x1 LB: > { %s1744_s25 = sadd.s32 4294967295, %s2269_s24   ;;  %p1748_p0 = scmp.ge.s32.totalorder %s2269_s24, 1  ;;  %s2269_s24 = sphi %s2311_s24, %s17_s24  }
   0x2   : > { %p239_p1 = scmp.lt.s32.totalorder %s2269_s24, 3 }
   0x4   : > { %p240_p2 = pnand %p1748_p0, %p239_p1 }
   0x5   : > { %s1749_s23 = sshll.u32 (!%p240_p2), %s1744_s25, 4 }
   0x6   : > { %243 = sbr.rel (%p240_p2) target bundleno = 887 (0x377), region = 48  ;;  %p273_p3 = scmp.lt.s32.totalorder (!%p240_p2), %s1749_s23, 31 }
   0xb   : > { %v1907_v0 = vld [vmem:[%s3078_s1 + $0x70] sm:$0xf]  ;;  %v2154_v1 = vld [vmem:[%s3078_s1 + $0x74] sm:$0xf0]  ;;  %v1899_v2 = vld [vmem:[%s3078_s1 + $0x60] sm:$0xf] }
   0xc   : > { %v1908_v3 = vor.u32 %v2154_v1, %v1907_v0  ;;  %v2152_v4 = vld [vmem:[%s3078_s1 + $0x64] sm:$0xf0]  ;;  %v1891_v6 = vld [vmem:[%s3078_s1 + $0x50] sm:$0xf]  ;;  %v2150_v7 = vld [vmem:[%s3078_s1 + $0x54] sm:$0xf0] }
   0xd   : > { %v1900_v5 = vor.u32 %v2152_v4, %v1899_v2  ;;  %v1995_v8 = vld [vmem:[%s3078_s1 + $0x120] sm:$0xf]  ;;  %v1892_v9 = vor.u32 %v2150_v7, %v1891_v6  ;;  %v2176_v10 = vld [vmem:[%s3078_s1 + $0x124] sm:$0x30]  ;;  %vm695_vm0 = vcmask 1045504   ;;  %s3086_s23 = smov (!%p273_p3, %s1749_s23), 31 }
   0xe   : > { %702 = vmatpush.bf16.msra.mxu0 %v1908_v3  ;;  %2201 = vmatpush.bf16.msra.mxu1 %v1908_v3  ;;  %v1883_v11 = vld [vmem:[%s3078_s1 + $0x40] sm:$0xf]  ;;  %v2148_v12 = vld [vmem:[%s3078_s1 + $0x44] sm:$0xf0]  ;;  %v1996_v13 = vor.u32 %v2176_v10, %v1995_v8  ;;  %v1875_v16 = vld [vmem:[%s3078_s1 + $0x30] sm:$0xf] }
   0xf   : > { %2202 = vmatpush.bf16.msra.mxu3 %v1908_v3  ;;  %v1884_v14 = vor.u32 %v2148_v12, %v1883_v11  ;;  %v2146_v17 = vld [vmem:[%s3078_s1 + $0x34] sm:$0xf0]  ;;  %v1867_v19 = vld [vmem:[%s3078_s1 + $0x20] sm:$0xf]  ;;  %v2144_v20 = vld [vmem:[%s3078_s1 + $0x24] sm:$0xf0] }
  0x10   : > { %v697_v15 = vsel %vm695_vm0, %v1996_v13, 0  ;;  %v1876_v18 = vor.u32 %v2146_v17, %v1875_v16  ;;  %v1868_v21 = vor.u32 %v2144_v20, %v1867_v19  ;;  %s2220_s10 = smul.u32 12, %s3086_s23  ;;  %v1859_v22 = vld [vmem:[%s3078_s1 + $0x10] sm:$0xf]  ;;  %v2142_v23 = vld [vmem:[%s3078_s1 + $0x14] sm:$0xf0] }
  0x11   : > { %2217 = vmatpush.bf16.msra.mxu2 %v697_v15  ;;  %v1860_v24 = vor.u32 %v2142_v23, %v1859_v22  ;;  %v1851_v25 = vld [vmem:[%s3078_s1] sm:$0xf]  ;;  %v2140_v26 = vld [vmem:[%s3078_s1 + $0x4] sm:$0xf0]  ;;  %v1987_v27 = vld [vmem:[%s3078_s1 + $0x110] sm:$0xf] }
  0x12   : > { %703 = vmatpush.bf16.msra.mxu0 %v1900_v5  ;;  %2203 = vmatpush.bf16.msra.mxu1 %v1900_v5  ;;  %s2377_s19 = scalar_lea.vmem %s3077_s0, %s2220_s10  ;;  %v2174_v28 = vld [vmem:[%s3078_s1 + $0x114] sm:$0xf0]  ;;  %v1971_v29 = vld [vmem:[%s3078_s1 + $0xf0] sm:$0xf]  ;;  %v1852_v33 = vor.u32 %v2140_v26, %v1851_v25  ;;  %v1963_v38 = vld [vmem:[%s3078_s1 + $0xe0] sm:$0xf] }
  0x13   : > { %2204 = vmatpush.bf16.msra.mxu3 %v1900_v5  ;;  %v2170_v30 = vld [vmem:[%s3078_s1 + $0xf4] sm:$0xf0]  ;;  %v1755_v31 = vld [vmem:[%s2377_s19] sm:$0xf]  ;;  %v1988_v32 = vor.u32 %v2174_v28, %v1987_v27  ;;  %v2116_v34 = vld [vmem:[%s2377_s19 + $0x8] sm:$0xf0] }
  0x14   : > { %v1815_v35 = vld [vmem:[%s2377_s19 + $0x78] sm:$0xf]  ;;  %v2131_v36 = vld [vmem:[%s2377_s19 + $0x80] sm:$0xf0]  ;;  %v1972_v37 = vor.u32 %v2170_v30, %v1971_v29  ;;  %v2168_v39 = vld [vmem:[%s3078_s1 + $0xe4] sm:$0xf0]  ;;  %v2404_v40 = vor.u32 %v2116_v34, %v1755_v31 }
  0x15   : > { %2218 = vmatpush.bf16.msra.mxu2 %v1988_v32  ;;  %v2406_v41 = vor.u32 %v2131_v36, %v1815_v35  ;;  %v1964_v42 = vor.u32 %v2168_v39, %v1963_v38  ;;  %v1955_v43 = vld [vmem:[%s3078_s1 + $0xd0] sm:$0xf]  ;;  %v2166_v44 = vld [vmem:[%s3078_s1 + $0xd4] sm:$0xf0]  ;;  %v1947_v46 = vld [vmem:[%s3078_s1 + $0xc0] sm:$0xf] }
  0x16   : > { %704 = vmatpush.bf16.msra.mxu0 %v1892_v9  ;;  %2205 = vmatpush.bf16.msra.mxu1 %v1892_v9  ;;  %v1956_v45 = vor.u32 %v2166_v44, %v1955_v43  ;;  %v2164_v47 = vld [vmem:[%s3078_s1 + $0xc4] sm:$0xf0]  ;;  %v1939_v49 = vld [vmem:[%s3078_s1 + $0xb0] sm:$0xf]  ;;  %v2162_v50 = vld [vmem:[%s3078_s1 + $0xb4] sm:$0xf0] }
  0x17   : > { %2206 = vmatpush.bf16.msra.mxu3 %v1892_v9  ;;  %v1948_v48 = vor.u32 %v2164_v47, %v1947_v46  ;;  %v1767_v51 = vld [vmem:[%s2377_s19 + $0x18] sm:$0xf]  ;;  %v2119_v52 = vld [vmem:[%s2377_s19 + $0x20] sm:$0xf0]  ;;  %v1827_v53 = vld [vmem:[%s2377_s19 + $0x90] sm:$0xf]  ;;  %v1940_v57 = vor.u32 %v2162_v50, %v1939_v49 }
  0x18   : > { %v2134_v54 = vld [vmem:[%s2377_s19 + $0x98] sm:$0xf0]  ;;  %v2175_v55 = vld [vmem:[%s3078_s1 + $0x124] sm:$0xf]  ;;  %v1997_v56 = vld [vmem:[%s3078_s1 + $0x128] sm:$0x30]  ;;  %v2444_v60 = vor.u32 %v2119_v52, %v1767_v51 }
  0x19   : > { %v1931_v58 = vld [vmem:[%s3078_s1 + $0xa0] sm:$0xf]  ;;  %v2160_v59 = vld [vmem:[%s3078_s1 + $0xa4] sm:$0xf0]  ;;  %v2446_v61 = vor.u32 %v2134_v54, %v1827_v53  ;;  %v2000_v62 = vor.u32 %v2175_v55, %v1997_v56  ;;  %v1923_v0 = vld [vmem:[%s3078_s1 + $0x90] sm:$0xf] }
  0x1a   : > { %705 = vmatpush.bf16.msra.mxu0 %v1884_v14  ;;  %2207 = vmatpush.bf16.msra.mxu1 %v1884_v14  ;;  %v1932_v63 = vor.u32 %v2160_v59, %v1931_v58  ;;  %v2158_v1 = vld [vmem:[%s3078_s1 + $0x94] sm:$0xf0]  ;;  %v1979_v2 = vld [vmem:[%s3078_s1 + $0x100] sm:$0xf]  ;;  %v2172_v3 = vld [vmem:[%s3078_s1 + $0x104] sm:$0xf0] }
  0x1b   : > { %2208 = vmatpush.bf16.msra.mxu3 %v1884_v14  ;;  %v700_v4 = vsel %vm695_vm0, %v2000_v62, 0  ;;  %v1980_v5 = vor.u32 %v2172_v3, %v1979_v2  ;;  %v1924_v6 = vor.u32 %v2158_v1, %v1923_v0  ;;  %v1915_v7 = vld [vmem:[%s3078_s1 + $0x80] sm:$0xf]  ;;  %v2156_v8 = vld [vmem:[%s3078_s1 + $0x84] sm:$0xf0]  ;;  %vm670_vm1 = vcmask 359424  }
  0x1c   : > { %v1916_v9 = vor.u32 %v2156_v8, %v1915_v7  ;;  %v1779_v10 = vld [vmem:[%s2377_s19 + $0x30] sm:$0xf]  ;;  %v2122_v11 = vld [vmem:[%s2377_s19 + $0x38] sm:$0xf0]  ;;  %v2115_v12 = vld [vmem:[%s2377_s19 + $0x4] sm:$0xf] }
  0x1d   : > { %2219 = vmatpush.bf16.msra.mxu2 %v1980_v5  ;;  %v1757_v13 = vld [vmem:[%s2377_s19 + $0xc] sm:$0xf0]  ;;  %v2473_v14 = vor.u32 %v2122_v11, %v1779_v10  ;;  %v1791_v16 = vld [vmem:[%s2377_s19 + $0x48] sm:$0xf]  ;;  %v2125_v17 = vld [vmem:[%s2377_s19 + $0x50] sm:$0xf0] }
  0x1e   : > { %706 = vmatpush.bf16.msra.mxu0 %v1876_v18  ;;  %2209 = vmatpush.bf16.msra.mxu1 %v1876_v18  ;;  %v1769_v19 = vld [vmem:[%s2377_s19 + $0x24] sm:$0xf0]  ;;  %v2483_v20 = vor.u32 %v2125_v17, %v1791_v16  ;;  %v1803_v22 = vld [vmem:[%s2377_s19 + $0x60] sm:$0xf]  ;;  %v2128_v23 = vld [vmem:[%s2377_s19 + $0x68] sm:$0xf0] }
  0x1f   : > { %2210 = vmatpush.bf16.msra.mxu3 %v1876_v18  ;;  %v2118_v18 = vld [vmem:[%s2377_s19 + $0x1c] sm:$0xf]  ;;  %v1781_v25 = vld [vmem:[%s2377_s19 + $0x3c] sm:$0xf0]  ;;  %v2493_v26 = vor.u32 %v2128_v23, %v1803_v22  ;;  %v2132_v29 = vld [vmem:[%s2377_s19 + $0x88] sm:$0xf0] }
  0x20   : > { %v1823_v28 = vld [vmem:[%s2377_s19 + $0x80] sm:$0xf]  ;;  %v2169_v31 = vld [vmem:[%s3078_s1 + $0xf4] sm:$0xf]  ;;  %v1989_v35 = vld [vmem:[%s3078_s1 + $0x118] sm:$0xf0] }
  0x21   : > { %v2499_v30 = vor.u32 %v2132_v29, %v1823_v28  ;;  %v2167_v36 = vld [vmem:[%s3078_s1 + $0xe4] sm:$0xf]  ;;  %v2153_v39 = vld [vmem:[%s3078_s1 + $0x74] sm:$0xf]  ;;  %v1793_v46 = vld [vmem:[%s2377_s19 + $0x54] sm:$0xf0] }
  0x22   : > { %707 = vmatpush.bf16.msra.mxu0 %v1868_v21  ;;  %2211 = vmatpush.bf16.msra.mxu1 %v1868_v21  ;;  %v1763_v47 = vld [vmem:[%s2377_s19 + $0x8] sm:$0xf]  ;;  %v1835_v51 = vld [vmem:[%s2377_s19 + $0x98] sm:$0xf]  ;;  %v2135_v52 = vld [vmem:[%s2377_s19 + $0xa0] sm:$0xf0] }
  0x23   : > { %2212 = vmatpush.bf16.msra.mxu3 %v1868_v21  ;;  %v2485_v21 = vor.u32 %v2118_v18, %v1769_v19  ;;  %2006 = vmatmul.msk.bf16.vlgmr.msra.gmra.mxu2 %vm670_vm1, %v2499_v30  ;;  %v2539_v53 = vor.u32 %v2135_v52, %v1835_v51  ;;  %v2151_v54 = vld [vmem:[%s3078_s1 + $0x64] sm:$0xf]  ;;  %v1901_v55 = vld [vmem:[%s3078_s1 + $0x68] sm:$0xf0]  ;;  %v2165_v56 = vld [vmem:[%s3078_s1 + $0xd4] sm:$0xf] }
  0x24   : > { %v1957_v58 = vld [vmem:[%s3078_s1 + $0xd8] sm:$0xf0]  ;;  %v2149_v59 = vld [vmem:[%s3078_s1 + $0x54] sm:$0xf]  ;;  %v2163_v0 = vld [vmem:[%s3078_s1 + $0xc4] sm:$0xf] }
  0x25   : > { %v1893_v62 = vld [vmem:[%s3078_s1 + $0x58] sm:$0xf0]  ;;  %v1949_v1 = vld [vmem:[%s3078_s1 + $0xc8] sm:$0xf0]  ;;  %v2127_v7 = vld [vmem:[%s2377_s19 + $0x64] sm:$0xf] }
  0x26   : > { %708 = vmatpush.bf16.msra.mxu0 %v1860_v24  ;;  %2213 = vmatpush.bf16.msra.mxu1 %v1860_v24  ;;  %v1896_v2 = vor.u32 %v2149_v59, %v1893_v62  ;;  %v1952_v3 = vor.u32 %v2163_v0, %v1949_v1  ;;  %v1805_v8 = vld [vmem:[%s2377_s19 + $0x6c] sm:$0xf0]  ;;  %v2120_v10 = vld [vmem:[%s2377_s19 + $0x28] sm:$0xf0]  ;;  %v1839_v11 = vld [vmem:[%s2377_s19 + $0xa8] sm:$0xf] }
  0x27   : > { %2214 = vmatpush.bf16.msra.mxu3 %v1860_v24  ;;  %v2121_v24 = vld [vmem:[%s2377_s19 + $0x34] sm:$0xf]  ;;  %v1877_v19 = vld [vmem:[%s3078_s1 + $0x38] sm:$0xf0]  ;;  %v1847_v23 = vld [vmem:[%s2377_s19 + $0xb0] sm:$0xf] }
  0x28   : > { %v2495_v27 = vor.u32 %v2121_v24, %v1781_v25  ;;  %v2145_v18 = vld [vmem:[%s3078_s1 + $0x34] sm:$0xf]  ;;  %v2138_v24 = vld [vmem:[%s2377_s19 + $0xb8] sm:$0xf0]  ;;  %v1853_v51 = vld [vmem:[%s3078_s1 + $0x8] sm:$0xf0] }
  0x29   : > { %v1880_v22 = vor.u32 %v2145_v18, %v1877_v19  ;;  %v2597_v25 = vor.u32 %v2138_v24, %v1847_v23  ;;  %v2161_v28 = vld [vmem:[%s3078_s1 + $0xb4] sm:$0xf]  ;;  %v1941_v29 = vld [vmem:[%s3078_s1 + $0xb8] sm:$0xf0]  ;;  %v2155_v59 = vld [vmem:[%s3078_s1 + $0x84] sm:$0xf] }
  0x2a   : > { %709 = vmatpush.bf16.msra.mxu0 %v1852_v33  ;;  %2215 = vmatpush.bf16.msra.mxu1 %v1852_v33  ;;  %v2130_v52 = vld [vmem:[%s2377_s19 + $0x7c] sm:$0xf]  ;;  %v1917_v62 = vld [vmem:[%s3078_s1 + $0x88] sm:$0xf0]  ;;  %v1811_v18 = vld [vmem:[%s2377_s19 + $0x68] sm:$0xf] }
  0x2b   : > { %2216 = vmatpush.bf16.msra.mxu3 %v1852_v33  ;;  %v2173_v33 = vld [vmem:[%s3078_s1 + $0x114] sm:$0xf]  ;;  %vm1431_vm2 = vcmask 523264   ;;  %s1752_s8 = sshll.u32 %s3086_s23, 3 }
  0x2c   : > { %v1992_v38 = vor.u32 %v2173_v33, %v1989_v35  ;;  %v1869_v33 = vld [vmem:[%s3078_s1 + $0x28] sm:$0xf0]  ;;  %v2159_v35 = vld [vmem:[%s3078_s1 + $0xa4] sm:$0xf]  ;;  %s3024_s11 = scalar_lea.vmem %s3084_s7, %s1752_s8 }
  0x2d   : > { %710 = vmatmul.bf16.vlgmr.msra.gmra.mxu0 %v2404_v40  ;;  %735 = vmatmul.bf16.vlgmr.msra.gmra.mxu1 %v2406_v41 }
  0x2e   : > { %805 = vmatpush.bf16.msrb.mxu0 %v697_v15  ;;  %751 = vmatpush.bf16.msrb.mxu1 %v1972_v37  ;;  %v2475_v15 = vor.u32 %v2115_v12, %v1757_v13  ;;  %v1965_v37 = vld [vmem:[%s3078_s1 + $0xe8] sm:$0xf0]  ;;  %v2137_v12 = vld [vmem:[%s2377_s19 + $0xb0] sm:$0xf0]  ;;  %v2582_v13 = vor.u32 %v2127_v7, %v1805_v8 }
  0x2f   : > { %v1968_v43 = vor.u32 %v2167_v36, %v1965_v37  ;;  %v2586_v17 = vor.u32 %v2137_v12, %v1839_v11  ;;  %v1933_v36 = vld [vmem:[%s3078_s1 + $0xa8] sm:$0xf0]  ;;  %v1841_v12 = vld [vmem:[%s2377_s19 + $0xb4] sm:$0xf0] }
  0x30   : > { %v1936_v37 = vor.u32 %v2159_v35, %v1933_v36  ;;  %v2136_v11 = vld [vmem:[%s2377_s19 + $0xac] sm:$0xf] }
  0x31   : > { %745 = vmatmul.bf16.vlgmr.msra.gmra.mxu3 %v2586_v17  ;;  %v2693_v19 = vor.u32 %v2136_v11, %v1841_v12  ;;  %v2190_v35 = vld [vmem:[%s3080_s3 + $0x68] sm:$0xff] }
  0x32   : > { %752 = vmatpush.bf16.msrb.mxu1 %v1964_v42  ;;  %806 = vmatpush.bf16.msrb.mxu0 %v1988_v32  ;;  %v1973_v32 = vld [vmem:[%s3078_s1 + $0xf8] sm:$0xf0] }
  0x33   : > { %v1976_v34 = vor.u32 %v2169_v31, %v1973_v32  ;;  %v1909_v42 = vld [vmem:[%s3078_s1 + $0x78] sm:$0xf0]  ;;  %2007 = vmatmul.msk.bf16.gmra.mxu2 %vm670_vm1, %v2539_v53  ;;  %v1944_v31 = vor.u32 %v2161_v28, %v1941_v29  ;;  %v2143_v32 = vld [vmem:[%s3078_s1 + $0x24] sm:$0xf] }
  0x34   : > { %v1912_v44 = vor.u32 %v2153_v39, %v1909_v42  ;;  %v1861_v39 = vld [vmem:[%s3078_s1 + $0x18] sm:$0xf0] }
  0x35   : > { %898 = vmatpush.bf16.msrb.mxu2 %v1976_v34  ;;  %v1872_v34 = vor.u32 %v2143_v32, %v1869_v33  ;;  %v2183_v32 = vld [vmem:[%s3080_s3 + $0x30] sm:$0xff] }
  0x36   : > { %753 = vmatpush.bf16.msrb.mxu1 %v1956_v45  ;;  %807 = vmatpush.bf16.msrb.mxu0 %v1980_v5  ;;  %v2124_v45 = vld [vmem:[%s2377_s19 + $0x4c] sm:$0xf] }
  0x37   : > { %849 = vmatpush.bf16.msrb.mxu3 %v1912_v44  ;;  %v2533_v49 = vor.u32 %v2124_v45, %v1793_v46  ;;  %v1885_v5 = vld [vmem:[%s3078_s1 + $0x48] sm:$0xf0]  ;;  %v2157_v45 = vld [vmem:[%s3078_s1 + $0x94] sm:$0xf] }
  0x38   : > { %v1981_v44 = vld [vmem:[%s3078_s1 + $0x108] sm:$0xf0] }
  0x39   : > { %899 = vmatpush.bf16.msrb.mxu2 %v1968_v43  ;;  %v2171_v43 = vld [vmem:[%s3078_s1 + $0x104] sm:$0xf] }
  0x3a   : > { %754 = vmatpush.bf16.msrb.mxu1 %v1948_v48  ;;  %952 = vmatpush.bf16.msra.mxu0 %v700_v4  ;;  %v2117_v48 = vld [vmem:[%s2377_s19 + $0x10] sm:$0xf0]  ;;  %v2147_v4 = vld [vmem:[%s3078_s1 + $0x44] sm:$0xf]  ;;  %v1984_v46 = vor.u32 %v2171_v43, %v1981_v44 }
  0x3b   : > { %v2535_v50 = vor.u32 %v2117_v48, %v1763_v47  ;;  %v1925_v47 = vld [vmem:[%s3078_s1 + $0x98] sm:$0xf0]  ;;  %v2139_v48 = vld [vmem:[%s3078_s1 + $0x4] sm:$0xf] }
  0x3d   : > { %715 = vmatmul.bf16.gmra.mxu0 %v2444_v60  ;;  %740 = vmatmul.bf16.gmra.mxu1 %v2446_v61 }
  0x3e   : > { %755 = vmatpush.bf16.msrb.mxu1 %v1940_v57  ;;  %953 = vmatpush.bf16.msra.mxu0 %v1992_v38  ;;  %v1904_v57 = vor.u32 %v2151_v54, %v1901_v55  ;;  %v2141_v38 = vld [vmem:[%s3078_s1 + $0x14] sm:$0xf]  ;;  %v1928_v54 = vor.u32 %v2157_v45, %v1925_v47  ;;  %v1856_v55 = vor.u32 %v2139_v48, %v1853_v51 }
  0x3f   : > { %v1864_v42 = vor.u32 %v2141_v38, %v1861_v39  ;;  %v2178_v38 = vld [vmem:[%s3080_s3 + $0x8] sm:$0xff] }
  0x40   : > { %850 = vmatpush.bf16.msrb.mxu3 %v1904_v57  ;;  %v1787_v57 = vld [vmem:[%s2377_s19 + $0x38] sm:$0xf] }
  0x42   : > { %756 = vmatpush.bf16.msrb.mxu1 %v1932_v63  ;;  %v1960_v63 = vor.u32 %v2165_v56, %v1957_v58  ;;  %v1817_v56 = vld [vmem:[%s2377_s19 + $0x84] sm:$0xf0]  ;;  %v2123_v58 = vld [vmem:[%s2377_s19 + $0x40] sm:$0xf0]  ;;  %954 = vmatpush.bf16.msra.mxu0 %v1984_v46  ;;  %v2772_v46 = vld [vmem:[%s3079_s2] sm:$0x3] }
  0x43   : > { %2008 = vmatmul.msk.bf16.gmra.mxu2 %vm670_vm1, %v2597_v25  ;;  %v2656_v0 = vor.u32 %v2130_v52, %v1817_v56  ;;  %v2658_v1 = vor.u32 %v2123_v58, %v1787_v57  ;;  %v2775_v47 = vperm.slane %v2772_v46, 0 }
  0x44   : > { %900 = vmatpush.bf16.msrb.mxu2 %v1960_v63  ;;  %851 = vmatpush.bf16.msrb.mxu3 %v1896_v2  ;;  %v1920_v63 = vor.u32 %v2155_v59, %v1917_v62  ;;  %v2133_v2 = vld [vmem:[%s2377_s19 + $0x94] sm:$0xf] }
  0x46   : > { %757 = vmatpush.bf16.msrb.mxu1 %v1924_v6  ;;  %v1888_v6 = vor.u32 %v2147_v4, %v1885_v5  ;;  %v1799_v4 = vld [vmem:[%s2377_s19 + $0x50] sm:$0xf]  ;;  %v2126_v5 = vld [vmem:[%s2377_s19 + $0x58] sm:$0xf0] }
  0x47   : > { %v2671_v7 = vor.u32 %v2126_v5, %v1799_v4 }
  0x48   : > { %901 = vmatpush.bf16.msrb.mxu2 %v1952_v3  ;;  %852 = vmatpush.bf16.msrb.mxu3 %v1888_v6  ;;  %v1829_v3 = vld [vmem:[%s2377_s19 + $0x9c] sm:$0xf0] }
  0x49   : > { %v2669_v6 = vor.u32 %v2133_v2, %v1829_v3  ;;  %v2187_v3 = vld [vmem:[%s3080_s3 + $0x50] sm:$0xff] }
  0x4a   : > { %758 = vmatpush.bf16.msrb.mxu1 %v1916_v9  ;;  %v1775_v9 = vld [vmem:[%s2377_s19 + $0x20] sm:$0xf] }
  0x4b   : > { %v2584_v16 = vor.u32 %v2120_v10, %v1775_v9  ;;  %v2192_v9 = vld [vmem:[%s3080_s3 + $0x78] sm:$0xff] }
  0x4c   : > { %853 = vmatpush.bf16.msrb.mxu3 %v1880_v22  ;;  %902 = vmatpush.bf16.msrb.mxu2 %v1944_v31 }
  0x4d   : > { %720 = vmatmul.bf16.gmra.mxu0 %v2473_v14  ;;  %759 = vmatmul.bf16.vlgmr.msrb.gmra.mxu1 %v2475_v15 }
  0x50   : > { %854 = vmatpush.bf16.msrb.mxu3 %v1872_v34  ;;  %903 = vmatpush.bf16.msrb.mxu2 %v1936_v37  ;;  %v2179_v37 = vld [vmem:[%s3080_s3 + $0x10] sm:$0xff] }
  0x54   : > { %855 = vmatpush.bf16.msrb.mxu3 %v1864_v42  ;;  %904 = vmatpush.bf16.msrb.mxu2 %v1928_v54 }
  0x58   : > { %856 = vmatpush.bf16.msrb.mxu3 %v1856_v55  ;;  %905 = vmatpush.bf16.msrb.mxu2 %v1920_v63 }
  0x5b   : > { %857 = vmatmul.bf16.vlgmr.msrb.gmra.mxu3 %v2404_v40  ;;  %906 = vmatmul.bf16.vlgmr.msrb.gmra.mxu2 %v2475_v15 }
  0x5c   : > { %1225 = vmatpush.bf16.msra.mxu3 %v2192_v9 }
  0x5d   : > { %725 = vmatmul.bf16.gmra.mxu0 %v2483_v20  ;;  %764 = vmatmul.bf16.gmra.mxu1 %v2485_v21 }
  0x6b   : > { %862 = vmatmul.bf16.gmra.mxu3 %v2444_v60  ;;  %911 = vmatmul.bf16.gmra.mxu2 %v2485_v21  ;;  %v2129_v60 = vld [vmem:[%s2377_s19 + $0x70] sm:$0xf0]  ;;  %v2184_v21 = vld [vmem:[%s3080_s3 + $0x38] sm:$0xff] }
  0x6c   : > { %v2695_v22 = vor.u32 %v2129_v60, %v1811_v18  ;;  %1176 = vmatpush.bf16.msra.mxu1 %v2184_v21 }
  0x6d   : > { %730 = vmatmul.bf16.gmra.mxu0 %v2493_v26  ;;  %769 = vmatmul.bf16.gmra.mxu1 %v2495_v27 }
  0x70   : > { %1177 = vmatpush.bf16.msra.mxu1 %v2183_v32 }
  0x7b   : > { %867 = vmatmul.bf16.gmra.mxu3 %v2473_v14  ;;  %916 = vmatmul.bf16.gmra.mxu2 %v2495_v27  ;;  %v2191_v14 = vld [vmem:[%s3080_s3 + $0x70] sm:$0xff]  ;;  %v2182_v27 = vld [vmem:[%s3080_s3 + $0x28] sm:$0xff] }
  0x7c   : > { %1226 = vmatpush.bf16.msra.mxu3 %v2191_v14  ;;  %1178 = vmatpush.bf16.msra.mxu1 %v2182_v27 }
  0x7d   : > { %774 = vmatmul.bf16.gmra.mxu1 %v2533_v49  ;;  %2001 = vmatmul.msk.bf16.vlgmr.msrb.gmra.mxu0 %vm670_vm1, %v2535_v50 }
  0x80   : > { %1227 = vmatpush.bf16.msra.mxu3 %v2190_v35 }
  0x8b   : > { %872 = vmatmul.bf16.gmra.mxu3 %v2483_v20  ;;  %921 = vmatmul.bf16.gmra.mxu2 %v2533_v49  ;;  %v2181_v20 = vld [vmem:[%s3080_s3 + $0x20] sm:$0xff]  ;;  %v2180_v49 = vld [vmem:[%s3080_s3 + $0x18] sm:$0xff] }
  0x8c   : > { %1179 = vmatpush.bf16.msra.mxu1 %v2181_v20 }
  0x8d   : > { %779 = vmatmul.bf16.gmra.mxu1 %v2582_v13  ;;  %2002 = vmatmul.msk.bf16.gmra.mxu0 %vm670_vm1, %v2584_v16 }
  0x90   : > { %1180 = vmatpush.bf16.msra.mxu1 %v2180_v49 }
  0x94   : > { %1181 = vmatpush.bf16.msra.mxu1 %v2179_v37 }
  0x98   : > { %1182 = vmatpush.bf16.msra.mxu1 %v2178_v38 }
  0x9b   : > { %877 = vmatmul.bf16.gmra.mxu3 %v2493_v26  ;;  %926 = vmatmul.bf16.gmra.mxu2 %v2582_v13  ;;  %v2177_v26 = vld [vmem:[%s3080_s3] sm:$0xff] }
  0x9c   : > { %1183 = vmatpush.bf16.msra.mxu1 %v2177_v26 }
  0x9d   : > { %784 = vmatmul.bf16.gmra.mxu1 %v2656_v0  ;;  %2003 = vmatmul.msk.bf16.gmra.mxu0 %vm670_vm1, %v2658_v1 }
  0xa6   : > { %v2765_v44 = vpop.f32.mrf.mxu2 }
  0xaa   : > { %v2673_v40 = vpop.f32.mrf.mxu0  ;;  %v2675_v8 = vpop.f32.mrf.mxu1 }
  0xab   : > { %882 = vmatmul.bf16.gmra.mxu3 %v2406_v41  ;;  %931 = vmatmul.bf16.gmra.mxu2 %v2656_v0  ;;  %v2188_v41 = vld [vmem:[%s3080_s3 + $0x58] sm:$0xff]  ;;  %v712_v54 = vadd.f32 %v2673_v40, %v2775_v47 }
  0xad   : > { %789 = vmatmul.bf16.gmra.mxu1 %v2669_v6  ;;  %2004 = vmatmul.msk.bf16.gmra.mxu0 %vm670_vm1, %v2671_v7 }
  0xae   : > { %v2777_v48 = vpop.f32.mrf.mxu2 }
  0xb2   : > { %v2682_v15 = vpop.f32.mrf.mxu0  ;;  %v2687_v10 = vpop.f32.mrf.mxu1 }
  0xb3   : > { %v714_v55 = vadd.f32 %v2682_v15, %v2775_v47 }
  0xb4   : > { %v2805_v9 = vpop.f32.mrf.mxu3 }
  0xb6   : > { %v2790_v59 = vpop.f32.mrf.mxu2 }
  0xba   : > { %v2697_v23 = vpop.f32.mrf.mxu0  ;;  %v2706_v24 = vpop.f32.mrf.mxu1 }
  0xbb   : > { %887 = vmatmul.bf16.gmra.mxu3 %v2446_v61  ;;  %936 = vmatmul.bf16.gmra.mxu2 %v2669_v6  ;;  %v717_v6 = vadd.f32 %v2697_v23, %v2775_v47 }
  0xbd   : > { %794 = vmatmul.bf16.gmra.mxu1 %v2693_v19  ;;  %2005 = vmatmul.msk.bf16.gmra.mxu0 %vm670_vm1, %v2695_v22 }
  0xbe   : > { %v2795_v5 = vpop.f32.mrf.mxu2 }
  0xc2   : > { %v2709_v28 = vpop.f32.mrf.mxu0  ;;  %v2714_v29 = vpop.f32.mrf.mxu1 }
  0xc3   : > { %v719_v40 = vadd.f32 %v2709_v28, %v2775_v47  ;;  %v2812_v28 = vpop.f32.mrf.mxu3 }
  0xca   : > { %v2716_v31 = vpop.f32.mrf.mxu0  ;;  %v760_v33 = vpop.f32.mrf.mxu1 }
  0xcb   : > { %v761_v56 = vadd.f32 %v760_v33, %v712_v54  ;;  %892 = vmatmul.bf16.gmra.mxu3 %v2586_v17  ;;  %941 = vmatmul.bf16.gmra.mxu2 %v2693_v19  ;;  %v2807_v17 = vpop.f32.mrf.mxu2  ;;  %v2186_v19 = vld [vmem:[%s3080_s3 + $0x48] sm:$0xff]  ;;  %v722_v27 = vadd.f32 %v2716_v31, %v2775_v47 }
  0xcd   : > { %2009 = vmatmul.msk.bf16.vlgmr.msra.gmra.mxu0 %vm670_vm1, %v2535_v50 }
  0xd2   : > { %v2728_v34 = vpop.f32.mrf.mxu0  ;;  %v762_v36 = vpop.f32.mrf.mxu1 }
  0xd3   : > { %v763_v57 = vadd.f32 %v762_v36, %v714_v55  ;;  %v2818_v33 = vpop.f32.mrf.mxu2  ;;  %v724_v20 = vadd.f32 %v2728_v34, %v2775_v47 }
  0xda   : > { %v2739_v50 = vpop.f32.mrf.mxu0  ;;  %v765_v42 = vpop.f32.mrf.mxu1 }
  0xdb   : > { %v766_v15 = vadd.f32 %v765_v42, %v717_v6  ;;  %v727_v34 = vadd.f32 %v2739_v50, %v2775_v47 }
  0xdd   : > { %2010 = vmatmul.msk.bf16.gmra.mxu0 %vm670_vm1, %v2584_v16  ;;  %v2189_v16 = vld [vmem:[%s3080_s3 + $0x60] sm:$0xff] }
  0xde   : > { %1228 = vmatpush.bf16.msra.mxu3 %v2189_v16  ;;  %v858_v42 = vpop.f32.mrf.mxu3 }
  0xe2   : > { %v2751_v39 = vpop.f32.mrf.mxu0  ;;  %v767_v13 = vpop.f32.mrf.mxu1  ;;  %1229 = vmatpush.bf16.msra.mxu3 %v2188_v41 }
  0xe3   : > { %v768_v11 = vadd.f32 %v767_v13, %v719_v40  ;;  %v729_v55 = vadd.f32 %v2751_v39, %v2775_v47 }
  0xe6   : > { %1230 = vmatpush.bf16.msra.mxu3 %v2187_v3 }
  0xea   : > { %v2759_v43 = vpop.f32.mrf.mxu0  ;;  %v770_v51 = vpop.f32.mrf.mxu1  ;;  %1231 = vmatpush.bf16.msra.mxu3 %v2186_v19 }
  0xeb   : > { %v771_v35 = vadd.f32 %v770_v51, %v722_v27  ;;  %v860_v51 = vpop.f32.mrf.mxu3 }
  0xed   : > { %2011 = vmatmul.msk.bf16.gmra.mxu0 %vm670_vm1, %v2658_v1 }
  0xf2   : > { %v2767_v45 = vpop.f32.mrf.mxu0  ;;  %v772_v0 = vpop.f32.mrf.mxu1 }
  0xf3   : > { %v773_v49 = vadd.f32 %v772_v0, %v724_v20  ;;  %v734_v39 = vadd.f32 %v2767_v45, %v2775_v47  ;;  %v737_v45 = vadd.f32 %v2675_v8, %v2775_v47 }
  0xfa   : > { %v809_v52 = vpop.f32.mrf.mxu0 }
  0xfb   : > { %v810_v58 = vadd.f32 %v809_v52, %v761_v56  ;;  %v907_v52 = vpop.f32.mrf.mxu2 }
  0xfd   : > { %2012 = vmatmul.msk.bf16.gmra.mxu0 %vm670_vm1, %v2671_v7  ;;  %v996_v61 = vmax.f32 %v810_v58, 0.0  ;;  %v775_v7 = vpop.f32.mrf.mxu1 }
  0xfe   : > { %v776_v56 = vadd.f32 %v775_v7, %v727_v34 }
 0x102   : > { %v811_v62 = vpop.f32.mrf.mxu0 }
 0x103   : > { %v812_v63 = vadd.f32 %v811_v62, %v763_v57 }
 0x105   : > { %v998_v1 = vmax.f32 %v812_v63, 0.0  ;;  %v777_v32 = vpop.f32.mrf.mxu1  ;;  %v909_v63 = vpop.f32.mrf.mxu2 }
 0x106   : > { %v778_v57 = vadd.f32 %v777_v32, %v729_v55 }
 0x107   : > { %v1028_v2 = vpack.c.bf16 %v998_v1, %v996_v61 }
 0x109   : > { %1184 = vmatmul.bf16.vlgmr.msra.gmra.mxu1 %v1028_v2 }
 0x10a   : > { %v814_v4 = vpop.f32.mrf.mxu0 }
 0x10b   : > { %v815_v12 = vadd.f32 %v814_v4, %v766_v15  ;;  %v863_v4 = vpop.f32.mrf.mxu3 }
 0x10d   : > { %2013 = vmatmul.msk.bf16.gmra.mxu0 %vm670_vm1, %v2695_v22  ;;  %v1000_v21 = vmax.f32 %v815_v12, 0.0  ;;  %v780_v37 = vpop.f32.mrf.mxu1  ;;  %v912_v6 = vpop.f32.mrf.mxu2 }
 0x112   : > { %v816_v18 = vpop.f32.mrf.mxu0 }
 0x113   : > { %v817_v60 = vadd.f32 %v816_v18, %v768_v11  ;;  %v865_v18 = vpop.f32.mrf.mxu3 }
 0x115   : > { %v1002_v23 = vmax.f32 %v817_v60, 0.0  ;;  %v782_v54 = vpop.f32.mrf.mxu1  ;;  %v914_v32 = vpop.f32.mrf.mxu2 }
 0x116   : > { %v783_v15 = vadd.f32 %v782_v54, %v734_v39 }
 0x117   : > { %v1030_v14 = vpack.c.bf16 %v1002_v23, %v1000_v21  ;;  %v2838_v23 = vperm.slane %v2772_v46, 1 }
 0x119   : > { %1189 = vmatmul.bf16.gmra.mxu1 %v1030_v14  ;;  %v859_v19 = vadd.f32 %v858_v42, %v2838_v23  ;;  %v861_v46 = vadd.f32 %v860_v51, %v2838_v23  ;;  %v744_v51 = vadd.f32 %v2714_v29, %v2775_v47  ;;  %v2199_v29 = vld [vmem:[%s3082_s5 + $0x30] sm:$0xff] }
 0x11a   : > { %v819_v22 = vpop.f32.mrf.mxu0 }
 0x11b   : > { %v820_v36 = vadd.f32 %v819_v22, %v771_v35  ;;  %v868_v35 = vpop.f32.mrf.mxu3 }
 0x11d   : > { %2014 = vmatmul.msk.bf16.gmra.mxu0 %vm670_vm1, %v2499_v30  ;;  %v1004_v16 = vmax.f32 %v820_v36, 0.0  ;;  %v2185_v30 = vld [vmem:[%s3080_s3 + $0x40] sm:$0xff]  ;;  %v785_v2 = vpop.f32.mrf.mxu1  ;;  %v908_v36 = vadd.f32 %v907_v52, %v859_v19 }
 0x11e   : > { %1232 = vmatpush.bf16.msra.mxu3 %v2185_v30 }
 0x122   : > { %v821_v38 = vpop.f32.mrf.mxu0 }
 0x123   : > { %v822_v26 = vadd.f32 %v821_v38, %v773_v49  ;;  %v786_v49 = vadd.f32 %v785_v2, %v737_v45  ;;  %v917_v38 = vpop.f32.mrf.mxu2  ;;  %v870_v34 = vpop.f32.mrf.mxu3 }
 0x124   : > { %v871_v19 = vadd.f32 %v870_v34, %v2838_v23 }
 0x125   : > { %v1006_v13 = vmax.f32 %v822_v26, 0.0  ;;  %v787_v40 = vpop.f32.mrf.mxu1  ;;  %v835_v8 = vadd.f32 %v2765_v44, %v786_v49  ;;  %v910_v26 = vadd.f32 %v909_v63, %v861_v46  ;;  %v864_v44 = vadd.f32 %v863_v4, %v2838_v23 }
 0x127   : > { %v1032_v41 = vpack.c.bf16 %v1006_v13, %v1004_v16 }
 0x129   : > { %1194 = vmatmul.bf16.gmra.mxu1 %v1032_v41 }
 0x12a   : > { %v824_v31 = vpop.f32.mrf.mxu0 }
 0x12b   : > { %v825_v58 = vadd.f32 %v824_v31, %v776_v56  ;;  %v1016_v31 = vmax.f32 %v835_v8, 0.0 }
 0x12d   : > { %2015 = vmatmul.msk.bf16.gmra.mxu0 %vm670_vm1, %v2539_v53  ;;  %v1008_v61 = vmax.f32 %v825_v58, 0.0  ;;  %v732_v53 = vadd.f32 %v2759_v43, %v2775_v47  ;;  %v739_v43 = vadd.f32 %v2687_v10, %v2775_v47  ;;  %v790_v22 = vpop.f32.mrf.mxu1  ;;  %v919_v58 = vpop.f32.mrf.mxu2 }
 0x12f   : > { %v781_v7 = vadd.f32 %v780_v37, %v732_v53  ;;  %v788_v20 = vadd.f32 %v787_v40, %v739_v43  ;;  %v2200_v37 = vld [vmem:[%s3082_s5 + $0x38] sm:$0xff] }
 0x130   : > { %1366 = vmatpush.bf16.msra.mxu2 %v2200_v37 }
 0x131   : > { %v837_v10 = vadd.f32 %v2777_v48, %v788_v20  ;;  %v742_v48 = vadd.f32 %v2706_v24, %v2775_v47  ;;  %v873_v24 = vpop.f32.mrf.mxu3 }
 0x132   : > { %v826_v62 = vpop.f32.mrf.mxu0 }
 0x133   : > { %v827_v0 = vadd.f32 %v826_v62, %v778_v57  ;;  %v1018_v13 = vmax.f32 %v837_v10, 0.0  ;;  %v791_v63 = vadd.f32 %v790_v22, %v742_v48  ;;  %v2198_v22 = vld [vmem:[%s3082_s5 + $0x28] sm:$0xff] }
 0x134   : > { %1367 = vmatpush.bf16.msra.mxu2 %v2199_v29 }
 0x135   : > { %v1010_v1 = vmax.f32 %v827_v0, 0.0  ;;  %v792_v30 = vpop.f32.mrf.mxu1  ;;  %v1038_v56 = vpack.c.bf16 %v1018_v13, %v1016_v31  ;;  %v913_v0 = vadd.f32 %v912_v6, %v864_v44  ;;  %v922_v40 = vpop.f32.mrf.mxu2 }
 0x136   : > { %v793_v62 = vadd.f32 %v792_v30, %v744_v51 }
 0x137   : > { %v1034_v3 = vpack.c.bf16 %v1010_v1, %v1008_v61  ;;  %v866_v61 = vadd.f32 %v865_v18, %v2838_v23 }
 0x138   : > { %v842_v2 = vadd.f32 %v2795_v5, %v793_v62  ;;  %v869_v5 = vadd.f32 %v868_v35, %v2838_v23  ;;  %1368 = vmatpush.bf16.msra.mxu2 %v2198_v22  ;;  %v920_v35 = vadd.f32 %v919_v58, %v871_v19  ;;  %v2194_v19 = vld [vmem:[%s3082_s5 + $0x8] sm:$0xff] }
 0x139   : > { %1199 = vmatmul.bf16.gmra.mxu1 %v1034_v3  ;;  %v840_v3 = vadd.f32 %v2790_v59, %v791_v63  ;;  %v915_v4 = vadd.f32 %v914_v32, %v866_v61  ;;  %v747_v32 = vadd.f32 %v2805_v9, %v2775_v47  ;;  %v2196_v61 = vld [vmem:[%s3082_s5 + $0x18] sm:$0xff] }
 0x13a   : > { %v829_v50 = vpop.f32.mrf.mxu0  ;;  %v1022_v39 = vmax.f32 %v842_v2, 0.0  ;;  %v918_v45 = vadd.f32 %v917_v38, %v869_v5 }
 0x13b   : > { %v830_v11 = vadd.f32 %v829_v50, %v781_v7  ;;  %v1020_v6 = vmax.f32 %v840_v3, 0.0 }
 0x13d   : > { %2016 = vmatmul.msk.bf16.gmra.mxu0 %vm670_vm1, %v2597_v25  ;;  %v1012_v21 = vmax.f32 %v830_v11, 0.0  ;;  %v795_v1 = vpop.f32.mrf.mxu1 }
 0x142   : > { %v831_v12 = vpop.f32.mrf.mxu0 }
 0x143   : > { %v832_v60 = vadd.f32 %v831_v12, %v783_v15  ;;  %v1040_v12 = vpack.c.bf16 %v1022_v39, %v1020_v6 }
 0x145   : > { %v1014_v14 = vmax.f32 %v832_v60, 0.0  ;;  %v797_v60 = vpop.f32.mrf.mxu1 }
 0x147   : > { %v1036_v25 = vpack.c.bf16 %v1014_v14, %v1012_v21  ;;  %v749_v21 = vadd.f32 %v2812_v28, %v2775_v47  ;;  %v875_v14 = vpop.f32.mrf.mxu3 }
 0x149   : > { %1204 = vmatmul.bf16.gmra.mxu1 %v1036_v25  ;;  %v798_v43 = vadd.f32 %v797_v60, %v749_v21  ;;  %v796_v25 = vadd.f32 %v795_v1, %v747_v32 }
 0x14a   : > { %v956_v27 = vpop.f32.mrf.mxu0 }
 0x14b   : > { %v957_v42 = vadd.f32 %v956_v27, %v908_v36  ;;  %v924_v27 = vpop.f32.mrf.mxu2  ;;  %v847_v28 = vadd.f32 %v2818_v33, %v798_v43  ;;  %v845_v20 = vadd.f32 %v2807_v17, %v796_v25  ;;  %v876_v17 = vadd.f32 %v875_v14, %v2838_v23 }
 0x14d   : > { %v997_v52 = vmax.f32 %v957_v42, 0.0  ;;  %v1026_v46 = vmax.f32 %v847_v28, 0.0  ;;  %v1024_v37 = vmax.f32 %v845_v20, 0.0  ;;  %v925_v31 = vadd.f32 %v924_v27, %v876_v17 }
 0x14f   : > { %v878_v9 = vpop.f32.mrf.mxu3  ;;  %v1042_v8 = vpack.c.bf16 %v1026_v46, %v1024_v37 }
 0x152   : > { %v958_v16 = vpop.f32.mrf.mxu0 }
 0x153   : > { %v959_v41 = vadd.f32 %v958_v16, %v910_v26  ;;  %v927_v42 = vpop.f32.mrf.mxu2  ;;  %v874_v16 = vadd.f32 %v873_v24, %v2838_v23 }
 0x155   : > { %v999_v54 = vmax.f32 %v959_v41, 0.0  ;;  %v923_v13 = vadd.f32 %v922_v40, %v874_v16  ;;  %v2197_v41 = vld [vmem:[%s3082_s5 + $0x20] sm:$0xff] }
 0x156   : > { %1369 = vmatpush.bf16.msra.mxu2 %v2197_v41 }
 0x157   : > { %v1029_v55 = vpack.c.bf16 %v999_v54, %v997_v52  ;;  %v880_v30 = vpop.f32.mrf.mxu3 }
 0x159   : > { %1209 = vmatmul.bf16.gmra.mxu1 %v1038_v56  ;;  %1233 = vmatmul.bf16.vlgmr.msra.gmra.mxu3 %v1029_v55 }
 0x15a   : > { %v961_v57 = vpop.f32.mrf.mxu0  ;;  %1370 = vmatpush.bf16.msra.mxu2 %v2196_v61 }
 0x15b   : > { %v962_v50 = vadd.f32 %v961_v57, %v913_v0  ;;  %v929_v34 = vpop.f32.mrf.mxu2  ;;  %v879_v57 = vadd.f32 %v878_v9, %v2838_v23  ;;  %v881_v0 = vadd.f32 %v880_v30, %v2838_v23 }
 0x15d   : > { %v1001_v15 = vmax.f32 %v962_v50, 0.0  ;;  %v928_v63 = vadd.f32 %v927_v42, %v879_v57  ;;  %v930_v29 = vadd.f32 %v929_v34, %v881_v0 }
 0x15f   : > { %v883_v44 = vpop.f32.mrf.mxu3 }
 0x162   : > { %v963_v53 = vpop.f32.mrf.mxu0 }
 0x163   : > { %v964_v7 = vadd.f32 %v963_v53, %v915_v4  ;;  %v932_v62 = vpop.f32.mrf.mxu2 }
 0x165   : > { %v1003_v11 = vmax.f32 %v964_v7, 0.0  ;;  %v884_v7 = vadd.f32 %v883_v44, %v2838_v23 }
 0x167   : > { %v1031_v18 = vpack.c.bf16 %v1003_v11, %v1001_v15  ;;  %v885_v24 = vpop.f32.mrf.mxu3  ;;  %v933_v15 = vadd.f32 %v932_v62, %v884_v7 }
 0x168   : > { %v886_v11 = vadd.f32 %v885_v24, %v2838_v23 }
 0x169   : > { %1214 = vmatmul.bf16.gmra.mxu1 %v1040_v12  ;;  %1238 = vmatmul.bf16.gmra.mxu3 %v1031_v18  ;;  %v2195_v12 = vld [vmem:[%s3082_s5 + $0x10] sm:$0xff] }
 0x16a   : > { %v966_v59 = vpop.f32.mrf.mxu0  ;;  %1371 = vmatpush.bf16.msra.mxu2 %v2195_v12 }
 0x16b   : > { %v967_v49 = vadd.f32 %v966_v59, %v918_v45  ;;  %v934_v53 = vpop.f32.mrf.mxu2 }
 0x16c   : > { %v935_v60 = vadd.f32 %v934_v53, %v886_v11 }
 0x16d   : > { %v1005_v10 = vmax.f32 %v967_v49, 0.0 }
 0x16e   : > { %1372 = vmatpush.bf16.msra.mxu2 %v2194_v19 }
 0x16f   : > { %v888_v6 = vpop.f32.mrf.mxu3 }
 0x170   : > { %v889_v45 = vadd.f32 %v888_v6, %v2838_v23 }
 0x172   : > { %v968_v36 = vpop.f32.mrf.mxu0 }
 0x173   : > { %v969_v47 = vadd.f32 %v968_v36, %v920_v35  ;;  %v937_v18 = vpop.f32.mrf.mxu2 }
 0x174   : > { %v938_v28 = vadd.f32 %v937_v18, %v889_v45 }
 0x175   : > { %v1007_v38 = vmax.f32 %v969_v47, 0.0 }
 0x177   : > { %v1033_v26 = vpack.c.bf16 %v1007_v38, %v1005_v10  ;;  %v890_v43 = vpop.f32.mrf.mxu3 }
 0x178   : > { %v891_v20 = vadd.f32 %v890_v43, %v2838_v23 }
 0x179   : > { %1219 = vmatmul.bf16.gmra.mxu1 %v1042_v8  ;;  %1243 = vmatmul.bf16.gmra.mxu3 %v1033_v26  ;;  %v2193_v8 = vld [vmem:[%s3082_s5] sm:$0xff] }
 0x17a   : > { %v971_v33 = vpop.f32.mrf.mxu0  ;;  %1373 = vmatpush.bf16.msra.mxu2 %v2193_v8 }
 0x17b   : > { %v972_v52 = vadd.f32 %v971_v33, %v923_v13  ;;  %v939_v22 = vpop.f32.mrf.mxu2 }
 0x17c   : > { %v940_v49 = vadd.f32 %v939_v22, %v891_v20 }
 0x17d   : > { %v1009_v55 = vmax.f32 %v972_v52, 0.0 }
 0x17f   : > { %v893_v35 = vpop.f32.mrf.mxu3 }
 0x180   : > { %v894_v42 = vadd.f32 %v893_v35, %v2838_v23 }
 0x182   : > { %v973_v54 = vpop.f32.mrf.mxu0 }
 0x183   : > { %v974_v51 = vadd.f32 %v973_v54, %v925_v31  ;;  %v942_v9 = vpop.f32.mrf.mxu2 }
 0x184   : > { %v943_v13 = vadd.f32 %v942_v9, %v894_v42 }
 0x185   : > { %v1011_v56 = vmax.f32 %v974_v51, 0.0 }
 0x186   : > { %v1185_v26 = vpop.f32.mrf.mxu1 }
 0x187   : > { %v1035_v48 = vpack.c.bf16 %v1011_v56, %v1009_v55  ;;  %v895_v16 = vpop.f32.mrf.mxu3 }
 0x188   : > { %v896_v17 = vadd.f32 %v895_v16, %v2838_v23 }
 0x189   : > { %1248 = vmatmul.bf16.gmra.mxu3 %v1035_v48 }
 0x18a   : > { %v976_v58 = vpop.f32.mrf.mxu0 }
 0x18b   : > { %v977_v1 = vadd.f32 %v976_v58, %v928_v63  ;;  %v944_v41 = vpop.f32.mrf.mxu2  ;;  %v2901_v58 = vld [vmem:[%s3081_s4] ss:$0 sm:$0xff] }
 0x18c   : > { %v945_v30 = vadd.f32 %v944_v41, %v896_v17  ;;  %v1186_v23 = vadd.f32 %v2901_v58, %v1185_v26 }
 0x18d   : > { %v1013_v4 = vmax.f32 %v977_v1, 0.0 }
 0x18e   : > { %v1187_v34 = vpop.f32.mrf.mxu1 }
 0x18f   : > { %v1188_v63 = vadd.f32 %v2901_v58, %v1187_v34 }
 0x192   : > { %v978_v2 = vpop.f32.mrf.mxu0 }
 0x193   : > { %v979_v3 = vadd.f32 %v978_v2, %v930_v29 }
 0x195   : > { %v1015_v50 = vmax.f32 %v979_v3, 0.0 }
 0x196   : > { %v1190_v48 = vpop.f32.mrf.mxu1 }
 0x197   : > { %v1037_v39 = vpack.c.bf16 %v1015_v50, %v1013_v4  ;;  %v1191_v50 = vadd.f32 %v2901_v58, %v1190_v48 }
 0x199   : > { %1253 = vmatmul.bf16.gmra.mxu3 %v1037_v39 }
 0x19a   : > { %v981_v40 = vpop.f32.mrf.mxu0 }
 0x19b   : > { %v982_v21 = vadd.f32 %v981_v40, %v933_v15 }
 0x19d   : > { %v1017_v14 = vmax.f32 %v982_v21, 0.0 }
 0x19e   : > { %v1192_v44 = vpop.f32.mrf.mxu1 }
 0x19f   : > { %v1193_v53 = vadd.f32 %v2901_v58, %v1192_v44 }
 0x1a2   : > { %v983_v5 = vpop.f32.mrf.mxu0 }
 0x1a3   : > { %v984_v59 = vadd.f32 %v983_v5, %v935_v60 }
 0x1a5   : > { %v1019_v32 = vmax.f32 %v984_v59, 0.0 }
 0x1a6   : > { %v1195_v62 = vpop.f32.mrf.mxu1 }
 0x1a7   : > { %v1039_v25 = vpack.c.bf16 %v1019_v32, %v1017_v14  ;;  %v1196_v21 = vadd.f32 %v2901_v58, %v1195_v62 }
 0x1a9   : > { %1258 = vmatmul.bf16.gmra.mxu3 %v1039_v25 }
 0x1aa   : > { %v986_v27 = vpop.f32.mrf.mxu0 }
 0x1ab   : > { %v987_v36 = vadd.f32 %v986_v27, %v938_v28 }
 0x1ad   : > { %v1021_v37 = vmax.f32 %v987_v36, 0.0 }
 0x1ae   : > { %v1197_v3 = vpop.f32.mrf.mxu1 }
 0x1af   : > { %v1198_v5 = vadd.f32 %v2901_v58, %v1197_v3 }
 0x1b2   : > { %v988_v46 = vpop.f32.mrf.mxu0 }
 0x1b3   : > { %v989_v47 = vadd.f32 %v988_v46, %v940_v49 }
 0x1b5   : > { %v1023_v10 = vmax.f32 %v989_v47, 0.0 }
 0x1b6   : > { %v1200_v6 = vpop.f32.mrf.mxu1 }
 0x1b7   : > { %v1041_v38 = vpack.c.bf16 %v1023_v10, %v1021_v37  ;;  %v1201_v27 = vadd.f32 %v2901_v58, %v1200_v6 }
 0x1b9   : > { %1263 = vmatmul.bf16.gmra.mxu3 %v1041_v38 }
 0x1ba   : > { %v991_v33 = vpop.f32.mrf.mxu0 }
 0x1bb   : > { %v992_v31 = vadd.f32 %v991_v33, %v943_v13 }
 0x1bd   : > { %v1025_v51 = vmax.f32 %v992_v31, 0.0 }
 0x1be   : > { %v1202_v60 = vpop.f32.mrf.mxu1 }
 0x1bf   : > { %v1203_v28 = vadd.f32 %v2901_v58, %v1202_v60 }
 0x1c2   : > { %v993_v52 = vpop.f32.mrf.mxu0 }
 0x1c3   : > { %v994_v54 = vadd.f32 %v993_v52, %v945_v30 }
 0x1c5   : > { %v1027_v55 = vmax.f32 %v994_v54, 0.0 }
 0x1c6   : > { %v1205_v19 = vpop.f32.mrf.mxu1 }
 0x1c7   : > { %v1043_v56 = vpack.c.bf16 %v1027_v55, %v1025_v51  ;;  %v1206_v38 = vadd.f32 %v2901_v58, %v1205_v19 }
 0x1c9   : > { %1268 = vmatmul.bf16.gmra.mxu3 %v1043_v56 }
 0x1ce   : > { %v1207_v35 = vpop.f32.mrf.mxu1 }
 0x1cf   : > { %v1208_v8 = vadd.f32 %v2901_v58, %v1207_v35 }
 0x1d6   : > { %v1210_v10 = vpop.f32.mrf.mxu1 }
 0x1d7   : > { %v1211_v31 = vadd.f32 %v2901_v58, %v1210_v10 }
 0x1dc   : > { %v1234_v57 = vpop.f32.mrf.mxu3 }
 0x1dd   : > { %v1235_v0 = vadd.f32 %v1234_v57, %v1186_v23 }
 0x1de   : > { %v1212_v17 = vpop.f32.mrf.mxu1 }
 0x1df   : > { %v1274_v1 = vmax.f32 %v1235_v0, 0.0  ;;  %v1213_v54 = vadd.f32 %v2901_v58, %v1212_v17 }
 0x1e4   : > { %v1236_v61 = vpop.f32.mrf.mxu3 }
 0x1e5   : > { %v1237_v29 = vadd.f32 %v1236_v61, %v1188_v63 }
 0x1e6   : > { %v1215_v52 = vpop.f32.mrf.mxu1 }
 0x1e7   : > { %v1275_v2 = vmax.f32 %v1237_v29, 0.0  ;;  %v1216_v62 = vadd.f32 %v2901_v58, %v1215_v52 }
 0x1e9   : > { %v1290_v24 = vpack.c.bf16 %v1275_v2, %v1274_v1 }
 0x1eb   : > { %1374 = vmatmul.bf16.vlgmr.msra.gmra.mxu2 %v1290_v24 }
 0x1ec   : > { %v1239_v4 = vpop.f32.mrf.mxu3 }
 0x1ed   : > { %v1240_v39 = vadd.f32 %v1239_v4, %v1191_v50 }
 0x1ee   : > { %v1217_v57 = vpop.f32.mrf.mxu1 }
 0x1ef   : > { %v1276_v15 = vmax.f32 %v1240_v39, 0.0  ;;  %v1218_v63 = vadd.f32 %v2901_v58, %v1217_v57 }
 0x1f4   : > { %v1241_v7 = vpop.f32.mrf.mxu3 }
 0x1f5   : > { %v1242_v40 = vadd.f32 %v1241_v7, %v1193_v53 }
 0x1f6   : > { %v1220_v1 = vpop.f32.mrf.mxu1 }
 0x1f7   : > { %v1277_v11 = vmax.f32 %v1242_v40, 0.0  ;;  %v1221_v53 = vadd.f32 %v2901_v58, %v1220_v1 }
 0x1f9   : > { %v1291_v12 = vpack.c.bf16 %v1277_v11, %v1276_v15 }
 0x1fb   : > { %1379 = vmatmul.bf16.gmra.mxu2 %v1291_v12 }
 0x1fc   : > { %v1244_v18 = vpop.f32.mrf.mxu3 }
 0x1fd   : > { %v1245_v59 = vadd.f32 %v1244_v18, %v1196_v21  ;;  %v2922_v18 = vld [vmem:[%s3083_s6] ss:$0 sm:$0xff] }
 0x1fe   : > { %v1222_v50 = vpop.f32.mrf.mxu1 }
 0x1ff   : > { %v1278_v43 = vmax.f32 %v1245_v59, 0.0  ;;  %v1223_v39 = vadd.f32 %v2901_v58, %v1222_v50 }
 0x204   : > { %v1246_v14 = vpop.f32.mrf.mxu3 }
 0x205   : > { %v1247_v32 = vadd.f32 %v1246_v14, %v1198_v5 }
 0x207   : > { %v1279_v25 = vmax.f32 %v1247_v32, 0.0 }
 0x209   : > { %v1292_v45 = vpack.c.bf16 %v1279_v25, %v1278_v43 }
 0x20b   : > { %1384 = vmatmul.bf16.gmra.mxu2 %v1292_v45 }
 0x20c   : > { %v1249_v22 = vpop.f32.mrf.mxu3 }
 0x20d   : > { %v1250_v20 = vadd.f32 %v1249_v22, %v1201_v27 }
 0x20f   : > { %v1280_v46 = vmax.f32 %v1250_v20, 0.0 }
 0x214   : > { %v1251_v49 = vpop.f32.mrf.mxu3 }
 0x215   : > { %v1252_v36 = vadd.f32 %v1251_v49, %v1203_v28 }
 0x217   : > { %v1281_v47 = vmax.f32 %v1252_v36, 0.0 }
 0x219   : > { %v1293_v9 = vpack.c.bf16 %v1281_v47, %v1280_v46 }
 0x21b   : > { %1389 = vmatmul.bf16.gmra.mxu2 %v1293_v9 }
 0x21c   : > { %v1254_v37 = vpop.f32.mrf.mxu3 }
 0x21d   : > { %v1255_v26 = vadd.f32 %v1254_v37, %v1206_v38 }
 0x21f   : > { %v1282_v33 = vmax.f32 %v1255_v26, 0.0 }
 0x224   : > { %v1256_v42 = vpop.f32.mrf.mxu3 }
 0x225   : > { %v1257_v16 = vadd.f32 %v1256_v42, %v1208_v8 }
 0x227   : > { %v1283_v13 = vmax.f32 %v1257_v16, 0.0 }
 0x229   : > { %v1294_v41 = vpack.c.bf16 %v1283_v13, %v1282_v33 }
 0x22b   : > { %1394 = vmatmul.bf16.gmra.mxu2 %v1294_v41 }
 0x22c   : > { %v1259_v30 = vpop.f32.mrf.mxu3 }
 0x22d   : > { %v1260_v34 = vadd.f32 %v1259_v30, %v1211_v31 }
 0x22f   : > { %v1284_v56 = vmax.f32 %v1260_v34, 0.0 }
 0x234   : > { %v1261_v51 = vpop.f32.mrf.mxu3 }
 0x235   : > { %v1262_v55 = vadd.f32 %v1261_v51, %v1213_v54 }
 0x237   : > { %v1285_v48 = vmax.f32 %v1262_v55, 0.0 }
 0x239   : > { %v1295_v44 = vpack.c.bf16 %v1285_v48, %v1284_v56 }
 0x23b   : > { %1399 = vmatmul.bf16.gmra.mxu2 %v1295_v44 }
 0x23c   : > { %v1264_v23 = vpop.f32.mrf.mxu3 }
 0x23d   : > { %v1265_v0 = vadd.f32 %v1264_v23, %v1216_v62 }
 0x23f   : > { %v1286_v2 = vmax.f32 %v1265_v0, 0.0 }
 0x244   : > { %v1266_v61 = vpop.f32.mrf.mxu3 }
 0x245   : > { %v1267_v29 = vadd.f32 %v1266_v61, %v1218_v63 }
 0x247   : > { %v1287_v24 = vmax.f32 %v1267_v29, 0.0 }
 0x249   : > { %v1296_v3 = vpack.c.bf16 %v1287_v24, %v1286_v2 }
 0x24b   : > { %1404 = vmatmul.bf16.gmra.mxu2 %v1296_v3 }
 0x24c   : > { %v1269_v4 = vpop.f32.mrf.mxu3 }
 0x24d   : > { %v1270_v7 = vadd.f32 %v1269_v4, %v1221_v53 }
 0x24f   : > { %v1288_v15 = vmax.f32 %v1270_v7, 0.0 }
 0x254   : > { %v1271_v40 = vpop.f32.mrf.mxu3 }
 0x255   : > { %v1272_v6 = vadd.f32 %v1271_v40, %v1223_v39 }
 0x257   : > { %v1289_v11 = vmax.f32 %v1272_v6, 0.0 }
 0x259   : > { %v1297_v12 = vpack.c.bf16 %v1289_v11, %v1288_v15 }
 0x25b   : > { %1409 = vmatmul.bf16.gmra.mxu2 %v1297_v12 }
 0x26e   : > { %v1375_v60 = vpop.f32.mrf.mxu2 }
 0x26f   : > { %v2925_v21 = vadd.f32 %v2922_v18, %v1375_v60 }
 0x271   : > { %v1415_v58 = vmul.f32 %v2925_v21, %v2925_v21 }
 0x273   : > { %v1432_v5 = vsel %vm1431_vm2, %v1415_v58, 0.0 }
 0x274   : > { %1433 = vadd.xlane.f32.xlu0 %v1432_v5 }
 0x276   : > { %v1377_v59 = vpop.f32.mrf.mxu2 }
 0x277   : > { %v2931_v14 = vadd.f32 %v2922_v18, %v1377_v59 }
 0x279   : > { %v1416_v32 = vmul.f32 %v2931_v14, %v2931_v14 }
 0x27b   : > { %v1435_v43 = vsel %vm1431_vm2, %v1416_v32, 0.0 }
 0x27c   : > { %1436 = vadd.xlane.f32.xlu0 %v1435_v43 }
 0x27e   : > { %v1380_v25 = vpop.f32.mrf.mxu2 }
 0x27f   : > { %v2937_v45 = vadd.f32 %v2922_v18, %v1380_v25 }
 0x281   : > { %v1417_v19 = vmul.f32 %v2937_v45, %v2937_v45 }
 0x283   : > { %v1438_v22 = vsel %vm1431_vm2, %v1417_v19, 0.0 }
 0x284   : > { %1439 = vadd.xlane.f32.xlu1 %v1438_v22 }
 0x286   : > { %v1382_v27 = vpop.f32.mrf.mxu2 }
 0x287   : > { %v2943_v28 = vadd.f32 %v2922_v18, %v1382_v27 }
 0x289   : > { %v1418_v20 = vmul.f32 %v2943_v28, %v2943_v28 }
 0x28b   : > { %v1441_v35 = vsel %vm1431_vm2, %v1418_v20, 0.0 }
 0x28c   : > { %1442 = vadd.xlane.f32.xlu1 %v1441_v35 }
 0x28e   : > { %v1385_v49 = vpop.f32.mrf.mxu2 }
 0x28f   : > { %v2949_v36 = vadd.f32 %v2922_v18, %v1385_v49 }
 0x291   : > { %v1419_v46 = vmul.f32 %v2949_v36, %v2949_v36 }
 0x293   : > { %v1444_v47 = vsel %vm1431_vm2, %v1419_v46, 0.0 }
 0x294   : > { %1445 = vadd.xlane.f32.xlu2 %v1444_v47 }
 0x296   : > { %v1387_v9 = vpop.f32.mrf.mxu2 }
 0x297   : > { %v2955_v37 = vadd.f32 %v2922_v18, %v1387_v9 }
 0x299   : > { %v1420_v10 = vmul.f32 %v2955_v37, %v2955_v37 }
 0x29b   : > { %v1447_v38 = vsel %vm1431_vm2, %v1420_v10, 0.0 }
 0x29c   : > { %1448 = vadd.xlane.f32.xlu2 %v1447_v38 }
 0x29e   : > { %v1390_v8 = vpop.f32.mrf.mxu2 }
 0x29f   : > { %v2961_v26 = vadd.f32 %v2922_v18, %v1390_v8 }
 0x2a1   : > { %v1421_v42 = vmul.f32 %v2961_v26, %v2961_v26 }
 0x2a3   : > { %v1450_v16 = vsel %vm1431_vm2, %v1421_v42, 0.0 }
 0x2a4   : > { %1451 = vadd.xlane.f32.xlu0 %v1450_v16 }
 0x2a6   : > { %v1392_v33 = vpop.f32.mrf.mxu2 }
 0x2a7   : > { %v2967_v13 = vadd.f32 %v2922_v18, %v1392_v33 }
 0x2a9   : > { %v1422_v17 = vmul.f32 %v2967_v13, %v2967_v13 }
 0x2ab   : > { %v1453_v41 = vsel %vm1431_vm2, %v1422_v17, 0.0 }
 0x2ac   : > { %1454 = vadd.xlane.f32.xlu1 %v1453_v41 }
 0x2ae   : > { %v1395_v30 = vpop.f32.mrf.mxu2 }
 0x2af   : > { %v2973_v31 = vadd.f32 %v2922_v18, %v1395_v30 }
 0x2b1   : > { %v1423_v52 = vmul.f32 %v2973_v31, %v2973_v31 }
 0x2b3   : > { %v1456_v54 = vsel %vm1431_vm2, %v1423_v52, 0.0 }
 0x2b4   : > { %1457 = vadd.xlane.f32.xlu2 %v1456_v54 }
 0x2b6   : > { %v1397_v34 = vpop.f32.mrf.mxu2 }
 0x2b7   : > { %v2979_v51 = vadd.f32 %v2922_v18, %v1397_v34 }
 0x2b9   : > { %v1424_v55 = vmul.f32 %v2979_v51, %v2979_v51 }
 0x2bb   : > { %v1459_v56 = vsel %vm1431_vm2, %v1424_v55, 0.0 }
 0x2bc   : > { %1460 = vadd.xlane.f32.xlu0 %v1459_v56 }
 0x2be   : > { %v1400_v48 = vpop.f32.mrf.mxu2 }
 0x2bf   : > { %v2985_v44 = vadd.f32 %v2922_v18, %v1400_v48 }
 0x2c1   : > { %v1425_v57 = vmul.f32 %v2985_v44, %v2985_v44 }
 0x2c3   : > { %v1462_v23 = vsel %vm1431_vm2, %v1425_v57, 0.0 }
 0x2c4   : > { %1463 = vadd.xlane.f32.xlu1 %v1462_v23 }
 0x2c6   : > { %v1402_v62 = vpop.f32.mrf.mxu2 }
 0x2c7   : > { %v2991_v63 = vadd.f32 %v2922_v18, %v1402_v62 }
 0x2c9   : > { %v1426_v0 = vmul.f32 %v2991_v63, %v2991_v63 }
 0x2cb   : > { %v1465_v61 = vsel %vm1431_vm2, %v1426_v0, 0.0 }
 0x2cc   : > { %1466 = vadd.xlane.f32.xlu2 %v1465_v61 }
 0x2ce   : > { %v1405_v29 = vpop.f32.mrf.mxu2 }
 0x2cf   : > { %v2997_v1 = vadd.f32 %v2922_v18, %v1405_v29 }
 0x2d1   : > { %v1427_v2 = vmul.f32 %v2997_v1, %v2997_v1 }
 0x2d3   : > { %v1468_v24 = vsel %vm1431_vm2, %v1427_v2, 0.0 }
 0x2d4   : > { %1469 = vadd.xlane.f32.xlu0 %v1468_v24 }
 0x2d6   : > { %v1407_v3 = vpop.f32.mrf.mxu2 }
 0x2d7   : > { %v3003_v4 = vadd.f32 %v2922_v18, %v1407_v3 }
 0x2d9   : > { %v1428_v50 = vmul.f32 %v3003_v4, %v3003_v4 }
 0x2db   : > { %v1471_v53 = vsel %vm1431_vm2, %v1428_v50, 0.0 }
 0x2dc   : > { %1472 = vadd.xlane.f32.xlu1 %v1471_v53 }
 0x2de   : > { %v1410_v39 = vpop.f32.mrf.mxu2 }
 0x2df   : > { %v3009_v7 = vadd.f32 %v2922_v18, %v1410_v39 }
 0x2e1   : > { %v1429_v40 = vmul.f32 %v3009_v7, %v3009_v7 }
 0x2e3   : > { %v1474_v6 = vsel %vm1431_vm2, %v1429_v40, 0.0 }
 0x2e4   : > { %1475 = vadd.xlane.f32.xlu2 %v1474_v6 }
 0x2e6   : > { %v1412_v15 = vpop.f32.mrf.mxu2 }
 0x2e7   : > { %v3015_v11 = vadd.f32 %v2922_v18, %v1412_v15  ;;  %v1434_v12 = vpop.xlane.xlu0 %1433 }
 0x2e8   : > { %v1480_v60 = vmax.f32 %v1434_v12, 1e-24 }
 0x2e9   : > { %v1430_v58 = vmul.f32 %v3015_v11, %v3015_v11 }
 0x2ea   : > { %2231 = vrsqrt.f32 %v1480_v60  ;;  %vm1502_vm4 = vweird.f32 %v1480_v60 }
 0x2eb   : > { %v1477_v5 = vsel %vm1431_vm2, %v1430_v58, 0.0 }
 0x2ec   : > { %1478 = vadd.xlane.f32.xlu0 %v1477_v5 }
 0x2ef   : > { %v1437_v59 = vpop.xlane.xlu0 %1436 }
 0x2f0   : > { %v2232_v32 = vpop.eup %2231  ;;  %v1481_v43 = vmax.f32 %v1437_v59, 1e-24 }
 0x2f1   : > { %v1497_v25 = vmul.f32 %v2232_v32, %v1480_v60  ;;  %vm1503_vm3 = vweird.f32 %v2232_v32 }
 0x2f2   : > { %2233 = vrsqrt.f32 %v1481_v43  ;;  %vm1504_vm5 = vmor %vm1502_vm4, %vm1503_vm3  ;;  %vm1512_vm7 = vweird.f32 %v1481_v43 }
 0x2f3   : > { %v1498_v19 = vmul.f32 %v2232_v32, %v1497_v25 }
 0x2f5   : > { %v1499_v22 = vmul.f32 0.5, %v1498_v19 }
 0x2f7   : > { %v1500_v27 = vsub.f32 1.5, %v1499_v22  ;;  %v1440_v18 = vpop.xlane.xlu1 %1439 }
 0x2f8   : > { %v2234_v20 = vpop.eup %2233  ;;  %v1482_v35 = vmax.f32 %v1440_v18, 1e-24 }
 0x2f9   : > { %v1501_v49 = vmul.f32 %v2232_v32, %v1500_v27  ;;  %v1507_v46 = vmul.f32 %v2234_v20, %v1481_v43  ;;  %vm1513_vm6 = vweird.f32 %v2234_v20 }
 0x2fa   : > { %2235 = vrsqrt.f32 %v1482_v35  ;;  %vm1514_vm8 = vmor %vm1512_vm7, %vm1513_vm6  ;;  %vm1522_vm10 = vweird.f32 %v1482_v35 }
 0x2fb   : > { %v1505_v47 = vsel %vm1504_vm5, %v2232_v32, %v1501_v49  ;;  %v1508_v9 = vmul.f32 %v2234_v20, %v1507_v46 }
 0x2fc   : > { %v1656_v10 = vmul.f32 %v1505_v47, %v2925_v21 }
 0x2fd   : > { %v1509_v38 = vmul.f32 0.5, %v1508_v9 }
 0x2fe   : > { %1672 = vst.msk [vmem:[%s3024_s11] sm:$0xff] %vm1431_vm2, %v1656_v10 }
 0x2ff   : > { %v1510_v8 = vsub.f32 1.5, %v1509_v38  ;;  %v1443_v42 = vpop.xlane.xlu1 %1442 }
 0x300   : > { %v2236_v16 = vpop.eup %2235  ;;  %v1483_v33 = vmax.f32 %v1443_v42, 1e-24 }
 0x301   : > { %v1511_v17 = vmul.f32 %v2234_v20, %v1510_v8  ;;  %v1517_v41 = vmul.f32 %v2236_v16, %v1482_v35  ;;  %vm1523_vm9 = vweird.f32 %v2236_v16 }
 0x302   : > { %2237 = vrsqrt.f32 %v1483_v33  ;;  %vm1524_vm11 = vmor %vm1522_vm10, %vm1523_vm9  ;;  %vm1532_vm13 = vweird.f32 %v1483_v33 }
 0x303   : > { %v1515_v30 = vsel %vm1514_vm8, %v2234_v20, %v1511_v17  ;;  %v1518_v52 = vmul.f32 %v2236_v16, %v1517_v41 }
 0x304   : > { %v1657_v54 = vmul.f32 %v1515_v30, %v2931_v14 }
 0x305   : > { %v1519_v34 = vmul.f32 0.5, %v1518_v52 }
 0x306   : > { %1673 = vst.msk [vmem:[%s3024_s11 + $0x8] sm:$0xff] %vm1431_vm2, %v1657_v54 }
 0x307   : > { %v1520_v21 = vsub.f32 1.5, %v1519_v34  ;;  %v1446_v55 = vpop.xlane.xlu2 %1445 }
 0x308   : > { %v2238_v56 = vpop.eup %2237  ;;  %v1484_v48 = vmax.f32 %v1446_v55, 1e-24 }
 0x309   : > { %v1521_v57 = vmul.f32 %v2236_v16, %v1520_v21  ;;  %v1527_v23 = vmul.f32 %v2238_v56, %v1483_v33  ;;  %vm1533_vm12 = vweird.f32 %v2238_v56 }
 0x30a   : > { %2239 = vrsqrt.f32 %v1484_v48  ;;  %vm1534_vm14 = vmor %vm1532_vm13, %vm1533_vm12  ;;  %vm1542_vm0 = vweird.f32 %v1484_v48 }
 0x30b   : > { %v1525_v62 = vsel %vm1524_vm11, %v2236_v16, %v1521_v57  ;;  %v1528_v0 = vmul.f32 %v2238_v56, %v1527_v23 }
 0x30c   : > { %v1658_v61 = vmul.f32 %v1525_v62, %v2937_v45 }
 0x30d   : > { %v1529_v29 = vmul.f32 0.5, %v1528_v0 }
 0x30e   : > { %1674 = vst.msk [vmem:[%s3024_s11 + $0x10] sm:$0xff] %vm1431_vm2, %v1658_v61 }
 0x30f   : > { %v1530_v14 = vsub.f32 1.5, %v1529_v29  ;;  %v1449_v2 = vpop.xlane.xlu2 %1448 }
 0x310   : > { %v2240_v24 = vpop.eup %2239  ;;  %v1485_v3 = vmax.f32 %v1449_v2, 1e-24 }
 0x311   : > { %v1531_v50 = vmul.f32 %v2238_v56, %v1530_v14  ;;  %v1537_v53 = vmul.f32 %v2240_v24, %v1484_v48  ;;  %vm1543_vm15 = vweird.f32 %v2240_v24 }
 0x312   : > { %2241 = vrsqrt.f32 %v1485_v3  ;;  %vm1544_vm1 = vmor %vm1542_vm0, %vm1543_vm15  ;;  %vm1552_vm4 = vweird.f32 %v1485_v3 }
 0x313   : > { %v1535_v39 = vsel %vm1534_vm14, %v2238_v56, %v1531_v50  ;;  %v1538_v40 = vmul.f32 %v2240_v24, %v1537_v53 }
 0x314   : > { %v1659_v6 = vmul.f32 %v1535_v39, %v2943_v28 }
 0x315   : > { %v1539_v15 = vmul.f32 0.5, %v1538_v40 }
 0x316   : > { %1675 = vst.msk [vmem:[%s3024_s11 + $0x18] sm:$0xff] %vm1431_vm2, %v1659_v6 }
 0x317   : > { %v1540_v45 = vsub.f32 1.5, %v1539_v15  ;;  %v1452_v12 = vpop.xlane.xlu0 %1451 }
 0x318   : > { %v2242_v60 = vpop.eup %2241  ;;  %v1486_v58 = vmax.f32 %v1452_v12, 1e-24 }
 0x319   : > { %v1541_v5 = vmul.f32 %v2240_v24, %v1540_v45  ;;  %v1547_v59 = vmul.f32 %v2242_v60, %v1485_v3  ;;  %vm1553_vm3 = vweird.f32 %v2242_v60 }
 0x31a   : > { %2243 = vrsqrt.f32 %v1486_v58  ;;  %vm1554_vm5 = vmor %vm1552_vm4, %vm1553_vm3  ;;  %vm1562_vm7 = vweird.f32 %v1486_v58 }
 0x31b   : > { %v1545_v32 = vsel %vm1544_vm1, %v2240_v24, %v1541_v5  ;;  %v1548_v43 = vmul.f32 %v2242_v60, %v1547_v59 }
 0x31c   : > { %v1660_v25 = vmul.f32 %v1545_v32, %v2949_v36 }
 0x31d   : > { %v1549_v19 = vmul.f32 0.5, %v1548_v43 }
 0x31e   : > { %1676 = vst.msk [vmem:[%s3024_s11 + $0x20] sm:$0xff] %vm1431_vm2, %v1660_v25 }
 0x31f   : > { %v1550_v28 = vsub.f32 1.5, %v1549_v19  ;;  %v1455_v22 = vpop.xlane.xlu1 %1454 }
 0x320   : > { %v2244_v27 = vpop.eup %2243  ;;  %v1487_v18 = vmax.f32 %v1455_v22, 1e-24 }
 0x321   : > { %v1551_v20 = vmul.f32 %v2242_v60, %v1550_v28  ;;  %v1557_v35 = vmul.f32 %v2244_v27, %v1486_v58  ;;  %vm1563_vm6 = vweird.f32 %v2244_v27 }
 0x322   : > { %2245 = vrsqrt.f32 %v1487_v18  ;;  %vm1564_vm8 = vmor %vm1562_vm7, %vm1563_vm6  ;;  %vm1572_vm10 = vweird.f32 %v1487_v18 }
 0x323   : > { %v1555_v49 = vsel %vm1554_vm5, %v2242_v60, %v1551_v20  ;;  %v1558_v46 = vmul.f32 %v2244_v27, %v1557_v35 }
 0x324   : > { %v1661_v47 = vmul.f32 %v1555_v49, %v2955_v37 }
 0x325   : > { %v1559_v9 = vmul.f32 0.5, %v1558_v46 }
 0x326   : > { %1677 = vst.msk [vmem:[%s3024_s11 + $0x28] sm:$0xff] %vm1431_vm2, %v1661_v47 }
 0x327   : > { %v1560_v36 = vsub.f32 1.5, %v1559_v9  ;;  %v1458_v10 = vpop.xlane.xlu2 %1457 }
 0x328   : > { %v2246_v38 = vpop.eup %2245  ;;  %v1488_v8 = vmax.f32 %v1458_v10, 1e-24 }
 0x329   : > { %v1561_v42 = vmul.f32 %v2244_v27, %v1560_v36  ;;  %v1567_v16 = vmul.f32 %v2246_v38, %v1487_v18  ;;  %vm1573_vm9 = vweird.f32 %v2246_v38 }
 0x32a   : > { %2247 = vrsqrt.f32 %v1488_v8  ;;  %vm1574_vm11 = vmor %vm1572_vm10, %vm1573_vm9  ;;  %vm1582_vm13 = vweird.f32 %v1488_v8 }
 0x32b   : > { %v1565_v33 = vsel %vm1564_vm8, %v2244_v27, %v1561_v42  ;;  %v1568_v17 = vmul.f32 %v2246_v38, %v1567_v16 }
 0x32c   : > { %v1662_v41 = vmul.f32 %v1565_v33, %v2961_v26 }
 0x32d   : > { %v1569_v30 = vmul.f32 0.5, %v1568_v17 }
 0x32e   : > { %1678 = vst.msk [vmem:[%s3024_s11 + $0x30] sm:$0xff] %vm1431_vm2, %v1662_v41 }
 0x32f   : > { %v1570_v37 = vsub.f32 1.5, %v1569_v30  ;;  %v1461_v52 = vpop.xlane.xlu0 %1460 }
 0x330   : > { %v2248_v54 = vpop.eup %2247  ;;  %v1489_v34 = vmax.f32 %v1461_v52, 1e-24 }
 0x331   : > { %v1571_v21 = vmul.f32 %v2246_v38, %v1570_v37  ;;  %v1577_v55 = vmul.f32 %v2248_v54, %v1488_v8  ;;  %vm1583_vm12 = vweird.f32 %v2248_v54 }
 0x332   : > { %2249 = vrsqrt.f32 %v1489_v34  ;;  %vm1584_vm14 = vmor %vm1582_vm13, %vm1583_vm12  ;;  %vm1592_vm0 = vweird.f32 %v1489_v34 }
 0x333   : > { %v1575_v56 = vsel %vm1574_vm11, %v2246_v38, %v1571_v21  ;;  %v1578_v48 = vmul.f32 %v2248_v54, %v1577_v55 }
 0x334   : > { %v1663_v57 = vmul.f32 %v1575_v56, %v2967_v13 }
 0x335   : > { %v1579_v23 = vmul.f32 0.5, %v1578_v48 }
 0x336   : > { %1679 = vst.msk [vmem:[%s3024_s11 + $0x38] sm:$0xff] %vm1431_vm2, %v1663_v57 }
 0x337   : > { %v1580_v26 = vsub.f32 1.5, %v1579_v23  ;;  %v1464_v62 = vpop.xlane.xlu1 %1463 }
 0x338   : > { %v2250_v0 = vpop.eup %2249  ;;  %v1490_v61 = vmax.f32 %v1464_v62, 1e-24 }
 0x339   : > { %v1581_v29 = vmul.f32 %v2248_v54, %v1580_v26  ;;  %v1587_v14 = vmul.f32 %v2250_v0, %v1489_v34  ;;  %vm1593_vm15 = vweird.f32 %v2250_v0 }
 0x33a   : > { %2251 = vrsqrt.f32 %v1490_v61  ;;  %vm1594_vm1 = vmor %vm1592_vm0, %vm1593_vm15  ;;  %vm1602_vm4 = vweird.f32 %v1490_v61 }
 0x33b   : > { %v1585_v2 = vsel %vm1584_vm14, %v2248_v54, %v1581_v29  ;;  %v1588_v24 = vmul.f32 %v2250_v0, %v1587_v14 }
 0x33c   : > { %v1664_v3 = vmul.f32 %v1585_v2, %v2973_v31 }
 0x33d   : > { %v1589_v50 = vmul.f32 0.5, %v1588_v24 }
 0x33e   : > { %1680 = vst.msk [vmem:[%s3024_s11 + $0x40] sm:$0xff] %vm1431_vm2, %v1664_v3 }
 0x33f   : > { %v1590_v13 = vsub.f32 1.5, %v1589_v50  ;;  %v1467_v53 = vpop.xlane.xlu2 %1466 }
 0x340   : > { %v2252_v39 = vpop.eup %2251  ;;  %v1491_v40 = vmax.f32 %v1467_v53, 1e-24 }
 0x341   : > { %v1591_v6 = vmul.f32 %v2250_v0, %v1590_v13  ;;  %v1597_v15 = vmul.f32 %v2252_v39, %v1490_v61  ;;  %vm1603_vm3 = vweird.f32 %v2252_v39 }
 0x342   : > { %2253 = vrsqrt.f32 %v1491_v40  ;;  %vm1604_vm5 = vmor %vm1602_vm4, %vm1603_vm3  ;;  %vm1612_vm7 = vweird.f32 %v1491_v40 }
 0x343   : > { %v1595_v45 = vsel %vm1594_vm1, %v2250_v0, %v1591_v6  ;;  %v1598_v12 = vmul.f32 %v2252_v39, %v1597_v15 }
 0x344   : > { %v1665_v60 = vmul.f32 %v1595_v45, %v2979_v51 }
 0x345   : > { %v1599_v58 = vmul.f32 0.5, %v1598_v12 }
 0x346   : > { %1681 = vst.msk [vmem:[%s3024_s11 + $0x48] sm:$0xff] %vm1431_vm2, %v1665_v60 }
 0x347   : > { %v1600_v31 = vsub.f32 1.5, %v1599_v58  ;;  %v1470_v5 = vpop.xlane.xlu0 %1469 }
 0x348   : > { %v2254_v59 = vpop.eup %2253  ;;  %v1492_v32 = vmax.f32 %v1470_v5, 1e-24 }
 0x349   : > { %v1601_v43 = vmul.f32 %v2252_v39, %v1600_v31  ;;  %v1607_v25 = vmul.f32 %v2254_v59, %v1491_v40  ;;  %vm1613_vm6 = vweird.f32 %v2254_v59 }
 0x34a   : > { %2255 = vrsqrt.f32 %v1492_v32  ;;  %vm1614_vm8 = vmor %vm1612_vm7, %vm1613_vm6  ;;  %vm1622_vm10 = vweird.f32 %v1492_v32 }
 0x34b   : > { %v1605_v19 = vsel %vm1604_vm5, %v2252_v39, %v1601_v43  ;;  %v1608_v28 = vmul.f32 %v2254_v59, %v1607_v25 }
 0x34c   : > { %v1666_v22 = vmul.f32 %v1605_v19, %v2985_v44 }
 0x34d   : > { %v1609_v27 = vmul.f32 0.5, %v1608_v28 }
 0x34e   : > { %1682 = vst.msk [vmem:[%s3024_s11 + $0x50] sm:$0xff] %vm1431_vm2, %v1666_v22 }
 0x34f   : > { %v1610_v51 = vsub.f32 1.5, %v1609_v27  ;;  %v1473_v18 = vpop.xlane.xlu1 %1472 }
 0x350   : > { %v2256_v20 = vpop.eup %2255  ;;  %v1493_v35 = vmax.f32 %v1473_v18, 1e-24 }
 0x351   : > { %v1611_v49 = vmul.f32 %v2254_v59, %v1610_v51  ;;  %v1617_v46 = vmul.f32 %v2256_v20, %v1492_v32  ;;  %vm1623_vm9 = vweird.f32 %v2256_v20 }
 0x352   : > { %2257 = vrsqrt.f32 %v1493_v35  ;;  %vm1624_vm11 = vmor %vm1622_vm10, %vm1623_vm9  ;;  %vm1632_vm13 = vweird.f32 %v1493_v35 }
 0x353   : > { %v1615_v47 = vsel %vm1614_vm8, %v2254_v59, %v1611_v49  ;;  %v1618_v9 = vmul.f32 %v2256_v20, %v1617_v46 }
 0x354   : > { %v1667_v36 = vmul.f32 %v1615_v47, %v2991_v63 }
 0x355   : > { %v1619_v10 = vmul.f32 0.5, %v1618_v9 }
 0x356   : > { %1683 = vst.msk [vmem:[%s3024_s11 + $0x58] sm:$0xff] %vm1431_vm2, %v1667_v36 }
 0x357   : > { %v1620_v44 = vsub.f32 1.5, %v1619_v10  ;;  %v1476_v38 = vpop.xlane.xlu2 %1475 }
 0x358   : > { %v2258_v8 = vpop.eup %2257  ;;  %v1494_v42 = vmax.f32 %v1476_v38, 1e-24 }
 0x359   : > { %v1621_v16 = vmul.f32 %v2256_v20, %v1620_v44  ;;  %v1627_v33 = vmul.f32 %v2258_v8, %v1493_v35  ;;  %vm1633_vm12 = vweird.f32 %v2258_v8 }
 0x35a   : > { %2259 = vrsqrt.f32 %v1494_v42  ;;  %vm1634_vm14 = vmor %vm1632_vm13, %vm1633_vm12  ;;  %vm1642_vm0 = vweird.f32 %v1494_v42 }
 0x35b   : > { %v1625_v17 = vsel %vm1624_vm11, %v2256_v20, %v1621_v16  ;;  %v1628_v41 = vmul.f32 %v2258_v8, %v1627_v33 }
 0x35c   : > { %v1668_v30 = vmul.f32 %v1625_v17, %v2997_v1 }
 0x35d   : > { %v1629_v37 = vmul.f32 0.5, %v1628_v41 }
 0x35e   : > { %1684 = vst.msk [vmem:[%s3024_s11 + $0x60] sm:$0xff] %vm1431_vm2, %v1668_v30 }
 0x35f   : > { %v1630_v63 = vsub.f32 1.5, %v1629_v37  ;;  %v1479_v52 = vpop.xlane.xlu0 %1478 }
 0x360   : > { %v2260_v54 = vpop.eup %2259  ;;  %v1495_v34 = vmax.f32 %v1479_v52, 1e-24 }
 0x361   : > { %v1631_v21 = vmul.f32 %v2258_v8, %v1630_v63  ;;  %v1637_v55 = vmul.f32 %v2260_v54, %v1494_v42  ;;  %vm1643_vm15 = vweird.f32 %v2260_v54 }
 0x362   : > { %2261 = vrsqrt.f32 %v1495_v34  ;;  %vm1644_vm1 = vmor %vm1642_vm0, %vm1643_vm15  ;;  %vm1652_vm4 = vweird.f32 %v1495_v34 }
 0x363   : > { %v1635_v56 = vsel %vm1634_vm14, %v2258_v8, %v1631_v21  ;;  %v1638_v48 = vmul.f32 %v2260_v54, %v1637_v55 }
 0x364   : > { %v1669_v57 = vmul.f32 %v1635_v56, %v3003_v4 }
 0x365   : > { %v1639_v1 = vmul.f32 0.5, %v1638_v48 }
 0x366   : > { %1685 = vst.msk [vmem:[%s3024_s11 + $0x68] sm:$0xff] %vm1431_vm2, %v1669_v57 }
 0x367   : > { %v1640_v23 = vsub.f32 1.5, %v1639_v1 }
 0x368   : > { %v2262_v26 = vpop.eup %2261 }
 0x369   : > { %v1641_v62 = vmul.f32 %v2260_v54, %v1640_v23  ;;  %v1647_v0 = vmul.f32 %v2262_v26, %v1495_v34  ;;  %vm1653_vm3 = vweird.f32 %v2262_v26 }
 0x36a   : > { %vm1654_vm5 = vmor %vm1652_vm4, %vm1653_vm3 }
 0x36b   : > { %v1645_v61 = vsel %vm1644_vm1, %v2260_v54, %v1641_v62  ;;  %v1648_v29 = vmul.f32 %v2262_v26, %v1647_v0 }
 0x36c   : > { %v1670_v14 = vmul.f32 %v1645_v61, %v3009_v7 }
 0x36d   : > { %v1649_v2 = vmul.f32 0.5, %v1648_v29 }
 0x36e   : > { %1686 = vst.msk [vmem:[%s3024_s11 + $0x70] sm:$0xff] %vm1431_vm2, %v1670_v14 }
 0x36f   : > { %v1650_v24 = vsub.f32 1.5, %v1649_v2 }
 0x371   : > { %v1651_v4 = vmul.f32 %v2262_v26, %v1650_v24 }
 0x373   : > { %v1655_v3 = vsel %vm1654_vm5, %v2262_v26, %v1651_v4 }
 0x374   : > { %v1671_v50 = vmul.f32 %v1655_v3, %v3015_v11 }
 0x376   : > { %1687 = vst.msk [vmem:[%s3024_s11 + $0x78] sm:$0xff] %vm1431_vm2, %v1671_v50 }
 0x377 PF: > { %s17_s24 = sadd.s32 1, %s2269_s24  }
 0x378   : > { %p14_p4 = scmp.ge.s32.totalorder %s17_s24, 4  }
 0x37a   :  { %16 = sbr.rel (!%p14_p4) target bundleno = 1 (0x1), region = 78 }

</bundles_post_ra>
